<compile_context>
chip_gen: v5e
topology: v5e:2x2
jax: 0.10.0
libtpu: 0.0.40
codegen_flags: <defaults>
</compile_context>

<pallas_src>
import math
import numpy as np
import jax
import jax.numpy as jnp
from jax import lax
from jax.experimental import pallas as pl
from jax.experimental.pallas import tpu as pltpu

PAD_token = 1


def _round_up(x, m):
    return ((x + m - 1) // m) * m


# ---------------------------------------------------------------------------
# Pallas kernel: one time-tile of the bidirectional GRU recurrence
#   - prologue: fused input projection for both directions (one big MXU matmul)
#   - serial loop: merged fwd+bwd GRU cell, masked variable-length updates
#   - epilogue (last time tile): fused Linear(2H -> H) output projection
# ---------------------------------------------------------------------------
def encoder_gru_kernel(emb_ref, len_ref, wih_ref, whh_ref, bgx_ref, bnh_ref,
                       wout_ref, bout_ref, out_ref, h_ref, gx_ref):
    t_idx = pl.program_id(1)
    num_t = pl.num_programs(1)
    Tt, Bt, H2 = emb_ref.shape          # (T_tile, B_tile, 2*Hp)
    Hp = H2 // 2
    T_total = num_t * Tt

    @pl.when(t_idx == 0)
    def _():
        h_ref[...] = jnp.zeros_like(h_ref)

    # ---- Tile prologue: fused input projection, off the serial critical path ----
    # emb tile is [emb_fwd | emb_rev] along features; block-diagonal W_ih produces
    # gate-interleaved pre-activations [r_f, r_b, z_f, z_b, n_f, n_b] for all Tt steps.
    emb2d = emb_ref[...].reshape(Tt * Bt, H2)                        # bf16
    gx = jnp.dot(emb2d, wih_ref[...],
                 preferred_element_type=jnp.float32) + bgx_ref[...]  # (Tt*Bt, 6Hp) f32
    gx_ref[...] = gx.reshape(Tt, Bt, 6 * Hp)

    # ---- Hoisted loop-invariants -------------------------------------------------
    whh = whh_ref[...]                                               # (2Hp, 6Hp) bf16
    bnh = bnh_ref[...]                                               # (1, 2Hp) f32, n-gate b_hh
    lens = len_ref[...]                                              # (Bt, 1) int32
    is_fwd = lax.broadcasted_iota(jnp.int32, (1, 2 * Hp), 1) < Hp    # column -> direction

    # ---- Serial recurrence over the tile's timesteps -----------------------------
    def step(s, h):
        # h: (Bt, 2Hp) f32 = [h_f | h_b]
        gx_s = gx_ref[s]                                             # (Bt, 6Hp) f32
        gh = jnp.dot(h.astype(jnp.bfloat16), whh,
                     preferred_element_type=jnp.float32)             # one merged MXU push
        r = jax.nn.sigmoid(gx_s[:, 0:2 * Hp] + gh[:, 0:2 * Hp])
        z = jax.nn.sigmoid(gx_s[:, 2 * Hp:4 * Hp] + gh[:, 2 * Hp:4 * Hp])
        n = jnp.tanh(gx_s[:, 4 * Hp:] + r * (gh[:, 4 * Hp:] + bnh))
        h_new = (1.0 - z) * n + z * h

        # pack_padded_sequence emulation: fwd half updates while t < len,
        # bwd half (reversed stream) updates while (T_total-1-t) < len.
        tf = t_idx * Tt + s
        t_eff = jnp.where(is_fwd, tf, T_total - 1 - tf)              # (1, 2Hp) int32
        mask = t_eff < lens                                          # (Bt, 2Hp) bool
        return jnp.where(mask, h_new, h)

    h = lax.fori_loop(0, Tt, step, h_ref[...], unroll=4)
    h_ref[...] = h

    # ---- Epilogue: Linear(2H -> H) on [h_f | h_b], no concat needed --------------
    @pl.when(t_idx == num_t - 1)
    def _():
        out_ref[...] = (jnp.dot(h.astype(jnp.bfloat16), wout_ref[...],
                                preferred_element_type=jnp.float32)
                        + bout_ref[...])


# ---------------------------------------------------------------------------
# Weight re-packing helpers (wrapper-side, XLA):
#   per-direction (H, 3H) [r|z|n] weights -> padded, gate-interleaved block-diagonal
#   (2Hp, 6Hp) with columns [r_f, r_b, z_f, z_b, n_f, n_b].
# ---------------------------------------------------------------------------
def _blockdiag_gru_weights(w_f, w_b, H, Hp):
    out = jnp.zeros((2 * Hp, 6 * Hp), jnp.float32)
    for g in range(3):
        out = out.at[0:H, (2 * g) * Hp:(2 * g) * Hp + H].set(w_f[:, g * H:(g + 1) * H])
        out = out.at[Hp:Hp + H, (2 * g + 1) * Hp:(2 * g + 1) * Hp + H].set(
            w_b[:, g * H:(g + 1) * H])
    return out


def _interleave_gru_bias(b_f, b_b, H, Hp):
    out = jnp.zeros((1, 6 * Hp), jnp.float32)
    for g in range(3):
        out = out.at[:, (2 * g) * Hp:(2 * g) * Hp + H].set(b_f[:, g * H:(g + 1) * H])
        out = out.at[:, (2 * g + 1) * Hp:(2 * g + 1) * Hp + H].set(b_b[:, g * H:(g + 1) * H])
    return out


# ---------------------------------------------------------------------------
# Wrapper
# ---------------------------------------------------------------------------
def encoder_forward(tokens, lengths, params, *, t_tile=32, b_tile=8):
    """tokens: (T, B, M) int32, lengths: (B,) int32. Returns (B, H) float32."""
    T, B, M = tokens.shape
    H = params["hidden_size"]
    Hp = _round_up(H, 128)                      # lane-aligned hidden size
    Bp = _round_up(B, b_tile)                   # sublane-aligned batch (b_tile % 8 == 0)
    Tt = t_tile
    Tp = _round_up(T, Tt)                       # time padded to a whole number of tiles

    # --- XLA glue: embedding gather (PAD row is zero) + memory-axis sum -----------
    emb = params["embedding"][tokens].astype(jnp.float32).sum(axis=2)       # (T, B, H)
    # TODO(synk): dropout is identity in eval mode; training-mode dropout not modeled.

    # Pad to (Tp, Bp, Hp); build [fwd | time-reversed] feature-concat stream (bf16).
    emb_p = jnp.zeros((Tp, Bp, Hp), jnp.float32).at[:T, :B, :H].set(emb)
    emb_cat = jnp.concatenate([emb_p, jnp.flip(emb_p, axis=0)],
                              axis=-1).astype(jnp.bfloat16)                 # (Tp, Bp, 2Hp)

    lens = jnp.zeros((Bp, 1), jnp.int32).at[:B, 0].set(lengths.astype(jnp.int32))

    # --- Weight packing (block-diagonal, gate-interleaved, padded) -----------------
    wih = _blockdiag_gru_weights(params["w_ih_f"], params["w_ih_b"], H, Hp).astype(jnp.bfloat16)
    whh = _blockdiag_gru_weights(params["w_hh_f"], params["w_hh_b"], H, Hp).astype(jnp.bfloat16)
    b_ih = _interleave_gru_bias(params["b_ih_f"], params["b_ih_b"], H, Hp)
    b_hh = _interleave_gru_bias(params["b_hh_f"], params["b_hh_b"], H, Hp)
    b_gx = b_ih.at[:, :4 * Hp].add(b_hh[:, :4 * Hp])   # fold b_hh of r,z gates into gx bias
    b_nh = b_hh[:, 4 * Hp:]                            # n-gate hidden bias [n_f | n_b], (1, 2Hp)

    w_out = jnp.zeros((2 * Hp, Hp), jnp.float32)
    w_out = w_out.at[:H, :H].set(params["w_out"][:H])
    w_out = w_out.at[Hp:Hp + H, :H].set(params["w_out"][H:])
    w_out = w_out.astype(jnp.bfloat16)
    b_out = jnp.zeros((1, Hp), jnp.float32).at[:, :H].set(params["b_out"])

    grid = (Bp // b_tile, Tp // Tt)
    const = lambda b, t: (0, 0)

    grid_spec = pltpu.PrefetchScalarGridSpec(
        num_scalar_prefetch=0,
        grid=grid,
        in_specs=[
            pl.BlockSpec((Tt, b_tile, 2 * Hp), lambda b, t: (t, b, 0)),   # streamed emb tile
            pl.BlockSpec((b_tile, 1), lambda b, t: (b, 0)),               # lengths
            pl.BlockSpec((2 * Hp, 6 * Hp), const),                        # W_ih block-diag
            pl.BlockSpec((2 * Hp, 6 * Hp), const),                        # W_hh block-diag
            pl.BlockSpec((1, 6 * Hp), const),                             # gx bias
            pl.BlockSpec((1, 2 * Hp), const),                             # n-gate b_hh
            pl.BlockSpec((2 * Hp, Hp), const),                            # W_out (split-weight)
            pl.BlockSpec((1, Hp), const),                                 # b_out
        ],
        out_specs=pl.BlockSpec((b_tile, Hp), lambda b, t: (b, 0)),
        scratch_shapes=[
            pltpu.VMEM((b_tile, 2 * Hp), jnp.float32),      # h carry [h_f | h_b]
            pltpu.VMEM((Tt, b_tile, 6 * Hp), jnp.float32),  # per-tile pre-activations gx
        ],
    )

    # Explicit VMEM budget sized from the tile footprint (fits v7x's 64 MiB as well).
    vmem_bytes = (
        2 * (Tt * b_tile * 2 * Hp * 2)            # double-buffered streamed emb tile (bf16)
        + 2 * (2 * (2 * Hp * 6 * Hp * 2) + 2 * Hp * Hp * 2)   # resident weights (bf16)
        + Tt * b_tile * 6 * Hp * 4                # gx scratch (f32)
        + b_tile * 2 * Hp * 4                     # h scratch (f32)
        + 4 * 1024 * 1024                         # biases / output / headroom
    )
    vmem_limit = int(min(max(vmem_bytes, 8 * 1024 * 1024), 64 * 1024 * 1024))

    out = pl.pallas_call(
        encoder_gru_kernel,
        out_shape=jax.ShapeDtypeStruct((Bp, Hp), jnp.float32),
        grid_spec=grid_spec,
        compiler_params=pltpu.CompilerParams(
            dimension_semantics=("parallel", "arbitrary"),
            vmem_limit_bytes=vmem_limit,
        ),
    )(emb_cat, lens, wih, whh, b_gx, b_nh, w_out, b_out)

    return out[:B, :H]


# ---------------------------------------------------------------------------
# Pure-JAX reference (same math, same bf16 matmul operands) for correctness check
# ---------------------------------------------------------------------------
def encoder_reference(tokens, lengths, params):
    T, B, M = tokens.shape
    H = params["hidden_size"]
    emb = params["embedding"][tokens].astype(jnp.float32).sum(axis=2)      # (T, B, H)
    emb2d = emb.reshape(T * B, H).astype(jnp.bfloat16)
    zeros_h = jnp.zeros((1, H), jnp.float32)

    def proj(w_ih, b_ih, b_hh):
        bias = b_ih + jnp.concatenate([b_hh[:, :2 * H], zeros_h], axis=1)
        gx = jnp.dot(emb2d, w_ih.astype(jnp.bfloat16),
                     preferred_element_type=jnp.float32) + bias
        return gx.reshape(T, B, 3 * H)

    gx_f = proj(params["w_ih_f"], params["b_ih_f"], params["b_hh_f"])
    gx_b = proj(params["w_ih_b"], params["b_ih_b"], params["b_hh_b"])

    whf = params["w_hh_f"].astype(jnp.bfloat16)
    whb = params["w_hh_b"].astype(jnp.bfloat16)
    bnf = params["b_hh_f"][:, 2 * H:]
    bnb = params["b_hh_b"][:, 2 * H:]
    mask = (jnp.arange(T)[:, None] < lengths[None, :])[:, :, None]         # (T, B, 1) bool

    def cell(gx, h, wh, bn):
        gh = jnp.dot(h.astype(jnp.bfloat16), wh, preferred_element_type=jnp.float32)
        r = jax.nn.sigmoid(gx[:, :H] + gh[:, :H])
        z = jax.nn.sigmoid(gx[:, H:2 * H] + gh[:, H:2 * H])
        n = jnp.tanh(gx[:, 2 * H:] + r * (gh[:, 2 * H:] + bn))
        return (1.0 - z) * n + z * h

    h_f = jnp.zeros((B, H), jnp.float32)
    h_b = jnp.zeros((B, H), jnp.float32)
    for t in range(T):
        h_f = jnp.where(mask[t], cell(gx_f[t], h_f, whf, bnf), h_f)
        tb = T - 1 - t
        h_b = jnp.where(mask[tb], cell(gx_b[tb], h_b, whb, bnb), h_b)

    out = (jnp.dot(h_f.astype(jnp.bfloat16), params["w_out"][:H].astype(jnp.bfloat16),
                   preferred_element_type=jnp.float32)
           + jnp.dot(h_b.astype(jnp.bfloat16), params["w_out"][H:].astype(jnp.bfloat16),
                     preferred_element_type=jnp.float32)
           + params["b_out"])
    return out


# ---------------------------------------------------------------------------
# Deterministic parameter construction (mirrors nn.Embedding / nn.GRU / nn.Linear shapes)
# ---------------------------------------------------------------------------
def make_params(vocab, hidden_size, key):
    H = hidden_size
    ks = jax.random.split(key, 12)
    bound = 1.0 / math.sqrt(H)
    u = lambda k, shape: jax.random.uniform(k, shape, jnp.float32, -bound, bound)

    embedding = jax.random.normal(ks[0], (vocab, H), jnp.float32) * 0.1
    embedding = embedding.at[PAD_token].set(0.0)                # padding_idx row

    params = dict(
        hidden_size=H,
        embedding=embedding,
        # forward-direction GRU (weights stored transposed: (in, 3H), gate order [r, z, n])
        w_ih_f=u(ks[1], (H, 3 * H)), w_hh_f=u(ks[2], (H, 3 * H)),
        b_ih_f=u(ks[3], (1, 3 * H)), b_hh_f=u(ks[4], (1, 3 * H)),
        # backward-direction GRU
        w_ih_b=u(ks[5], (H, 3 * H)), w_hh_b=u(ks[6], (H, 3 * H)),
        b_ih_b=u(ks[7], (1, 3 * H)), b_hh_b=u(ks[8], (1, 3 * H)),
        # output projection W: Linear(2H, H), stored transposed (2H, H)
        w_out=u(ks[9], (2 * H, H)), b_out=u(ks[10], (1, H)),
    )
    return params


if __name__ == "__main__":
    # Small shapes consistent with the module's forward:
    #   input_seqs (T, B, M) int tokens, input_lengths per batch element.
    T, B, M = 6, 2, 4
    H = 32
    VOCAB = 50

    key = jax.random.PRNGKey(0)
    k_par, k_tok = jax.random.split(key)

    params = make_params(VOCAB, H, k_par)

    lengths = jnp.array([6, 4], dtype=jnp.int32)   # sorted descending (pack_padded_sequence)
    tokens = jax.random.randint(k_tok, (T, B, M), minval=2, maxval=VOCAB, dtype=jnp.int32)
    # positions past each sequence length are PAD tokens
    pad_pos = (jnp.arange(T)[:, None] >= lengths[None, :])[:, :, None]
    tokens = jnp.where(pad_pos, PAD_token, tokens)

    # t_tile=4 -> 2 time tiles: exercises the streamed grid + scratch-carried hidden state.
    out = encoder_forward(tokens, lengths, params, t_tile=4, b_tile=8)
    out = jax.block_until_ready(out)

    ref = encoder_reference(tokens, lengths, params)
    assert out.shape == (B, H)
    assert np.allclose(np.asarray(out), np.asarray(ref), atol=2e-3, rtol=2e-3), \
        "Pallas kernel output mismatch vs JAX reference"

    print("KERNEL_OK")
</pallas_src>

<mosaic_0001>
module attributes {stable_mosaic.version = 11 : i64} {
  func.func @encoder_gru_kernel(%arg0: i32, %arg1: i32, %arg2: memref<4x8x256xbf16, #tpu.memory_space<vmem>>, %arg3: memref<8x1xi32, #tpu.memory_space<vmem>>, %arg4: memref<256x768xbf16, #tpu.memory_space<vmem>>, %arg5: memref<256x768xbf16, #tpu.memory_space<vmem>>, %arg6: memref<1x768xf32, #tpu.memory_space<vmem>>, %arg7: memref<1x256xf32, #tpu.memory_space<vmem>>, %arg8: memref<256x128xbf16, #tpu.memory_space<vmem>>, %arg9: memref<1x128xf32, #tpu.memory_space<vmem>>, %arg10: memref<8x128xf32, #tpu.memory_space<vmem>>, %arg11: memref<8x256xf32, #tpu.memory_space<vmem>>, %arg12: memref<4x8x768xf32, #tpu.memory_space<vmem>>) attributes {dimension_semantics = [#tpu.dimension_semantics<parallel>, #tpu.dimension_semantics<arbitrary>], iteration_bounds = array<i64: 1, 2>, scalar_prefetch = 0 : i64, scratch_operands = 2 : i64, tpu.core_type = #tpu.core_type<tc>, window_params = [{transform_indices = @transform_0, window_bounds = array<i64: 4, 8, 256>}, {transform_indices = @transform_1, window_bounds = array<i64: 8, 1>}, {pipeline_mode = #tpu.pipeline_mode<synchronous>, transform_indices = @transform_2, window_bounds = array<i64: 256, 768>}, {pipeline_mode = #tpu.pipeline_mode<synchronous>, transform_indices = @transform_3, window_bounds = array<i64: 256, 768>}, {pipeline_mode = #tpu.pipeline_mode<synchronous>, transform_indices = @transform_4, window_bounds = array<i64: 1, 768>}, {pipeline_mode = #tpu.pipeline_mode<synchronous>, transform_indices = @transform_5, window_bounds = array<i64: 1, 256>}, {pipeline_mode = #tpu.pipeline_mode<synchronous>, transform_indices = @transform_6, window_bounds = array<i64: 256, 128>}, {pipeline_mode = #tpu.pipeline_mode<synchronous>, transform_indices = @transform_7, window_bounds = array<i64: 1, 128>}, {transform_indices = @transform_8, window_bounds = array<i64: 8, 128>}]} {
    %c0_i32 = arith.constant 0 : i32
    %0 = arith.cmpi eq, %arg1, %c0_i32 : i32
    %1 = arith.extui %0 : i1 to i32
    %c0_i32_0 = arith.constant 0 : i32
    %2 = arith.cmpi ne, %1, %c0_i32_0 : i32
    scf.if %2 {
      %cst_54 = arith.constant 0.000000e+00 : f32
      %195 = vector.broadcast %cst_54 : f32 to vector<8x256xf32>
      %c0_55 = arith.constant 0 : index
      %c0_56 = arith.constant 0 : index
      %196 = vector.load %arg11[%c0_55, %c0_56] : memref<8x256xf32, #tpu.memory_space<vmem>>, vector<8x256xf32>
      tpu.vector_store %arg11[%c0_55, %c0_56], %195 {strides = array<i32>} : memref<8x256xf32, #tpu.memory_space<vmem>>, vector<8x256xf32>,
    } else {
    }
    %c0 = arith.constant 0 : index
    %c0_1 = arith.constant 0 : index
    %c0_2 = arith.constant 0 : index
    %3 = vector.load %arg2[%c0, %c0_1, %c0_2] : memref<4x8x256xbf16, #tpu.memory_space<vmem>>, vector<4x8x256xbf16>
    %4 = vector.shape_cast %3 : vector<4x8x256xbf16> to vector<32x256xbf16>
    %c0_3 = arith.constant 0 : index
    %c0_4 = arith.constant 0 : index
    %5 = vector.load %arg4[%c0_3, %c0_4] : memref<256x768xbf16, #tpu.memory_space<vmem>>, vector<256x768xbf16>
    %cst = arith.constant dense<0.000000e+00> : vector<32x768xf32>
    %6 = tpu.matmul %4, %5, %cst {dimension_numbers = #tpu.dot_dimension_numbers<[1], [0], [0], [1], [0, 0, 1, 1], [], []>} : vector<32x256xbf16>, vector<256x768xbf16>, vector<32x768xf32> -> vector<32x768xf32>
    %c0_5 = arith.constant 0 : index
    %c0_6 = arith.constant 0 : index
    %7 = vector.load %arg6[%c0_5, %c0_6] : memref<1x768xf32, #tpu.memory_space<vmem>>, vector<1x768xf32>
    %8 = vector.broadcast %7 : vector<1x768xf32> to vector<32x768xf32>
    %9 = arith.addf %6, %8 : vector<32x768xf32>
    %10 = vector.shape_cast %9 : vector<32x768xf32> to vector<4x8x768xf32>
    %c0_7 = arith.constant 0 : index
    %c0_8 = arith.constant 0 : index
    %c0_9 = arith.constant 0 : index
    %11 = vector.load %arg12[%c0_7, %c0_8, %c0_9] : memref<4x8x768xf32, #tpu.memory_space<vmem>>, vector<4x8x768xf32>
    tpu.vector_store %arg12[%c0_7, %c0_8, %c0_9], %10 {strides = array<i32>} : memref<4x8x768xf32, #tpu.memory_space<vmem>>, vector<4x8x768xf32>,
    %c0_10 = arith.constant 0 : index
    %c0_11 = arith.constant 0 : index
    %12 = vector.load %arg5[%c0_10, %c0_11] : memref<256x768xbf16, #tpu.memory_space<vmem>>, vector<256x768xbf16>
    %c0_12 = arith.constant 0 : index
    %c0_13 = arith.constant 0 : index
    %13 = vector.load %arg7[%c0_12, %c0_13] : memref<1x256xf32, #tpu.memory_space<vmem>>, vector<1x256xf32>
    %c0_14 = arith.constant 0 : index
    %c0_15 = arith.constant 0 : index
    %14 = vector.load %arg3[%c0_14, %c0_15] : memref<8x1xi32, #tpu.memory_space<vmem>>, vector<8x1xi32>
    %15 = tpu.iota {dimensions = array<i32: 1>} : vector<1x256xi32>
    %c128_i32 = arith.constant 128 : i32
    %16 = vector.broadcast %c128_i32 : i32 to vector<1x256xi32>
    %17 = arith.cmpi slt, %15, %16 : vector<1x256xi32>
    %c0_16 = arith.constant 0 : index
    %c0_17 = arith.constant 0 : index
    %18 = vector.load %arg11[%c0_16, %c0_17] : memref<8x256xf32, #tpu.memory_space<vmem>>, vector<8x256xf32>
    %c0_i32_18 = arith.constant 0 : i32
    %19 = arith.index_cast %c0_i32_18 : i32 to index
    %c0_19 = arith.constant 0 : index
    %c0_20 = arith.constant 0 : index
    %20 = vector.load %arg12[%19, %c0_19, %c0_20] : memref<4x8x768xf32, #tpu.memory_space<vmem>>, vector<1x8x768xf32>
    %21 = vector.shape_cast %20 : vector<1x8x768xf32> to vector<8x768xf32>
    %22 = arith.truncf %18 : vector<8x256xf32> to vector<8x256xbf16>
    %cst_21 = arith.constant dense<0.000000e+00> : vector<8x768xf32>
    %23 = tpu.matmul %22, %12, %cst_21 {dimension_numbers = #tpu.dot_dimension_numbers<[1], [0], [0], [1], [0, 0, 1, 1], [], []>} : vector<8x256xbf16>, vector<256x768xbf16>, vector<8x768xf32> -> vector<8x768xf32>
    %24 = vector.extract_strided_slice %21 {offsets = [0, 0], sizes = [8, 256], strides = [1, 1]} : vector<8x768xf32> to vector<8x256xf32>
    %25 = vector.extract_strided_slice %23 {offsets = [0, 0], sizes = [8, 256], strides = [1, 1]} : vector<8x768xf32> to vector<8x256xf32>
    %26 = arith.addf %24, %25 : vector<8x256xf32>
    %27 = arith.negf %26 : vector<8x256xf32>
    %28 = math.exp %27 : vector<8x256xf32>
    %cst_22 = arith.constant 1.000000e+00 : f32
    %29 = vector.broadcast %cst_22 : f32 to vector<8x256xf32>
    %30 = arith.addf %29, %28 : vector<8x256xf32>
    %31 = arith.divf %29, %30 : vector<8x256xf32>
    %32 = vector.extract_strided_slice %21 {offsets = [0, 256], sizes = [8, 256], strides = [1, 1]} : vector<8x768xf32> to vector<8x256xf32>
    %33 = vector.extract_strided_slice %23 {offsets = [0, 256], sizes = [8, 256], strides = [1, 1]} : vector<8x768xf32> to vector<8x256xf32>
    %34 = arith.addf %32, %33 : vector<8x256xf32>
    %35 = arith.negf %34 : vector<8x256xf32>
    %36 = math.exp %35 : vector<8x256xf32>
    %cst_23 = arith.constant 1.000000e+00 : f32
    %37 = vector.broadcast %cst_23 : f32 to vector<8x256xf32>
    %38 = arith.addf %37, %36 : vector<8x256xf32>
    %39 = arith.divf %37, %38 : vector<8x256xf32>
    %40 = vector.extract_strided_slice %21 {offsets = [0, 512], sizes = [8, 256], strides = [1, 1]} : vector<8x768xf32> to vector<8x256xf32>
    %41 = vector.extract_strided_slice %23 {offsets = [0, 512], sizes = [8, 256], strides = [1, 1]} : vector<8x768xf32> to vector<8x256xf32>
    %42 = vector.broadcast %13 : vector<1x256xf32> to vector<8x256xf32>
    %43 = arith.addf %41, %42 : vector<8x256xf32>
    %44 = arith.mulf %31, %43 : vector<8x256xf32>
    %45 = arith.addf %40, %44 : vector<8x256xf32>
    %46 = math.tanh %45 : vector<8x256xf32>
    %cst_24 = arith.constant 1.000000e+00 : f32
    %47 = vector.broadcast %cst_24 : f32 to vector<8x256xf32>
    %48 = arith.subf %47, %39 : vector<8x256xf32>
    %49 = arith.mulf %48, %46 : vector<8x256xf32>
    %50 = arith.mulf %39, %18 : vector<8x256xf32>
    %51 = arith.addf %49, %50 : vector<8x256xf32>
    %c4_i32 = arith.constant 4 : i32
    %52 = arith.muli %arg1, %c4_i32 : i32
    %53 = arith.addi %52, %c0_i32_18 : i32
    %c7_i32 = arith.constant 7 : i32
    %54 = arith.subi %c7_i32, %53 : i32
    %55 = vector.broadcast %53 : i32 to vector<1x256xi32>
    %56 = vector.broadcast %54 : i32 to vector<1x256xi32>
    %57 = arith.select %17, %55, %56 : vector<1x256xi1>, vector<1x256xi32>
    %58 = vector.broadcast %57 : vector<1x256xi32> to vector<8x256xi32>
    %59 = vector.broadcast %14 : vector<8x1xi32> to vector<8x256xi32>
    %60 = arith.cmpi slt, %58, %59 : vector<8x256xi32>
    %61 = arith.select %60, %51, %18 : vector<8x256xi1>, vector<8x256xf32>
    %c1_i32 = arith.constant 1 : i32
    %62 = arith.index_cast %c1_i32 : i32 to index
    %c0_25 = arith.constant 0 : index
    %c0_26 = arith.constant 0 : index
    %63 = vector.load %arg12[%62, %c0_25, %c0_26] : memref<4x8x768xf32, #tpu.memory_space<vmem>>, vector<1x8x768xf32>
    %64 = vector.shape_cast %63 : vector<1x8x768xf32> to vector<8x768xf32>
    %65 = arith.truncf %61 : vector<8x256xf32> to vector<8x256xbf16>
    %cst_27 = arith.constant dense<0.000000e+00> : vector<8x768xf32>
    %66 = tpu.matmul %65, %12, %cst_27 {dimension_numbers = #tpu.dot_dimension_numbers<[1], [0], [0], [1], [0, 0, 1, 1], [], []>} : vector<8x256xbf16>, vector<256x768xbf16>, vector<8x768xf32> -> vector<8x768xf32>
    %67 = vector.extract_strided_slice %64 {offsets = [0, 0], sizes = [8, 256], strides = [1, 1]} : vector<8x768xf32> to vector<8x256xf32>
    %68 = vector.extract_strided_slice %66 {offsets = [0, 0], sizes = [8, 256], strides = [1, 1]} : vector<8x768xf32> to vector<8x256xf32>
    %69 = arith.addf %67, %68 : vector<8x256xf32>
    %70 = arith.negf %69 : vector<8x256xf32>
    %71 = math.exp %70 : vector<8x256xf32>
    %cst_28 = arith.constant 1.000000e+00 : f32
    %72 = vector.broadcast %cst_28 : f32 to vector<8x256xf32>
    %73 = arith.addf %72, %71 : vector<8x256xf32>
    %74 = arith.divf %72, %73 : vector<8x256xf32>
    %75 = vector.extract_strided_slice %64 {offsets = [0, 256], sizes = [8, 256], strides = [1, 1]} : vector<8x768xf32> to vector<8x256xf32>
    %76 = vector.extract_strided_slice %66 {offsets = [0, 256], sizes = [8, 256], strides = [1, 1]} : vector<8x768xf32> to vector<8x256xf32>
    %77 = arith.addf %75, %76 : vector<8x256xf32>
    %78 = arith.negf %77 : vector<8x256xf32>
    %79 = math.exp %78 : vector<8x256xf32>
    %cst_29 = arith.constant 1.000000e+00 : f32
    %80 = vector.broadcast %cst_29 : f32 to vector<8x256xf32>
    %81 = arith.addf %80, %79 : vector<8x256xf32>
    %82 = arith.divf %80, %81 : vector<8x256xf32>
    %83 = vector.extract_strided_slice %64 {offsets = [0, 512], sizes = [8, 256], strides = [1, 1]} : vector<8x768xf32> to vector<8x256xf32>
    %84 = vector.extract_strided_slice %66 {offsets = [0, 512], sizes = [8, 256], strides = [1, 1]} : vector<8x768xf32> to vector<8x256xf32>
    %85 = vector.broadcast %13 : vector<1x256xf32> to vector<8x256xf32>
    %86 = arith.addf %84, %85 : vector<8x256xf32>
    %87 = arith.mulf %74, %86 : vector<8x256xf32>
    %88 = arith.addf %83, %87 : vector<8x256xf32>
    %89 = math.tanh %88 : vector<8x256xf32>
    %cst_30 = arith.constant 1.000000e+00 : f32
    %90 = vector.broadcast %cst_30 : f32 to vector<8x256xf32>
    %91 = arith.subf %90, %82 : vector<8x256xf32>
    %92 = arith.mulf %91, %89 : vector<8x256xf32>
    %93 = arith.mulf %82, %61 : vector<8x256xf32>
    %94 = arith.addf %92, %93 : vector<8x256xf32>
    %c4_i32_31 = arith.constant 4 : i32
    %95 = arith.muli %arg1, %c4_i32_31 : i32
    %96 = arith.addi %95, %c1_i32 : i32
    %c7_i32_32 = arith.constant 7 : i32
    %97 = arith.subi %c7_i32_32, %96 : i32
    %98 = vector.broadcast %96 : i32 to vector<1x256xi32>
    %99 = vector.broadcast %97 : i32 to vector<1x256xi32>
    %100 = arith.select %17, %98, %99 : vector<1x256xi1>, vector<1x256xi32>
    %101 = vector.broadcast %100 : vector<1x256xi32> to vector<8x256xi32>
    %102 = vector.broadcast %14 : vector<8x1xi32> to vector<8x256xi32>
    %103 = arith.cmpi slt, %101, %102 : vector<8x256xi32>
    %104 = arith.select %103, %94, %61 : vector<8x256xi1>, vector<8x256xf32>
    %c2_i32 = arith.constant 2 : i32
    %105 = arith.index_cast %c2_i32 : i32 to index
    %c0_33 = arith.constant 0 : index
    %c0_34 = arith.constant 0 : index
    %106 = vector.load %arg12[%105, %c0_33, %c0_34] : memref<4x8x768xf32, #tpu.memory_space<vmem>>, vector<1x8x768xf32>
    %107 = vector.shape_cast %106 : vector<1x8x768xf32> to vector<8x768xf32>
    %108 = arith.truncf %104 : vector<8x256xf32> to vector<8x256xbf16>
    %cst_35 = arith.constant dense<0.000000e+00> : vector<8x768xf32>
    %109 = tpu.matmul %108, %12, %cst_35 {dimension_numbers = #tpu.dot_dimension_numbers<[1], [0], [0], [1], [0, 0, 1, 1], [], []>} : vector<8x256xbf16>, vector<256x768xbf16>, vector<8x768xf32> -> vector<8x768xf32>
    %110 = vector.extract_strided_slice %107 {offsets = [0, 0], sizes = [8, 256], strides = [1, 1]} : vector<8x768xf32> to vector<8x256xf32>
    %111 = vector.extract_strided_slice %109 {offsets = [0, 0], sizes = [8, 256], strides = [1, 1]} : vector<8x768xf32> to vector<8x256xf32>
    %112 = arith.addf %110, %111 : vector<8x256xf32>
    %113 = arith.negf %112 : vector<8x256xf32>
    %114 = math.exp %113 : vector<8x256xf32>
    %cst_36 = arith.constant 1.000000e+00 : f32
    %115 = vector.broadcast %cst_36 : f32 to vector<8x256xf32>
    %116 = arith.addf %115, %114 : vector<8x256xf32>
    %117 = arith.divf %115, %116 : vector<8x256xf32>
    %118 = vector.extract_strided_slice %107 {offsets = [0, 256], sizes = [8, 256], strides = [1, 1]} : vector<8x768xf32> to vector<8x256xf32>
    %119 = vector.extract_strided_slice %109 {offsets = [0, 256], sizes = [8, 256], strides = [1, 1]} : vector<8x768xf32> to vector<8x256xf32>
    %120 = arith.addf %118, %119 : vector<8x256xf32>
    %121 = arith.negf %120 : vector<8x256xf32>
    %122 = math.exp %121 : vector<8x256xf32>
    %cst_37 = arith.constant 1.000000e+00 : f32
    %123 = vector.broadcast %cst_37 : f32 to vector<8x256xf32>
    %124 = arith.addf %123, %122 : vector<8x256xf32>
    %125 = arith.divf %123, %124 : vector<8x256xf32>
    %126 = vector.extract_strided_slice %107 {offsets = [0, 512], sizes = [8, 256], strides = [1, 1]} : vector<8x768xf32> to vector<8x256xf32>
    %127 = vector.extract_strided_slice %109 {offsets = [0, 512], sizes = [8, 256], strides = [1, 1]} : vector<8x768xf32> to vector<8x256xf32>
    %128 = vector.broadcast %13 : vector<1x256xf32> to vector<8x256xf32>
    %129 = arith.addf %127, %128 : vector<8x256xf32>
    %130 = arith.mulf %117, %129 : vector<8x256xf32>
    %131 = arith.addf %126, %130 : vector<8x256xf32>
    %132 = math.tanh %131 : vector<8x256xf32>
    %cst_38 = arith.constant 1.000000e+00 : f32
    %133 = vector.broadcast %cst_38 : f32 to vector<8x256xf32>
    %134 = arith.subf %133, %125 : vector<8x256xf32>
    %135 = arith.mulf %134, %132 : vector<8x256xf32>
    %136 = arith.mulf %125, %104 : vector<8x256xf32>
    %137 = arith.addf %135, %136 : vector<8x256xf32>
    %c4_i32_39 = arith.constant 4 : i32
    %138 = arith.muli %arg1, %c4_i32_39 : i32
    %139 = arith.addi %138, %c2_i32 : i32
    %c7_i32_40 = arith.constant 7 : i32
    %140 = arith.subi %c7_i32_40, %139 : i32
    %141 = vector.broadcast %139 : i32 to vector<1x256xi32>
    %142 = vector.broadcast %140 : i32 to vector<1x256xi32>
    %143 = arith.select %17, %141, %142 : vector<1x256xi1>, vector<1x256xi32>
    %144 = vector.broadcast %143 : vector<1x256xi32> to vector<8x256xi32>
    %145 = vector.broadcast %14 : vector<8x1xi32> to vector<8x256xi32>
    %146 = arith.cmpi slt, %144, %145 : vector<8x256xi32>
    %147 = arith.select %146, %137, %104 : vector<8x256xi1>, vector<8x256xf32>
    %c3_i32 = arith.constant 3 : i32
    %148 = arith.index_cast %c3_i32 : i32 to index
    %c0_41 = arith.constant 0 : index
    %c0_42 = arith.constant 0 : index
    %149 = vector.load %arg12[%148, %c0_41, %c0_42] : memref<4x8x768xf32, #tpu.memory_space<vmem>>, vector<1x8x768xf32>
    %150 = vector.shape_cast %149 : vector<1x8x768xf32> to vector<8x768xf32>
    %151 = arith.truncf %147 : vector<8x256xf32> to vector<8x256xbf16>
    %cst_43 = arith.constant dense<0.000000e+00> : vector<8x768xf32>
    %152 = tpu.matmul %151, %12, %cst_43 {dimension_numbers = #tpu.dot_dimension_numbers<[1], [0], [0], [1], [0, 0, 1, 1], [], []>} : vector<8x256xbf16>, vector<256x768xbf16>, vector<8x768xf32> -> vector<8x768xf32>
    %153 = vector.extract_strided_slice %150 {offsets = [0, 0], sizes = [8, 256], strides = [1, 1]} : vector<8x768xf32> to vector<8x256xf32>
    %154 = vector.extract_strided_slice %152 {offsets = [0, 0], sizes = [8, 256], strides = [1, 1]} : vector<8x768xf32> to vector<8x256xf32>
    %155 = arith.addf %153, %154 : vector<8x256xf32>
    %156 = arith.negf %155 : vector<8x256xf32>
    %157 = math.exp %156 : vector<8x256xf32>
    %cst_44 = arith.constant 1.000000e+00 : f32
    %158 = vector.broadcast %cst_44 : f32 to vector<8x256xf32>
    %159 = arith.addf %158, %157 : vector<8x256xf32>
    %160 = arith.divf %158, %159 : vector<8x256xf32>
    %161 = vector.extract_strided_slice %150 {offsets = [0, 256], sizes = [8, 256], strides = [1, 1]} : vector<8x768xf32> to vector<8x256xf32>
    %162 = vector.extract_strided_slice %152 {offsets = [0, 256], sizes = [8, 256], strides = [1, 1]} : vector<8x768xf32> to vector<8x256xf32>
    %163 = arith.addf %161, %162 : vector<8x256xf32>
    %164 = arith.negf %163 : vector<8x256xf32>
    %165 = math.exp %164 : vector<8x256xf32>
    %cst_45 = arith.constant 1.000000e+00 : f32
    %166 = vector.broadcast %cst_45 : f32 to vector<8x256xf32>
    %167 = arith.addf %166, %165 : vector<8x256xf32>
    %168 = arith.divf %166, %167 : vector<8x256xf32>
    %169 = vector.extract_strided_slice %150 {offsets = [0, 512], sizes = [8, 256], strides = [1, 1]} : vector<8x768xf32> to vector<8x256xf32>
    %170 = vector.extract_strided_slice %152 {offsets = [0, 512], sizes = [8, 256], strides = [1, 1]} : vector<8x768xf32> to vector<8x256xf32>
    %171 = vector.broadcast %13 : vector<1x256xf32> to vector<8x256xf32>
    %172 = arith.addf %170, %171 : vector<8x256xf32>
    %173 = arith.mulf %160, %172 : vector<8x256xf32>
    %174 = arith.addf %169, %173 : vector<8x256xf32>
    %175 = math.tanh %174 : vector<8x256xf32>
    %cst_46 = arith.constant 1.000000e+00 : f32
    %176 = vector.broadcast %cst_46 : f32 to vector<8x256xf32>
    %177 = arith.subf %176, %168 : vector<8x256xf32>
    %178 = arith.mulf %177, %175 : vector<8x256xf32>
    %179 = arith.mulf %168, %147 : vector<8x256xf32>
    %180 = arith.addf %178, %179 : vector<8x256xf32>
    %c4_i32_47 = arith.constant 4 : i32
    %181 = arith.muli %arg1, %c4_i32_47 : i32
    %182 = arith.addi %181, %c3_i32 : i32
    %c7_i32_48 = arith.constant 7 : i32
    %183 = arith.subi %c7_i32_48, %182 : i32
    %184 = vector.broadcast %182 : i32 to vector<1x256xi32>
    %185 = vector.broadcast %183 : i32 to vector<1x256xi32>
    %186 = arith.select %17, %184, %185 : vector<1x256xi1>, vector<1x256xi32>
    %187 = vector.broadcast %186 : vector<1x256xi32> to vector<8x256xi32>
    %188 = vector.broadcast %14 : vector<8x1xi32> to vector<8x256xi32>
    %189 = arith.cmpi slt, %187, %188 : vector<8x256xi32>
    %190 = arith.select %189, %180, %147 : vector<8x256xi1>, vector<8x256xf32>
    %c4_i32_49 = arith.constant 4 : i32
    %c0_50 = arith.constant 0 : index
    %c0_51 = arith.constant 0 : index
    %191 = vector.load %arg11[%c0_50, %c0_51] : memref<8x256xf32, #tpu.memory_space<vmem>>, vector<8x256xf32>
    tpu.vector_store %arg11[%c0_50, %c0_51], %190 {strides = array<i32>} : memref<8x256xf32, #tpu.memory_space<vmem>>, vector<8x256xf32>,
    %c1_i32_52 = arith.constant 1 : i32
    %192 = arith.cmpi eq, %arg1, %c1_i32_52 : i32
    %193 = arith.extui %192 : i1 to i32
    %c0_i32_53 = arith.constant 0 : i32
    %194 = arith.cmpi ne, %193, %c0_i32_53 : i32
    scf.if %194 {
      %195 = arith.truncf %190 : vector<8x256xf32> to vector<8x256xbf16>
      %c0_54 = arith.constant 0 : index
      %c0_55 = arith.constant 0 : index
      %196 = vector.load %arg8[%c0_54, %c0_55] : memref<256x128xbf16, #tpu.memory_space<vmem>>, vector<256x128xbf16>
      %cst_56 = arith.constant dense<0.000000e+00> : vector<8x128xf32>
      %197 = tpu.matmul %195, %196, %cst_56 {dimension_numbers = #tpu.dot_dimension_numbers<[1], [0], [0], [1], [0, 0, 1, 1], [], []>} : vector<8x256xbf16>, vector<256x128xbf16>, vector<8x128xf32> -> vector<8x128xf32>
      %c0_57 = arith.constant 0 : index
      %c0_58 = arith.constant 0 : index
      %198 = vector.load %arg9[%c0_57, %c0_58] : memref<1x128xf32, #tpu.memory_space<vmem>>, vector<1x128xf32>
      %199 = vector.broadcast %198 : vector<1x128xf32> to vector<8x128xf32>
      %200 = arith.addf %197, %199 : vector<8x128xf32>
      %c0_59 = arith.constant 0 : index
      %c0_60 = arith.constant 0 : index
      %201 = vector.load %arg10[%c0_59, %c0_60] : memref<8x128xf32, #tpu.memory_space<vmem>>, vector<8x128xf32>
      tpu.vector_store %arg10[%c0_59, %c0_60], %200 {strides = array<i32>} : memref<8x128xf32, #tpu.memory_space<vmem>>, vector<8x128xf32>,
    } else {
    }
    return
  }
  func.func @transform_0(%arg0: i32, %arg1: i32) -> (i32, i32, i32) {
    %c0_i32 = arith.constant 0 : i32
    %c0_i32_0 = arith.constant 0 : i32
    return %arg1, %arg0, %c0_i32 : i32, i32, i32
  }
  func.func @transform_1(%arg0: i32, %arg1: i32) -> (i32, i32) {
    %c0_i32 = arith.constant 0 : i32
    %c0_i32_0 = arith.constant 0 : i32
    return %arg0, %c0_i32 : i32, i32
  }
  func.func @transform_2(%arg0: i32, %arg1: i32) -> (i32, i32) {
    %c0_i32 = arith.constant 0 : i32
    %c0_i32_0 = arith.constant 0 : i32
    %c0_i32_1 = arith.constant 0 : i32
    return %c0_i32, %c0_i32_0 : i32, i32
  }
  func.func @transform_3(%arg0: i32, %arg1: i32) -> (i32, i32) {
    %c0_i32 = arith.constant 0 : i32
    %c0_i32_0 = arith.constant 0 : i32
    %c0_i32_1 = arith.constant 0 : i32
    return %c0_i32, %c0_i32_0 : i32, i32
  }
  func.func @transform_4(%arg0: i32, %arg1: i32) -> (i32, i32) {
    %c0_i32 = arith.constant 0 : i32
    %c0_i32_0 = arith.constant 0 : i32
    %c0_i32_1 = arith.constant 0 : i32
    return %c0_i32, %c0_i32_0 : i32, i32
  }
  func.func @transform_5(%arg0: i32, %arg1: i32) -> (i32, i32) {
    %c0_i32 = arith.constant 0 : i32
    %c0_i32_0 = arith.constant 0 : i32
    %c0_i32_1 = arith.constant 0 : i32
    return %c0_i32, %c0_i32_0 : i32, i32
  }
  func.func @transform_6(%arg0: i32, %arg1: i32) -> (i32, i32) {
    %c0_i32 = arith.constant 0 : i32
    %c0_i32_0 = arith.constant 0 : i32
    %c0_i32_1 = arith.constant 0 : i32
    return %c0_i32, %c0_i32_0 : i32, i32
  }
  func.func @transform_7(%arg0: i32, %arg1: i32) -> (i32, i32) {
    %c0_i32 = arith.constant 0 : i32
    %c0_i32_0 = arith.constant 0 : i32
    %c0_i32_1 = arith.constant 0 : i32
    return %c0_i32, %c0_i32_0 : i32, i32
  }
  func.func @transform_8(%arg0: i32, %arg1: i32) -> (i32, i32) {
    %c0_i32 = arith.constant 0 : i32
    %c0_i32_0 = arith.constant 0 : i32
    return %arg0, %c0_i32 : i32, i32
  }
}

</mosaic_0001>

<bundles_post_ra>
// kernel: tpu_custom_call.1
= control target key start
LH: loop header
LB: loop body
LE: loop exit
PB: predicated region body
PF: predicated region fallthrough
CT: control target
= control target key end

     0   :  { %s5863_s0 = inlined_call_operand.hbm [shape: bf16[8,8,256], index: 0, kind: input, shape index: {}]   ;;  %s5864_s1 = inlined_call_operand.vmem [shape: s32[8,1], index: 1, kind: input, shape index: {}]   ;;  %s5865_s2 = inlined_call_operand.hbm [shape: bf16[256,768], index: 2, kind: input, shape index: {}]   ;;  %s5866_s3 = inlined_call_operand.hbm [shape: bf16[256,768], index: 3, kind: input, shape index: {}]   ;;  %s5867_s4 = inlined_call_operand.vmem [shape: f32[1,768], index: 4, kind: input, shape index: {}]   ;;  %s5868_s5 = inlined_call_operand.vmem [shape: f32[1,256], index: 5, kind: input, shape index: {}]   ;;  %s5869_s6 = inlined_call_operand.hbm [shape: bf16[256,128], index: 6, kind: input, shape index: {}]   ;;  %s5870_s7 = inlined_call_operand.vmem [shape: f32[1,128], index: 7, kind: input, shape index: {}]   ;;  %s5871_s8 = inlined_call_operand.hbm [shape: f32[8,128], index: 8, kind: output, shape index: {}]  }
   0x1   :  { %6038 = sst [smem:[#allocation142_spill]] %s5865_s2 }
   0x2   :  { %6039 = sst [smem:[#allocation143_spill]] %s5866_s3 }
   0x3   :  { %13 = vsyncpa [#allocation5], 0 }
   0x4   :  { %15 = vsyncpa [#allocation5 + $0x1], 0 }
   0x5   :  { %16 = vsyncpa [#allocation8], 0 }
   0x6   :  { %17 = vsyncpa [#allocation11], 0 }
   0x7   :  { %18 = vsyncpa [#allocation6], 0  ;;  %s4793_s27 = smov 0   ;;  %s4795_s28 = smov 0  }
   0x8   :  { %s4797_s29 = smov 0   ;;  %s4799_s30 = smov 0  }
   0x9   :  { %s4801_s9 = smov 0   ;;  %s4803_s10 = smov 0  }
   0xa LB: > { %s5872_s11 = sadd.s32 4294967295, %s4734_s10   ;;  %p58_p0 = scmp.ne.s32.totalorder %s4718_s28, %s4714_s27  ;;  %s4734_s10 = sphi %s4803_s10, %s24_s10   ;;  %s4730_s9 = sphi %s4801_s9, %s6381_s9   ;;  %s4726_s30 = sphi %s4799_s30, %s6380_s30   ;;  %s4722_s29 = sphi %s4797_s29, %s6379_s29   ;;  %s4718_s28 = sphi %s4795_s28, %s6378_s28   ;;  %s4714_s27 = sphi %s4793_s27, %s6377_s27  }
   0xb   : > { %p4825_p1 = scmp.eq.s32.totalorder %s5872_s11, 0  ;;  %p3239_p2 = scmp.ge.s32.totalorder %s4734_s10, 1 }
   0xc   : > { %p247_p3 = scmp.lt.s32.totalorder %s4734_s10, 3  ;;  %s6042_s2 = sld [smem:[#allocation142_spill]] }
   0xd   : > { %p4833_p4 = por %p4825_p1, %p58_p0  ;;  %s4736_s18 = smov [#allocation7]  }
   0xe   : > { %p4840_p5 = pnand %p3239_p2, %p247_p3  ;;  %s267_s19 = sshll.u32 %s4736_s18, 4  ;;  %s268_s19 = int_to_ptr.vmem [resolvable:$true] %s267_s19 }
   0xf   : > { %s6045_s3 = sld [smem:[#allocation143_spill]]  ;;  %s4737_s24 = smov 384  }
  0x10   : > { %p4357_p6 = pneg %p4840_p5  ;;  %s4738_s25 = smov 24  }
  0x11   : > { %s4739_s26 = smov [#allocation9]   ;;  %s299_s18 = sshll.u32 %s5869_s6, 4  ;;  %s300_s18 = int_to_ptr.hbm [resolvable:$true] %s299_s18 }
  0x12   : > { %s265_s16 = sshll.u32 %s6042_s2, 4  ;;  %p4848_p7 = pnand %p4357_p6, %p4825_p1  ;;  %s266_s16 = int_to_ptr.hbm [resolvable:$true] %s265_s16 }
  0x13   : > { %s281_s27 = sshll.u32 %s4739_s26, 4  ;;  %s4740_s21 = smov [#allocation10]   ;;  %s282_s27 = int_to_ptr.vmem [resolvable:$true] %s281_s27 }
  0x14   : > { %4360 = dma.hbm_to_vmem [thread:$0]  (!%p4848_p7), %s266_s16, 12288, %s268_s19, [#allocation8], %s4737_s24, %s4737_s24, %s4738_s25  }
  0x15   : > { %s279_s23 = sshll.u32 %s6045_s3, 4  ;;  %s301_s22 = sshll.u32 %s4740_s21, 4  ;;  %s280_s23 = int_to_ptr.hbm [resolvable:$true] %s279_s23  ;;  %s302_s22 = int_to_ptr.vmem [resolvable:$true] %s301_s22 }
  0x16   : > { %4363 = dma.hbm_to_vmem [thread:$0]  (!%p4848_p7), %s280_s23, 12288, %s282_s27, [#allocation8], %s4737_s24, %s4737_s24, %s4738_s25  }
  0x17   : > { %s4741_s11 = smov 64   ;;  %s4742_s16 = smov 4  }
  0x18   : > { %4366 = dma.hbm_to_vmem [thread:$0]  (!%p4848_p7), %s300_s18, 2048, %s302_s22, [#allocation11], %s4741_s11, %s4741_s11, %s4742_s16  }
  0x19   : > { %s45_s19 = sadd.s32 1, %s4722_s29  ;;  %s33_s26 = sadd.s32 1, %s4730_s9 }
  0x1a   : > { %p52_p8 = scmp.ne.s32.totalorder %s4722_s29, %s4718_s28  ;;  %p34_p9 = scmp.ge.s32.totalorder %s33_s26, 2 }
  0x1b   : > { %p53_p10 = scmp.eq.s32.totalorder %s4734_s10, 0  ;;  %p4374_p11 = scmp.lt.s32.totalorder %s4734_s10, 2 }
  0x1c   : > { %s318_s14 = sand.u32 1, %s4722_s29   ;;  %s6383_s26 = smov (%p34_p9, %s33_s26), 0 }
  0x1d   : > { %p54_p12 = por %p53_p10, %p52_p8  ;;  %s40_s23 = ssub.s32 %s4730_s9, %s6383_s26 }
  0x1e   : > { %s3245_s24 = sshll.u32 %s318_s14, 5  ;;  %p43_p13 = scmp.eq.s32.totalorder %s40_s23, 0 }
  0x1f   : > { %s4126_s25 = sshll.u32 %s4730_s9, 5  ;;  %s322_s27 = scalar_lea.vmem [#allocation4], %s3245_s24 }
  0x20   : > { %s333_s20 = sshll.u32 %s322_s27, 4  ;;  %s330_s21 = scalar_lea.hbm %s5863_s0, %s4126_s25  ;;  %s334_s20 = int_to_ptr.vmem [resolvable:$true] %s333_s20 }
  0x21   : > { %s4877_s11 = scalar_select %p43_p13, %s4722_s29, %s45_s19  }
  0x22   : > { %s331_s22 = sshll.u32 %s330_s21, 4  ;;  %p4368_p0 = pnand %p4374_p11, %p54_p12  ;;  %s332_s22 = int_to_ptr.hbm [resolvable:$true] %s331_s22 }
  0x23   : > { %s319_s16 = scalar_lea.sflag [#allocation5], %s318_s14  ;;  %s4743_s2 = smov 128  }
  0x24   : > { %s4744_s3 = smov 8   ;;  %345 = sbr.rel (%p4840_p5) target bundleno = 1149 (0x47d), region = 52 }
  0x25   : > { %4370 = dma.hbm_to_vmem [thread:$0]  (!%p4368_p0), %s332_s22, 512, %s334_s20, %s319_s16, %s4743_s2, %s4743_s2, %s4744_s3  }
  0x29   : > { %s347_s19 = sand.u32 1, %s4718_s28  }
  0x2a   : > { %s3250_s23 = sshll.u32 %s347_s19, 5  ;;  %s348_s24 = scalar_lea.sflag [#allocation5], %s347_s19 }
  0x2b   : > { %s4887_s27 = scalar_lea.vmem [#allocation4], %s3250_s23 }
  0x2c   : > { %4697 = dma.done.wait (%p4833_p4), %s348_s24, 512  }
  0x2d   : > { %4699 = vsyncadd (%p4833_p4), %s348_s24, 4294966784 }
  0x2e   : > { %4701 = dma.done.wait (%p4825_p1), [#allocation8], 24576  }
  0x2f   : > { %4703 = vsyncadd (%p4825_p1), [#allocation8], 4294942720 }
  0x30   : > { %4705 = dma.done.wait (%p4825_p1), [#allocation11], 2048  }
  0x31   : > { %4707 = vsyncadd (%p4825_p1), [#allocation11], 4294965248  ;;  %p3254_p2 = scmp.ne.s32.totalorder %s4726_s30, 0 }
  0x33   : > { %407 = sbr.rel (%p3254_p2) target bundleno = 59 (0x3b), region = 72 }
  0x38   : > { %v4745_v0 = vmov 0.0  }
  0x39   : > { %408 = vst [vmem:[#allocation2] sm:$0xff] %v4745_v0 }
  0x3a   : > { %409 = vst [vmem:[#allocation2 + $0x8] sm:$0xff] %v4745_v0 }
  0x3b PF: > { %v3441_v1 = vld [vmem:[#allocation7 + $0x150] sm:$0xf]  ;;  %v4176_v2 = vld [vmem:[#allocation7 + $0x164] sm:$0xf0]  ;;  %v4173_v6 = vld [vmem:[#allocation7 + $0x154] sm:$0xf] }
  0x3c   : > { %v3633_v3 = vld [vmem:[#allocation7 + $0x2d0] sm:$0xf]  ;;  %v3442_v4 = vor.u32 %v4176_v2, %v3441_v1  ;;  %v4224_v5 = vld [vmem:[#allocation7 + $0x2e4] sm:$0xf0]  ;;  %v3443_v7 = vld [vmem:[#allocation7 + $0x168] sm:$0xf0] }
  0x3d   : > { %v3634_v8 = vor.u32 %v4224_v5, %v3633_v3  ;;  %v3446_v9 = vor.u32 %v4173_v6, %v3443_v7  ;;  %v4221_v10 = vld [vmem:[#allocation7 + $0x2d4] sm:$0xf]  ;;  %v3635_v11 = vld [vmem:[#allocation7 + $0x2e8] sm:$0xf0]  ;;  %v3417_v12 = vld [vmem:[#allocation7 + $0x120] sm:$0xf] }
  0x3e   : > { %1024 = vmatpush.bf16.msra.mxu0 %v3442_v4  ;;  %v3638_v13 = vor.u32 %v4221_v10, %v3635_v11  ;;  %v4170_v14 = vld [vmem:[#allocation7 + $0x134] sm:$0xf0]  ;;  %v3609_v15 = vld [vmem:[#allocation7 + $0x2a0] sm:$0xf]  ;;  %v4167_v19 = vld [vmem:[#allocation7 + $0x124] sm:$0xf] }
  0x3f   : > { %v4218_v16 = vld [vmem:[#allocation7 + $0x2b4] sm:$0xf0]  ;;  %1043 = vmatpush.bf16.msra.mxu1 %v3634_v8  ;;  %1062 = vmatpush.bf16.msra.mxu2 %v3446_v9  ;;  %v3418_v17 = vor.u32 %v4170_v14, %v3417_v12  ;;  %v3419_v20 = vld [vmem:[#allocation7 + $0x138] sm:$0xf0]  ;;  %v4215_v21 = vld [vmem:[#allocation7 + $0x2a4] sm:$0xf] }
  0x40   : > { %v3610_v18 = vor.u32 %v4218_v16, %v3609_v15  ;;  %1081 = vmatpush.bf16.msra.mxu3 %v3638_v13  ;;  %v3422_v22 = vor.u32 %v4167_v19, %v3419_v20  ;;  %v3611_v23 = vld [vmem:[#allocation7 + $0x2b8] sm:$0xf0]  ;;  %v3393_v24 = vld [vmem:[#allocation7 + $0xf0] sm:$0xf]  ;;  %v4164_v25 = vld [vmem:[#allocation7 + $0x104] sm:$0xf0] }
  0x41   : > { %v3614_v26 = vor.u32 %v4215_v21, %v3611_v23  ;;  %v3585_v27 = vld [vmem:[#allocation7 + $0x270] sm:$0xf]  ;;  %v4212_v28 = vld [vmem:[#allocation7 + $0x284] sm:$0xf0]  ;;  %v4161_v29 = vld [vmem:[#allocation7 + $0xf4] sm:$0xf]  ;;  %v3394_v30 = vor.u32 %v4164_v25, %v3393_v24 }
  0x42   : > { %1025 = vmatpush.bf16.msra.mxu0 %v3418_v17  ;;  %v3395_v31 = vld [vmem:[#allocation7 + $0x108] sm:$0xf0]  ;;  %v4209_v32 = vld [vmem:[#allocation7 + $0x274] sm:$0xf]  ;;  %v3586_v34 = vor.u32 %v4212_v28, %v3585_v27  ;;  %v3369_v36 = vld [vmem:[#allocation7 + $0xc0] sm:$0xf] }
  0x43   : > { %v3587_v33 = vld [vmem:[#allocation7 + $0x288] sm:$0xf0]  ;;  %1044 = vmatpush.bf16.msra.mxu1 %v3610_v18  ;;  %1063 = vmatpush.bf16.msra.mxu2 %v3422_v22  ;;  %v3398_v35 = vor.u32 %v4161_v29, %v3395_v31  ;;  %v4158_v37 = vld [vmem:[#allocation7 + $0xd4] sm:$0xf0]  ;;  %v3561_v38 = vld [vmem:[#allocation7 + $0x240] sm:$0xf] }
  0x44   : > { %1082 = vmatpush.bf16.msra.mxu3 %v3614_v26  ;;  %v3590_v39 = vor.u32 %v4209_v32, %v3587_v33  ;;  %v4206_v40 = vld [vmem:[#allocation7 + $0x254] sm:$0xf0]  ;;  %v4155_v41 = vld [vmem:[#allocation7 + $0xc4] sm:$0xf]  ;;  %v3371_v42 = vld [vmem:[#allocation7 + $0xd8] sm:$0xf0]  ;;  %v3370_v45 = vor.u32 %v4158_v37, %v3369_v36 }
  0x45   : > { %v4203_v43 = vld [vmem:[#allocation7 + $0x244] sm:$0xf]  ;;  %v3563_v44 = vld [vmem:[#allocation7 + $0x258] sm:$0xf0]  ;;  %v3562_v46 = vor.u32 %v4206_v40, %v3561_v38  ;;  %v3374_v47 = vor.u32 %v4155_v41, %v3371_v42  ;;  %v3345_v48 = vld [vmem:[#allocation7 + $0x90] sm:$0xf] }
  0x46   : > { %1026 = vmatpush.bf16.msra.mxu0 %v3394_v30  ;;  %v4152_v49 = vld [vmem:[#allocation7 + $0xa4] sm:$0xf0]  ;;  %v3537_v50 = vld [vmem:[#allocation7 + $0x210] sm:$0xf]  ;;  %v3566_v51 = vor.u32 %v4203_v43, %v3563_v44  ;;  %v4149_v53 = vld [vmem:[#allocation7 + $0x94] sm:$0xf] }
  0x47   : > { %1045 = vmatpush.bf16.msra.mxu1 %v3586_v34  ;;  %1064 = vmatpush.bf16.msra.mxu2 %v3398_v35  ;;  %v4200_v52 = vld [vmem:[#allocation7 + $0x224] sm:$0xf0]  ;;  %v3347_v54 = vld [vmem:[#allocation7 + $0xa8] sm:$0xf0]  ;;  %v4197_v55 = vld [vmem:[#allocation7 + $0x214] sm:$0xf]  ;;  %v3346_v57 = vor.u32 %v4152_v49, %v3345_v48 }
  0x48   : > { %1083 = vmatpush.bf16.msra.mxu3 %v3590_v39  ;;  %v3539_v56 = vld [vmem:[#allocation7 + $0x228] sm:$0xf0]  ;;  %v3538_v58 = vor.u32 %v4200_v52, %v3537_v50  ;;  %v3350_v59 = vor.u32 %v4149_v53, %v3347_v54  ;;  %v3321_v60 = vld [vmem:[#allocation7 + $0x60] sm:$0xf]  ;;  %v4146_v61 = vld [vmem:[#allocation7 + $0x74] sm:$0xf0] }
  0x49   : > { %v3513_v62 = vld [vmem:[#allocation7 + $0x1e0] sm:$0xf]  ;;  %v3542_v63 = vor.u32 %v4197_v55, %v3539_v56  ;;  %v4194_v0 = vld [vmem:[#allocation7 + $0x1f4] sm:$0xf0]  ;;  %v4143_v1 = vld [vmem:[#allocation7 + $0x64] sm:$0xf]  ;;  %v3322_v5 = vor.u32 %v4146_v61, %v3321_v60 }
  0x4a   : > { %1027 = vmatpush.bf16.msra.mxu0 %v3370_v45  ;;  %v3323_v2 = vld [vmem:[#allocation7 + $0x78] sm:$0xf0]  ;;  %v4191_v3 = vld [vmem:[#allocation7 + $0x1e4] sm:$0xf]  ;;  %v3514_v6 = vor.u32 %v4194_v0, %v3513_v62  ;;  %v3297_v8 = vld [vmem:[#allocation7 + $0x30] sm:$0xf] }
  0x4b   : > { %1046 = vmatpush.bf16.msra.mxu1 %v3562_v46  ;;  %1065 = vmatpush.bf16.msra.mxu2 %v3374_v47  ;;  %v3515_v4 = vld [vmem:[#allocation7 + $0x1f8] sm:$0xf0]  ;;  %v3326_v7 = vor.u32 %v4143_v1, %v3323_v2  ;;  %v4140_v9 = vld [vmem:[#allocation7 + $0x44] sm:$0xf0]  ;;  %v3489_v10 = vld [vmem:[#allocation7 + $0x1b0] sm:$0xf] }
  0x4c   : > { %1084 = vmatpush.bf16.msra.mxu3 %v3566_v51  ;;  %v3518_v11 = vor.u32 %v4191_v3, %v3515_v4  ;;  %v4188_v12 = vld [vmem:[#allocation7 + $0x1c4] sm:$0xf0]  ;;  %v4137_v13 = vld [vmem:[#allocation7 + $0x34] sm:$0xf]  ;;  %v3299_v14 = vld [vmem:[#allocation7 + $0x48] sm:$0xf0]  ;;  %v3298_v17 = vor.u32 %v4140_v9, %v3297_v8 }
  0x4d   : > { %v4185_v15 = vld [vmem:[#allocation7 + $0x1b4] sm:$0xf]  ;;  %v3491_v16 = vld [vmem:[#allocation7 + $0x1c8] sm:$0xf0]  ;;  %v3273_v18 = vld [vmem:[#allocation7] sm:$0xf]  ;;  %v3490_v21 = vor.u32 %v4188_v12, %v3489_v10  ;;  %v3302_v22 = vor.u32 %v4137_v13, %v3299_v14 }
  0x4e   : > { %1028 = vmatpush.bf16.msra.mxu0 %v3346_v57  ;;  %v4134_v19 = vld [vmem:[#allocation7 + $0x14] sm:$0xf0]  ;;  %v3465_v20 = vld [vmem:[#allocation7 + $0x180] sm:$0xf]  ;;  %v4131_v24 = vld [vmem:[#allocation7 + $0x4] sm:$0xf]  ;;  %v3494_v26 = vor.u32 %v4185_v15, %v3491_v16 }
  0x4f   : > { %1047 = vmatpush.bf16.msra.mxu1 %v3538_v58  ;;  %1066 = vmatpush.bf16.msra.mxu2 %v3350_v59  ;;  %v4182_v23 = vld [vmem:[#allocation7 + $0x194] sm:$0xf0]  ;;  %v3275_v25 = vld [vmem:[#allocation7 + $0x18] sm:$0xf0]  ;;  %v4179_v27 = vld [vmem:[#allocation7 + $0x184] sm:$0xf]  ;;  %v3274_v33 = vor.u32 %v4134_v19, %v3273_v18 }
  0x50   : > { %1085 = vmatpush.bf16.msra.mxu3 %v3542_v63  ;;  %v3467_v28 = vld [vmem:[#allocation7 + $0x198] sm:$0xf0]  ;;  %v3449_v29 = vld [vmem:[#allocation7 + $0x158] sm:$0xf]  ;;  %v4177_v30 = vld [vmem:[#allocation7 + $0x16c] sm:$0xf0]  ;;  %v3466_v37 = vor.u32 %v4182_v23, %v3465_v20  ;;  %v3278_v38 = vor.u32 %v4131_v24, %v3275_v25 }
  0x51   : > { %v3641_v31 = vld [vmem:[#allocation7 + $0x2d8] sm:$0xf]  ;;  %v4225_v32 = vld [vmem:[#allocation7 + $0x2ec] sm:$0xf0]  ;;  %v4174_v34 = vld [vmem:[#allocation7 + $0x15c] sm:$0xf]  ;;  %v3470_v42 = vor.u32 %v4179_v27, %v3467_v28  ;;  %v3450_v43 = vor.u32 %v4177_v30, %v3449_v29 }
  0x52   : > { %1029 = vmatpush.bf16.msra.mxu0 %v3322_v5  ;;  %v3451_v35 = vld [vmem:[#allocation7 + $0x170] sm:$0xf0]  ;;  %v4222_v36 = vld [vmem:[#allocation7 + $0x2dc] sm:$0xf]  ;;  %v3257_v40 = vld [vmem:[%s4887_s27] sm:$0xf]  ;;  %v3642_v46 = vor.u32 %v4225_v32, %v3641_v31 }
  0x53   : > { %1048 = vmatpush.bf16.msra.mxu1 %v3514_v6  ;;  %1067 = vmatpush.bf16.msra.mxu2 %v3326_v7  ;;  %v3643_v39 = vld [vmem:[#allocation7 + $0x2f0] sm:$0xf0]  ;;  %v4128_v41 = vld [vmem:[%s4887_s27 + $0x4] sm:$0xf0]  ;;  %v4127_v44 = vld [vmem:[%s4887_s27 + $0x4] sm:$0xf]  ;;  %v3454_v47 = vor.u32 %v4174_v34, %v3451_v35 }
  0x54   : > { %1086 = vmatpush.bf16.msra.mxu3 %v3518_v11  ;;  %v3259_v45 = vld [vmem:[%s4887_s27 + $0x8] sm:$0xf0]  ;;  %v3425_v48 = vld [vmem:[#allocation7 + $0x128] sm:$0xf]  ;;  %v4171_v49 = vld [vmem:[#allocation7 + $0x13c] sm:$0xf0]  ;;  %v3646_v51 = vor.u32 %v4222_v36, %v3643_v39  ;;  %v4906_v52 = vor.u32 %v4128_v41, %v3257_v40 }
  0x55   : > { %v3617_v50 = vld [vmem:[#allocation7 + $0x2a8] sm:$0xf]  ;;  %v4219_v53 = vld [vmem:[#allocation7 + $0x2bc] sm:$0xf0]  ;;  %v4168_v54 = vld [vmem:[#allocation7 + $0x12c] sm:$0xf]  ;;  %v4908_v56 = vor.u32 %v4127_v44, %v3259_v45  ;;  %v3426_v59 = vor.u32 %v4171_v49, %v3425_v48 }
  0x56   : > { %1030 = vmatpush.bf16.msra.mxu0 %v3298_v17  ;;  %v3427_v55 = vld [vmem:[#allocation7 + $0x140] sm:$0xf0]  ;;  %v4216_v57 = vld [vmem:[#allocation7 + $0x2ac] sm:$0xf]  ;;  %v3618_v60 = vor.u32 %v4219_v53, %v3617_v50  ;;  %v3401_v62 = vld [vmem:[#allocation7 + $0xf8] sm:$0xf] }
  0x57   : > { %1049 = vmatpush.bf16.msra.mxu1 %v3490_v21  ;;  %1068 = vmatpush.bf16.msra.mxu2 %v3302_v22  ;;  %v3619_v58 = vld [vmem:[#allocation7 + $0x2c0] sm:$0xf0]  ;;  %v3430_v61 = vor.u32 %v4168_v54, %v3427_v55  ;;  %v4165_v63 = vld [vmem:[#allocation7 + $0x10c] sm:$0xf0]  ;;  %v3593_v0 = vld [vmem:[#allocation7 + $0x278] sm:$0xf] }
  0x58   : > { %1087 = vmatpush.bf16.msra.mxu3 %v3494_v26  ;;  %v3622_v1 = vor.u32 %v4216_v57, %v3619_v58  ;;  %v4213_v2 = vld [vmem:[#allocation7 + $0x28c] sm:$0xf0]  ;;  %v4162_v3 = vld [vmem:[#allocation7 + $0xfc] sm:$0xf]  ;;  %v3403_v4 = vld [vmem:[#allocation7 + $0x110] sm:$0xf0]  ;;  %v3402_v7 = vor.u32 %v4165_v63, %v3401_v62 }
  0x59   : > { %v4210_v5 = vld [vmem:[#allocation7 + $0x27c] sm:$0xf]  ;;  %v3595_v6 = vld [vmem:[#allocation7 + $0x290] sm:$0xf0]  ;;  %v3594_v8 = vor.u32 %v4213_v2, %v3593_v0  ;;  %v3406_v9 = vor.u32 %v4162_v3, %v3403_v4  ;;  %v3377_v10 = vld [vmem:[#allocation7 + $0xc8] sm:$0xf] }
  0x5a   : > { %1031 = vmatpush.bf16.msra.mxu0 %v3274_v33  ;;  %v4159_v11 = vld [vmem:[#allocation7 + $0xdc] sm:$0xf0]  ;;  %v3569_v12 = vld [vmem:[#allocation7 + $0x248] sm:$0xf]  ;;  %v3598_v13 = vor.u32 %v4210_v5, %v3595_v6  ;;  %v4156_v15 = vld [vmem:[#allocation7 + $0xcc] sm:$0xf] }
  0x5b   : > { %1050 = vmatpush.bf16.msra.mxu1 %v3466_v37  ;;  %1069 = vmatpush.bf16.msra.mxu2 %v3278_v38  ;;  %v4207_v14 = vld [vmem:[#allocation7 + $0x25c] sm:$0xf0]  ;;  %v3379_v16 = vld [vmem:[#allocation7 + $0xe0] sm:$0xf0]  ;;  %v4204_v17 = vld [vmem:[#allocation7 + $0x24c] sm:$0xf]  ;;  %v3378_v19 = vor.u32 %v4159_v11, %v3377_v10 }
  0x5c   : > { %1088 = vmatpush.bf16.msra.mxu3 %v3470_v42  ;;  %v3571_v18 = vld [vmem:[#allocation7 + $0x260] sm:$0xf0]  ;;  %v3353_v20 = vld [vmem:[#allocation7 + $0x98] sm:$0xf]  ;;  %v3570_v21 = vor.u32 %v4207_v14, %v3569_v12  ;;  %v3382_v22 = vor.u32 %v4156_v15, %v3379_v16  ;;  %v4153_v23 = vld [vmem:[#allocation7 + $0xac] sm:$0xf0] }
  0x5d   : > { %1032 = vmatmul.bf16.vlgmr.msra.gmra.mxu0 %v4906_v52  ;;  %v3545_v24 = vld [vmem:[#allocation7 + $0x218] sm:$0xf]  ;;  %v4201_v25 = vld [vmem:[#allocation7 + $0x22c] sm:$0xf0]  ;;  %v3574_v26 = vor.u32 %v4204_v17, %v3571_v18  ;;  %v4150_v27 = vld [vmem:[#allocation7 + $0x9c] sm:$0xf]  ;;  %v3354_v33 = vor.u32 %v4153_v23, %v3353_v20 }
  0x5e   : > { %1100 = vmatpush.bf16.msrb.mxu0 %v3450_v43  ;;  %1051 = vmatmul.bf16.vlgmr.msra.gmra.mxu1 %v4908_v56  ;;  %v3355_v28 = vld [vmem:[#allocation7 + $0xb0] sm:$0xf0]  ;;  %v4198_v29 = vld [vmem:[#allocation7 + $0x21c] sm:$0xf]  ;;  %v3265_v31 = vld [vmem:[%s4887_s27 + $0x10] sm:$0xf]  ;;  %v3546_v36 = vor.u32 %v4201_v25, %v3545_v24 }
  0x5f   : > { %1119 = vmatpush.bf16.msrb.mxu1 %v3642_v46  ;;  %1138 = vmatpush.bf16.msrb.mxu2 %v3454_v47  ;;  %v3547_v30 = vld [vmem:[#allocation7 + $0x230] sm:$0xf0]  ;;  %v4130_v32 = vld [vmem:[%s4887_s27 + $0x14] sm:$0xf0]  ;;  %v3267_v35 = vld [vmem:[%s4887_s27 + $0x18] sm:$0xf0]  ;;  %v3358_v37 = vor.u32 %v4150_v27, %v3355_v28 }
  0x60   : > { %1157 = vmatpush.bf16.msrb.mxu3 %v3646_v51  ;;  %1070 = vmatmul.bf16.vlgmr.msra.gmra.mxu2 %v4906_v52  ;;  %v4129_v34 = vld [vmem:[%s4887_s27 + $0x14] sm:$0xf]  ;;  %v3329_v38 = vld [vmem:[#allocation7 + $0x68] sm:$0xf]  ;;  %v4147_v39 = vld [vmem:[#allocation7 + $0x7c] sm:$0xf0]  ;;  %v3550_v41 = vor.u32 %v4198_v29, %v3547_v30  ;;  %v4918_v42 = vor.u32 %v4130_v32, %v3265_v31 }
  0x61   : > { %1089 = vmatmul.bf16.vlgmr.msra.gmra.mxu3 %v4908_v56  ;;  %v3521_v40 = vld [vmem:[#allocation7 + $0x1e8] sm:$0xf]  ;;  %v4195_v43 = vld [vmem:[#allocation7 + $0x1fc] sm:$0xf0]  ;;  %v4144_v44 = vld [vmem:[#allocation7 + $0x6c] sm:$0xf]  ;;  %v4920_v46 = vor.u32 %v4129_v34, %v3267_v35  ;;  %v3330_v49 = vor.u32 %v4147_v39, %v3329_v38 }
  0x62   : > { %1101 = vmatpush.bf16.msrb.mxu0 %v3426_v59  ;;  %v3331_v45 = vld [vmem:[#allocation7 + $0x80] sm:$0xf0]  ;;  %v4192_v47 = vld [vmem:[#allocation7 + $0x1ec] sm:$0xf]  ;;  %v3522_v50 = vor.u32 %v4195_v43, %v3521_v40  ;;  %v3305_v53 = vld [vmem:[#allocation7 + $0x38] sm:$0xf] }
  0x63   : > { %1120 = vmatpush.bf16.msrb.mxu1 %v3618_v60  ;;  %1139 = vmatpush.bf16.msrb.mxu2 %v3430_v61  ;;  %v3523_v48 = vld [vmem:[#allocation7 + $0x200] sm:$0xf0]  ;;  %v3334_v51 = vor.u32 %v4144_v44, %v3331_v45  ;;  %v4141_v54 = vld [vmem:[#allocation7 + $0x4c] sm:$0xf0]  ;;  %v3497_v55 = vld [vmem:[#allocation7 + $0x1b8] sm:$0xf] }
  0x64   : > { %1158 = vmatpush.bf16.msrb.mxu3 %v3622_v1  ;;  %v3526_v57 = vor.u32 %v4192_v47, %v3523_v48  ;;  %v4189_v58 = vld [vmem:[#allocation7 + $0x1cc] sm:$0xf0]  ;;  %v4138_v59 = vld [vmem:[#allocation7 + $0x3c] sm:$0xf]  ;;  %v3307_v60 = vld [vmem:[#allocation7 + $0x50] sm:$0xf0]  ;;  %v3306_v63 = vor.u32 %v4141_v54, %v3305_v53 }
  0x65   : > { %v4186_v61 = vld [vmem:[#allocation7 + $0x1bc] sm:$0xf]  ;;  %v3499_v62 = vld [vmem:[#allocation7 + $0x1d0] sm:$0xf0]  ;;  %v3281_v0 = vld [vmem:[#allocation7 + $0x8] sm:$0xf]  ;;  %v3498_v2 = vor.u32 %v4189_v58, %v3497_v55  ;;  %v3310_v3 = vor.u32 %v4138_v59, %v3307_v60 }
  0x66   : > { %1102 = vmatpush.bf16.msrb.mxu0 %v3402_v7  ;;  %v4135_v1 = vld [vmem:[#allocation7 + $0x1c] sm:$0xf0]  ;;  %v3473_v4 = vld [vmem:[#allocation7 + $0x188] sm:$0xf]  ;;  %v4132_v6 = vld [vmem:[#allocation7 + $0xc] sm:$0xf]  ;;  %v3502_v7 = vor.u32 %v4186_v61, %v3499_v62 }
  0x67   : > { %1121 = vmatpush.bf16.msrb.mxu1 %v3594_v8  ;;  %1140 = vmatpush.bf16.msrb.mxu2 %v3406_v9  ;;  %v4183_v5 = vld [vmem:[#allocation7 + $0x19c] sm:$0xf0]  ;;  %v3283_v8 = vld [vmem:[#allocation7 + $0x20] sm:$0xf0]  ;;  %v4180_v9 = vld [vmem:[#allocation7 + $0x18c] sm:$0xf]  ;;  %v3282_v14 = vor.u32 %v4135_v1, %v3281_v0 }
  0x68   : > { %1159 = vmatpush.bf16.msrb.mxu3 %v3598_v13  ;;  %v3475_v10 = vld [vmem:[#allocation7 + $0x1a0] sm:$0xf0]  ;;  %v3457_v11 = vld [vmem:[#allocation7 + $0x160] sm:$0xf]  ;;  %v4178_v12 = vld [vmem:[#allocation7 + $0x174] sm:$0xf0]  ;;  %v3474_v18 = vor.u32 %v4183_v5, %v3473_v4 }
  0x69   : > { %v3649_v13 = vld [vmem:[#allocation7 + $0x2e0] sm:$0xf]  ;;  %v4226_v15 = vld [vmem:[#allocation7 + $0x2f4] sm:$0xf0]  ;;  %v4175_v16 = vld [vmem:[#allocation7 + $0x164] sm:$0xf]  ;;  %v3458_v23 = vor.u32 %v4178_v12, %v3457_v11 }
  0x6a   : > { %1103 = vmatpush.bf16.msrb.mxu0 %v3378_v19  ;;  %v3459_v17 = vld [vmem:[#allocation7 + $0x178] sm:$0xf0]  ;;  %v3286_v19 = vor.u32 %v4132_v6, %v3283_v8  ;;  %v4223_v20 = vld [vmem:[#allocation7 + $0x2e4] sm:$0xf]  ;;  %v3650_v24 = vor.u32 %v4226_v15, %v3649_v13  ;;  %v4172_v27 = vld [vmem:[#allocation7 + $0x144] sm:$0xf0] }
  0x6b   : > { %1122 = vmatpush.bf16.msrb.mxu1 %v3570_v21  ;;  %1141 = vmatpush.bf16.msrb.mxu2 %v3382_v22  ;;  %v3651_v21 = vld [vmem:[#allocation7 + $0x2f8] sm:$0xf0]  ;;  %v3478_v22 = vor.u32 %v4180_v9, %v3475_v10  ;;  %v3462_v25 = vor.u32 %v4175_v16, %v3459_v17  ;;  %v3625_v28 = vld [vmem:[#allocation7 + $0x2b0] sm:$0xf]  ;;  %v4220_v30 = vld [vmem:[#allocation7 + $0x2c4] sm:$0xf0] }
  0x6c   : > { %1160 = vmatpush.bf16.msrb.mxu3 %v3574_v26  ;;  %v3433_v26 = vld [vmem:[#allocation7 + $0x130] sm:$0xf]  ;;  %v3654_v29 = vor.u32 %v4223_v20, %v3651_v21  ;;  %v4169_v31 = vld [vmem:[#allocation7 + $0x134] sm:$0xf]  ;;  %v3435_v32 = vld [vmem:[#allocation7 + $0x148] sm:$0xf0] }
  0x6d   : > { %1037 = vmatmul.bf16.gmra.mxu0 %v4918_v42  ;;  %v3627_v34 = vld [vmem:[#allocation7 + $0x2c8] sm:$0xf0]  ;;  %v3434_v35 = vor.u32 %v4172_v27, %v3433_v26  ;;  %v3409_v38 = vld [vmem:[#allocation7 + $0x100] sm:$0xf]  ;;  %v4166_v39 = vld [vmem:[#allocation7 + $0x114] sm:$0xf0] }
  0x6e   : > { %1104 = vmatpush.bf16.msrb.mxu0 %v3354_v33  ;;  %1056 = vmatmul.bf16.gmra.mxu1 %v4920_v46  ;;  %v4217_v33 = vld [vmem:[#allocation7 + $0x2b4] sm:$0xf]  ;;  %v3601_v40 = vld [vmem:[#allocation7 + $0x280] sm:$0xf]  ;;  %v4214_v43 = vld [vmem:[#allocation7 + $0x294] sm:$0xf0] }
  0x6f   : > { %1123 = vmatpush.bf16.msrb.mxu1 %v3546_v36  ;;  %1142 = vmatpush.bf16.msrb.mxu2 %v3358_v37  ;;  %v3626_v36 = vor.u32 %v4220_v30, %v3625_v28  ;;  %v3438_v37 = vor.u32 %v4169_v31, %v3435_v32  ;;  %v4163_v44 = vld [vmem:[#allocation7 + $0x104] sm:$0xf]  ;;  %v3411_v45 = vld [vmem:[#allocation7 + $0x118] sm:$0xf0]  ;;  %v3385_v53 = vld [vmem:[#allocation7 + $0xd0] sm:$0xf] }
  0x70   : > { %1161 = vmatpush.bf16.msrb.mxu3 %v3550_v41  ;;  %1075 = vmatmul.bf16.gmra.mxu2 %v4918_v42  ;;  %v3630_v41 = vor.u32 %v4217_v33, %v3627_v34  ;;  %v4211_v47 = vld [vmem:[#allocation7 + $0x284] sm:$0xf]  ;;  %v3603_v48 = vld [vmem:[#allocation7 + $0x298] sm:$0xf0]  ;;  %v4160_v54 = vld [vmem:[#allocation7 + $0xe4] sm:$0xf0] }
  0x71   : > { %1094 = vmatmul.bf16.gmra.mxu3 %v4920_v46  ;;  %v3577_v55 = vld [vmem:[#allocation7 + $0x250] sm:$0xf]  ;;  %v4208_v58 = vld [vmem:[#allocation7 + $0x264] sm:$0xf0]  ;;  %v4157_v59 = vld [vmem:[#allocation7 + $0xd4] sm:$0xf] }
  0x72   : > { %1105 = vmatpush.bf16.msrb.mxu0 %v3330_v49  ;;  %v3410_v49 = vor.u32 %v4166_v39, %v3409_v38  ;;  %v3387_v60 = vld [vmem:[#allocation7 + $0xe8] sm:$0xf0]  ;;  %v4205_v61 = vld [vmem:[#allocation7 + $0x254] sm:$0xf]  ;;  %v3578_v0 = vor.u32 %v4208_v58, %v3577_v55  ;;  %v3553_v4 = vld [vmem:[#allocation7 + $0x220] sm:$0xf] }
  0x73   : > { %1124 = vmatpush.bf16.msrb.mxu1 %v3522_v50  ;;  %1143 = vmatpush.bf16.msrb.mxu2 %v3334_v51  ;;  %v3602_v50 = vor.u32 %v4214_v43, %v3601_v40  ;;  %v3414_v51 = vor.u32 %v4163_v44, %v3411_v45  ;;  %v3579_v62 = vld [vmem:[#allocation7 + $0x268] sm:$0xf0]  ;;  %v3390_v1 = vor.u32 %v4157_v59, %v3387_v60  ;;  %v4202_v6 = vld [vmem:[#allocation7 + $0x234] sm:$0xf0]  ;;  %v3363_v8 = vld [vmem:[#allocation7 + $0xb8] sm:$0xf0] }
  0x74   : > { %1162 = vmatpush.bf16.msrb.mxu3 %v3526_v57  ;;  %v3606_v57 = vor.u32 %v4211_v47, %v3603_v48  ;;  %v3582_v5 = vor.u32 %v4205_v61, %v3579_v62  ;;  %v4199_v9 = vld [vmem:[#allocation7 + $0x224] sm:$0xf]  ;;  %v3555_v10 = vld [vmem:[#allocation7 + $0x238] sm:$0xf0]  ;;  %v3554_v12 = vor.u32 %v4202_v6, %v3553_v4  ;;  %v4148_v15 = vld [vmem:[#allocation7 + $0x84] sm:$0xf0] }
  0x75   : > { %v3529_v16 = vld [vmem:[#allocation7 + $0x1f0] sm:$0xf]  ;;  %v3558_v17 = vor.u32 %v4199_v9, %v3555_v10  ;;  %v3339_v20 = vld [vmem:[#allocation7 + $0x88] sm:$0xf0]  ;;  %v4193_v21 = vld [vmem:[#allocation7 + $0x1f4] sm:$0xf] }
  0x76   : > { %1106 = vmatpush.bf16.msrb.mxu0 %v3306_v63  ;;  %v3386_v63 = vor.u32 %v4160_v54, %v3385_v53  ;;  %v3313_v26 = vld [vmem:[#allocation7 + $0x40] sm:$0xf]  ;;  %v4142_v27 = vld [vmem:[#allocation7 + $0x54] sm:$0xf0]  ;;  %v4139_v31 = vld [vmem:[#allocation7 + $0x44] sm:$0xf] }
  0x77   : > { %1125 = vmatpush.bf16.msrb.mxu1 %v3498_v2  ;;  %1144 = vmatpush.bf16.msrb.mxu2 %v3310_v3  ;;  %v3361_v2 = vld [vmem:[#allocation7 + $0xa0] sm:$0xf]  ;;  %v4154_v3 = vld [vmem:[#allocation7 + $0xb4] sm:$0xf0]  ;;  %v3315_v32 = vld [vmem:[#allocation7 + $0x58] sm:$0xf0] }
  0x78   : > { %1163 = vmatpush.bf16.msrb.mxu3 %v3502_v7  ;;  %v4151_v7 = vld [vmem:[#allocation7 + $0xa4] sm:$0xf]  ;;  %v3362_v11 = vor.u32 %v4154_v3, %v3361_v2  ;;  %v3505_v28 = vld [vmem:[#allocation7 + $0x1c0] sm:$0xf]  ;;  %v4190_v30 = vld [vmem:[#allocation7 + $0x1d4] sm:$0xf0]  ;;  %v3318_v39 = vor.u32 %v4139_v31, %v3315_v32 }
  0x79   : > { %v3366_v13 = vor.u32 %v4151_v7, %v3363_v8  ;;  %v4187_v33 = vld [vmem:[#allocation7 + $0x1c4] sm:$0xf]  ;;  %v3507_v34 = vld [vmem:[#allocation7 + $0x1d8] sm:$0xf0]  ;;  %v3506_v38 = vor.u32 %v4190_v30, %v3505_v28  ;;  %v3481_v40 = vld [vmem:[#allocation7 + $0x190] sm:$0xf] }
  0x7a   : > { %1107 = vmatpush.bf16.msrb.mxu0 %v3282_v14  ;;  %v3337_v14 = vld [vmem:[#allocation7 + $0x70] sm:$0xf]  ;;  %v4133_v43 = vld [vmem:[#allocation7 + $0x14] sm:$0xf]  ;;  %v3510_v44 = vor.u32 %v4187_v33, %v3507_v34  ;;  %v3291_v45 = vld [vmem:[#allocation7 + $0x28] sm:$0xf0] }
  0x7b   : > { %1126 = vmatpush.bf16.msrb.mxu1 %v3474_v18  ;;  %1145 = vmatpush.bf16.msrb.mxu2 %v3286_v19  ;;  %v4196_v18 = vld [vmem:[#allocation7 + $0x204] sm:$0xf0]  ;;  %v4145_v19 = vld [vmem:[#allocation7 + $0x74] sm:$0xf]  ;;  %v3483_v48 = vld [vmem:[#allocation7 + $0x1a8] sm:$0xf0]  ;;  %v3294_v59 = vor.u32 %v4133_v43, %v3291_v45 }
  0x7c   : > { %1164 = vmatpush.bf16.msrb.mxu3 %v3478_v22  ;;  %v3531_v22 = vld [vmem:[#allocation7 + $0x208] sm:$0xf0]  ;;  %v4181_v47 = vld [vmem:[#allocation7 + $0x194] sm:$0xf]  ;;  %v4320_v54 = vld [vmem:[#allocation9 + $0x2e4] sm:$0xf0] }
  0x7d   : > { %1108 = vmatmul.bf16.vlgmr.msrb.gmra.mxu0 %v4906_v52  ;;  %v4269_v55 = vld [vmem:[#allocation9 + $0x154] sm:$0xf]  ;;  %v4019_v61 = vld [vmem:[#allocation9 + $0x2e8] sm:$0xf0]  ;;  %v3486_v62 = vor.u32 %v4181_v47, %v3483_v48  ;;  %v3801_v2 = vld [vmem:[#allocation9 + $0x120] sm:$0xf] }
  0x7e   : > { %1176 = vmatpush.bf16.msra.mxu0 %v3458_v23  ;;  %1127 = vmatmul.bf16.vlgmr.msrb.gmra.mxu1 %v4908_v56  ;;  %v3338_v23 = vor.u32 %v4148_v15, %v3337_v14  ;;  %v4317_v60 = vld [vmem:[#allocation9 + $0x2d4] sm:$0xf]  ;;  %v4266_v3 = vld [vmem:[#allocation9 + $0x134] sm:$0xf0]  ;;  %v3993_v4 = vld [vmem:[#allocation9 + $0x2a0] sm:$0xf] }
  0x7f   : > { %1195 = vmatpush.bf16.msra.mxu1 %v3650_v24  ;;  %1214 = vmatpush.bf16.msra.mxu2 %v3462_v25  ;;  %v3530_v24 = vor.u32 %v4196_v18, %v3529_v16  ;;  %v3342_v25 = vor.u32 %v4145_v19, %v3339_v20  ;;  %v4314_v6 = vld [vmem:[#allocation9 + $0x2b4] sm:$0xf0]  ;;  %v4263_v7 = vld [vmem:[#allocation9 + $0x124] sm:$0xf]  ;;  %v3803_v8 = vld [vmem:[#allocation9 + $0x138] sm:$0xf0] }
  0x80   : > { %1233 = vmatpush.bf16.msra.mxu3 %v3654_v29  ;;  %1146 = vmatmul.bf16.vlgmr.msrb.gmra.mxu2 %v4906_v52  ;;  %v3534_v29 = vor.u32 %v4193_v21, %v3531_v22  ;;  %v4311_v9 = vld [vmem:[#allocation9 + $0x2a4] sm:$0xf]  ;;  %v3995_v10 = vld [vmem:[#allocation9 + $0x2b8] sm:$0xf0]  ;;  %v3777_v15 = vld [vmem:[#allocation9 + $0xf0] sm:$0xf] }
  0x81   : > { %1165 = vmatmul.bf16.vlgmr.msrb.gmra.mxu3 %v4908_v56  ;;  %v4952_v14 = vor.u32 %v4311_v9, %v3995_v10  ;;  %v4260_v16 = vld [vmem:[#allocation9 + $0x104] sm:$0xf0]  ;;  %v4257_v19 = vld [vmem:[#allocation9 + $0xf4] sm:$0xf]  ;;  %v3779_v20 = vld [vmem:[#allocation9 + $0x108] sm:$0xf0] }
  0x82   : > { %1177 = vmatpush.bf16.msra.mxu0 %v3434_v35  ;;  %v3314_v35 = vor.u32 %v4142_v27, %v3313_v26  ;;  %v4308_v18 = vld [vmem:[#allocation9 + $0x284] sm:$0xf0]  ;;  %v4305_v21 = vld [vmem:[#allocation9 + $0x274] sm:$0xf]  ;;  %v3971_v22 = vld [vmem:[#allocation9 + $0x288] sm:$0xf0] }
  0x83   : > { %1196 = vmatpush.bf16.msra.mxu1 %v3626_v36  ;;  %1215 = vmatpush.bf16.msra.mxu2 %v3438_v37  ;;  %v3289_v36 = vld [vmem:[#allocation7 + $0x10] sm:$0xf]  ;;  %v4136_v37 = vld [vmem:[#allocation7 + $0x24] sm:$0xf0]  ;;  %6051 = vst [vmem:[#allocation22_spill] sm:$0xff] %v4952_v14  ;;  %s5482_s25 = sshll.u32 %s4726_s30, 2 }
  0x84   : > { %1234 = vmatpush.bf16.msra.mxu3 %v3630_v41  ;;  %v4184_v41 = vld [vmem:[#allocation7 + $0x1a4] sm:$0xf0]  ;;  %v3290_v53 = vor.u32 %v4136_v37, %v3289_v36  ;;  %v3753_v26 = vld [vmem:[#allocation9 + $0xc0] sm:$0xf]  ;;  %v4254_v27 = vld [vmem:[#allocation9 + $0xd4] sm:$0xf0] }
  0x85   : > { %v3482_v58 = vor.u32 %v4184_v41, %v3481_v40  ;;  %v3945_v28 = vld [vmem:[#allocation9 + $0x240] sm:$0xf]  ;;  %v4302_v30 = vld [vmem:[#allocation9 + $0x254] sm:$0xf0]  ;;  %v4251_v31 = vld [vmem:[#allocation9 + $0xc4] sm:$0xf] }
  0x86   : > { %1178 = vmatpush.bf16.msra.mxu0 %v3410_v49  ;;  %v3825_v49 = vld [vmem:[#allocation9 + $0x150] sm:$0xf]  ;;  %v3755_v32 = vld [vmem:[#allocation9 + $0xd8] sm:$0xf0]  ;;  %v4299_v33 = vld [vmem:[#allocation9 + $0x244] sm:$0xf]  ;;  %v4975_v36 = vor.u32 %v4302_v30, %v3945_v28 }
  0x87   : > { %1197 = vmatpush.bf16.msra.mxu1 %v3602_v50  ;;  %1216 = vmatpush.bf16.msra.mxu2 %v3414_v51  ;;  %v4272_v50 = vld [vmem:[#allocation9 + $0x164] sm:$0xf0]  ;;  %v4017_v51 = vld [vmem:[#allocation9 + $0x2d0] sm:$0xf]  ;;  %v3947_v34 = vld [vmem:[#allocation9 + $0x258] sm:$0xf0]  ;;  %v4977_v37 = vor.u32 %v4251_v31, %v3755_v32 }
  0x88   : > { %1235 = vmatpush.bf16.msra.mxu3 %v3606_v57  ;;  %v3827_v57 = vld [vmem:[#allocation9 + $0x168] sm:$0xf0]  ;;  %6057 = vst [vmem:[#allocation28_spill] sm:$0xff] %v4975_v36  ;;  %v3921_v40 = vld [vmem:[#allocation9 + $0x210] sm:$0xf]  ;;  %s2127_s20 = ssub.s32 7, %s5482_s25 }
  0x89   : > { %6058 = vst [vmem:[#allocation29_spill] sm:$0xff] %v4977_v37  ;;  %v4245_v41 = vld [vmem:[#allocation9 + $0x94] sm:$0xf]  ;;  %v3731_v43 = vld [vmem:[#allocation9 + $0xa8] sm:$0xf0]  ;;  %s2400_s15 = sadd.s32 1, %s5482_s25 }
  0x8a   : > { %1179 = vmatpush.bf16.msra.mxu0 %v3386_v63  ;;  %v4934_v63 = vor.u32 %v4272_v50, %v3825_v49  ;;  %v3923_v45 = vld [vmem:[#allocation9 + $0x228] sm:$0xf0]  ;;  %v4989_v49 = vor.u32 %v4245_v41, %v3731_v43  ;;  %v3705_v50 = vld [vmem:[#allocation9 + $0x60] sm:$0xf]  ;;  %v4233_v9 = vld [vmem:[#allocation9 + $0x34] sm:$0xf] }
  0x8b   : > { %1198 = vmatpush.bf16.msra.mxu1 %v3578_v0  ;;  %1217 = vmatpush.bf16.msra.mxu2 %v3390_v1  ;;  %v4936_v0 = vor.u32 %v4320_v54, %v4017_v51  ;;  %v4938_v1 = vor.u32 %v4269_v55, %v3827_v57  ;;  %v4242_v51 = vld [vmem:[#allocation9 + $0x74] sm:$0xf0]  ;;  %v4239_v57 = vld [vmem:[#allocation9 + $0x64] sm:$0xf]  ;;  %v3683_v10 = vld [vmem:[#allocation9 + $0x48] sm:$0xf0] }
  0x8c   : > { %1236 = vmatpush.bf16.msra.mxu3 %v3582_v5  ;;  %v4940_v5 = vor.u32 %v4317_v60, %v4019_v61  ;;  %6062 = vst [vmem:[#allocation33_spill] sm:$0xff] %v4989_v49  ;;  %v4290_v55 = vld [vmem:[#allocation9 + $0x1f4] sm:$0xf0]  ;;  %v3899_v60 = vld [vmem:[#allocation9 + $0x1f8] sm:$0xf0]  ;;  %v4995_v61 = vor.u32 %v4242_v51, %v3705_v50  ;;  %s2401_s18 = ssub.s32 6, %s5482_s25 }
  0x8d   : > { %1113 = vmatmul.bf16.gmra.mxu0 %v4918_v42  ;;  %6046 = vst [vmem:[#allocation17_spill] sm:$0xff] %v4936_v0  ;;  %v3659_v30 = vld [vmem:[#allocation9 + $0x18] sm:$0xf0]  ;;  %v4275_v31 = vld [vmem:[#allocation9 + $0x184] sm:$0xf]  ;;  %s2671_s21 = sadd.s32 2, %s5482_s25 }
  0x8e   : > { %1180 = vmatpush.bf16.msra.mxu0 %v3362_v11  ;;  %1132 = vmatmul.bf16.gmra.mxu1 %v4920_v46  ;;  %6047 = vst [vmem:[#allocation18_spill] sm:$0xff] %v4940_v5  ;;  %v4943_v11 = vor.u32 %v4266_v3, %v3801_v2  ;;  %v3681_v3 = vld [vmem:[#allocation9 + $0x30] sm:$0xf]  ;;  %v3851_v32 = vld [vmem:[#allocation9 + $0x198] sm:$0xf0]  ;;  %s2672_s22 = ssub.s32 5, %s5482_s25 }
  0x8f   : > { %1199 = vmatpush.bf16.msra.mxu1 %v3554_v12  ;;  %1218 = vmatpush.bf16.msra.mxu2 %v3366_v13  ;;  %v4947_v12 = vor.u32 %v4314_v6, %v3993_v4  ;;  %v4949_v13 = vor.u32 %v4263_v7, %v3803_v8  ;;  %6064 = vst [vmem:[#allocation35_spill] sm:$0xff] %v4995_v61  ;;  %v4236_v4 = vld [vmem:[#allocation9 + $0x44] sm:$0xf0]  ;;  %v3873_v6 = vld [vmem:[#allocation9 + $0x1b0] sm:$0xf]  ;;  %s2942_s16 = sadd.s32 3, %s5482_s25 }
  0x90   : > { %1237 = vmatpush.bf16.msra.mxu3 %v3558_v17  ;;  %1151 = vmatmul.bf16.gmra.mxu2 %v4918_v42  ;;  %6048 = vst [vmem:[#allocation19_spill] sm:$0xff] %v4943_v11  ;;  %v3969_v17 = vld [vmem:[#allocation9 + $0x270] sm:$0xf]  ;;  %v4284_v8 = vld [vmem:[#allocation9 + $0x1c4] sm:$0xf0]  ;;  %s2943_s19 = ssub.s32 4, %s5482_s25 }
  0x91   : > { %1170 = vmatmul.bf16.gmra.mxu3 %v4920_v46  ;;  %6049 = vst [vmem:[#allocation20_spill] sm:$0xff] %v4947_v12  ;;  %v3835_v41 = vld [vmem:[#allocation9 + $0x170] sm:$0xf0]  ;;  %p4056_p1 = scmp.ne.s32.totalorder %s4726_s30, 1 }
  0x92   : > { %1181 = vmatpush.bf16.msra.mxu0 %v3338_v23  ;;  %6050 = vst [vmem:[#allocation21_spill] sm:$0xff] %v4949_v13  ;;  %v4958_v23 = vor.u32 %v4260_v16, %v3777_v15  ;;  %v4281_v15 = vld [vmem:[#allocation9 + $0x1b4] sm:$0xf]  ;;  %v3875_v16 = vld [vmem:[#allocation9 + $0x1c8] sm:$0xf0] }
  0x93   : > { %1200 = vmatpush.bf16.msra.mxu1 %v3530_v24  ;;  %1219 = vmatpush.bf16.msra.mxu2 %v3342_v25  ;;  %v4960_v24 = vor.u32 %v4308_v18, %v3969_v17  ;;  %v4962_v25 = vor.u32 %v4257_v19, %v3779_v20  ;;  %v5007_v17 = vor.u32 %v4236_v4, %v3681_v3  ;;  %v3657_v18 = vld [vmem:[#allocation9] sm:$0xf]  ;;  %v4230_v19 = vld [vmem:[#allocation9 + $0x14] sm:$0xf0]  ;;  %v4264_v3 = vld [vmem:[#allocation9 + $0x12c] sm:$0xf] }
  0x94   : > { %1238 = vmatpush.bf16.msra.mxu3 %v3534_v29  ;;  %6052 = vst [vmem:[#allocation23_spill] sm:$0xff] %v4958_v23  ;;  %v4965_v29 = vor.u32 %v4305_v21, %v3971_v22  ;;  %v5011_v20 = vor.u32 %v4284_v8, %v3873_v6  ;;  %v5013_v21 = vor.u32 %v4233_v9, %v3683_v10  ;;  %v3849_v22 = vld [vmem:[#allocation9 + $0x180] sm:$0xf]  ;;  %v3811_v4 = vld [vmem:[#allocation9 + $0x140] sm:$0xf0] }
  0x95   : > { %6053 = vst [vmem:[#allocation24_spill] sm:$0xff] %v4960_v24  ;;  %v5017_v28 = vor.u32 %v4281_v15, %v3875_v16  ;;  %v4312_v6 = vld [vmem:[#allocation9 + $0x2ac] sm:$0xf]  ;;  %v4003_v8 = vld [vmem:[#allocation9 + $0x2c0] sm:$0xf0]  ;;  %v5053_v15 = vor.u32 %v4264_v3, %v3811_v4 }
  0x96   : > { %1182 = vmatpush.bf16.msra.mxu0 %v3314_v35  ;;  %6054 = vst [vmem:[#allocation25_spill] sm:$0xff] %v4962_v25  ;;  %v4971_v35 = vor.u32 %v4254_v27, %v3753_v26  ;;  %v4278_v26 = vld [vmem:[#allocation9 + $0x194] sm:$0xf0]  ;;  %v4227_v27 = vld [vmem:[#allocation9 + $0x4] sm:$0xf] }
  0x97   : > { %1201 = vmatpush.bf16.msra.mxu1 %v3506_v38  ;;  %1220 = vmatpush.bf16.msra.mxu2 %v3318_v39  ;;  %6055 = vst [vmem:[#allocation26_spill] sm:$0xff] %v4965_v29  ;;  %v3729_v38 = vld [vmem:[#allocation9 + $0x90] sm:$0xf]  ;;  %v4248_v39 = vld [vmem:[#allocation9 + $0xa4] sm:$0xf0]  ;;  %v5027_v43 = vor.u32 %v4278_v26, %v3849_v22  ;;  %v5056_v22 = vor.u32 %v4312_v6, %v4003_v8 }
  0x98   : > { %1239 = vmatpush.bf16.msra.mxu3 %v3510_v44  ;;  %6056 = vst [vmem:[#allocation27_spill] sm:$0xff] %v4971_v35  ;;  %v4293_v44 = vld [vmem:[#allocation9 + $0x214] sm:$0xf]  ;;  %v4983_v47 = vor.u32 %v4248_v39, %v3729_v38  ;;  %v4025_v38 = vld [vmem:[#allocation9 + $0x2d8] sm:$0xf]  ;;  %v5023_v39 = vor.u32 %v4230_v19, %v3657_v18 }
  0x99   : > { %v4992_v54 = vor.u32 %v4293_v44, %v3923_v45  ;;  %6068 = vst [vmem:[#allocation39_spill] sm:$0xff] %v5007_v17  ;;  %v5029_v44 = vor.u32 %v4227_v27, %v3659_v30  ;;  %v4027_v45 = vld [vmem:[#allocation9 + $0x2f0] sm:$0xf0]  ;;  %v3785_v16 = vld [vmem:[#allocation9 + $0xf8] sm:$0xf] }
  0x9a   : > { %1183 = vmatpush.bf16.msra.mxu0 %v3290_v53  ;;  %6060 = vst [vmem:[#allocation31_spill] sm:$0xff] %v4983_v47  ;;  %v3897_v53 = vld [vmem:[#allocation9 + $0x1e0] sm:$0xf]  ;;  %v4261_v18 = vld [vmem:[#allocation9 + $0x10c] sm:$0xf0] }
  0x9b   : > { %1202 = vmatpush.bf16.msra.mxu1 %v3482_v58  ;;  %1221 = vmatpush.bf16.msra.mxu2 %v3294_v59  ;;  %6063 = vst [vmem:[#allocation34_spill] sm:$0xff] %v4992_v54  ;;  %v3707_v58 = vld [vmem:[#allocation9 + $0x78] sm:$0xf0]  ;;  %v4287_v59 = vld [vmem:[#allocation9 + $0x1e4] sm:$0xf] }
  0x9c   : > { %1240 = vmatpush.bf16.msra.mxu3 %v3486_v62  ;;  %v4999_v62 = vor.u32 %v4290_v55, %v3897_v53  ;;  %v5001_v2 = vor.u32 %v4239_v57, %v3707_v58  ;;  %v5004_v7 = vor.u32 %v4287_v59, %v3899_v60  ;;  %6069 = vst [vmem:[#allocation40_spill] sm:$0xff] %v5011_v20  ;;  %v3809_v55 = vld [vmem:[#allocation9 + $0x128] sm:$0xf]  ;;  %v4267_v57 = vld [vmem:[#allocation9 + $0x13c] sm:$0xf0] }
  0x9d   : > { %1184 = vmatmul.bf16.vlgmr.msra.gmra.mxu0 %v4906_v52  ;;  %6070 = vst [vmem:[#allocation41_spill] sm:$0xff] %v5013_v21  ;;  %v4001_v58 = vld [vmem:[#allocation9 + $0x2a8] sm:$0xf]  ;;  %v4315_v60 = vld [vmem:[#allocation9 + $0x2bc] sm:$0xf0]  ;;  %v5047_v9 = vor.u32 %v4267_v57, %v3809_v55 }
  0x9e   : > { %1869 = vmatpush.bf16.msrb.mxu0 %v4934_v63  ;;  %1203 = vmatmul.bf16.vlgmr.msra.gmra.mxu1 %v4908_v56  ;;  %6065 = vst [vmem:[#allocation36_spill] sm:$0xff] %v4999_v62  ;;  %v5051_v10 = vor.u32 %v4315_v60, %v4001_v58  ;;  %v3977_v19 = vld [vmem:[#allocation9 + $0x278] sm:$0xf]  ;;  %v4309_v26 = vld [vmem:[#allocation9 + $0x28c] sm:$0xf0] }
  0x9f   : > { %1882 = vmatpush.bf16.msrb.mxu1 %v4936_v0  ;;  %1895 = vmatpush.bf16.msrb.mxu2 %v4938_v1  ;;  %6066 = vst [vmem:[#allocation37_spill] sm:$0xff] %v5001_v2  ;;  %v4258_v27 = vld [vmem:[#allocation9 + $0xfc] sm:$0xf]  ;;  %v3787_v30 = vld [vmem:[#allocation9 + $0x110] sm:$0xf0] }
  0xa0   : > { %1908 = vmatpush.bf16.msrb.mxu3 %v4940_v5  ;;  %1222 = vmatmul.bf16.vlgmr.msra.gmra.mxu2 %v4906_v52  ;;  %v4980_v52 = vor.u32 %v4299_v33, %v3947_v34  ;;  %6067 = vst [vmem:[#allocation38_spill] sm:$0xff] %v5004_v7  ;;  %v3833_v33 = vld [vmem:[#allocation9 + $0x158] sm:$0xf]  ;;  %v4273_v34 = vld [vmem:[#allocation9 + $0x16c] sm:$0xf0] }
  0xa1   : > { %1241 = vmatmul.bf16.vlgmr.msra.gmra.mxu3 %v4908_v56  ;;  %v4296_v56 = vld [vmem:[#allocation9 + $0x224] sm:$0xf0]  ;;  %6071 = vst [vmem:[#allocation42_spill] sm:$0xff] %v5017_v28  ;;  %v5034_v50 = vor.u32 %v4273_v34, %v3833_v33  ;;  %v5058_v33 = vld [vmem:[#allocation2] sm:$0xff]  ;;  %v5061_v34 = vor.u32 %v4261_v18, %v3785_v16  ;;  %v4303_v58 = vld [vmem:[#allocation9 + $0x25c] sm:$0xf0] }
  0xa2   : > { %1870 = vmatpush.bf16.msrb.mxu0 %v4943_v11  ;;  %6059 = vst [vmem:[#allocation30_spill] sm:$0xff] %v4980_v52  ;;  %v4987_v48 = vor.u32 %v4296_v56, %v3921_v40  ;;  %v4321_v40 = vld [vmem:[#allocation9 + $0x2ec] sm:$0xf0]  ;;  %v4270_v56 = vld [vmem:[#allocation9 + $0x15c] sm:$0xf]  ;;  %v5074_v57 = vpack.c.bf16 %v5058_v33, %v5058_v33 }
  0xa3   : > { %1883 = vmatpush.bf16.msrb.mxu1 %v4947_v12  ;;  %1896 = vmatpush.bf16.msrb.mxu2 %v4949_v13  ;;  %6072 = vst [vmem:[#allocation43_spill] sm:$0xff] %v5023_v39  ;;  %v5036_v51 = vor.u32 %v4321_v40, %v4025_v38  ;;  %v5038_v53 = vor.u32 %v4270_v56, %v3835_v41  ;;  %v1380_v38 = vld [vmem:[#allocation2 + $0x8] sm:$0xff]  ;;  %v3761_v41 = vld [vmem:[#allocation9 + $0xc8] sm:$0xf]  ;;  %v4252_v60 = vld [vmem:[#allocation9 + $0xcc] sm:$0xf] }
  0xa4   : > { %1909 = vmatpush.bf16.msrb.mxu3 %v4952_v14  ;;  %6061 = vst [vmem:[#allocation32_spill] sm:$0xff] %v4987_v48  ;;  %v5065_v40 = vor.u32 %v4309_v26, %v3977_v19  ;;  %v5067_v56 = vor.u32 %v4258_v27, %v3787_v30  ;;  %v3763_v3 = vld [vmem:[#allocation9 + $0xe0] sm:$0xf0]  ;;  %v5076_v4 = vpack.c.bf16 %v1380_v38, %v1380_v38  ;;  %v4300_v6 = vld [vmem:[#allocation9 + $0x24c] sm:$0xf] }
  0xa5   : > { %6073 = vst [vmem:[#allocation44_spill] sm:$0xff] %v5027_v43  ;;  %v3955_v8 = vld [vmem:[#allocation9 + $0x260] sm:$0xf0]  ;;  %v5085_v19 = vor.u32 %v4252_v60, %v3763_v3  ;;  %v3737_v26 = vld [vmem:[#allocation9 + $0x98] sm:$0xf] }
  0xa6   : > { %1871 = vmatpush.bf16.msrb.mxu0 %v4958_v23  ;;  %6074 = vst [vmem:[#allocation45_spill] sm:$0xff] %v5029_v44  ;;  %v4249_v27 = vld [vmem:[#allocation9 + $0xac] sm:$0xf0]  ;;  %v3929_v30 = vld [vmem:[#allocation9 + $0x218] sm:$0xf] }
  0xa7   : > { %1884 = vmatpush.bf16.msrb.mxu1 %v4960_v24  ;;  %1897 = vmatpush.bf16.msrb.mxu2 %v4962_v25  ;;  %6076 = vst [vmem:[#allocation47_spill] sm:$0xff] %v5034_v50  ;;  %v4246_v38 = vld [vmem:[#allocation9 + $0x9c] sm:$0xf] }
  0xa8   : > { %1910 = vmatpush.bf16.msrb.mxu3 %v4965_v29  ;;  %6077 = vst [vmem:[#allocation48_spill] sm:$0xff] %v5036_v51 }
  0xa9   : > { %6078 = vst [vmem:[#allocation49_spill] sm:$0xff] %v5038_v53 }
  0xaa   : > { %1872 = vmatpush.bf16.msrb.mxu0 %v4971_v35  ;;  %6080 = vst [vmem:[#allocation51_spill] sm:$0xff] %v5047_v9 }
  0xab   : > { %1885 = vmatpush.bf16.msrb.mxu1 %v4975_v36  ;;  %1898 = vmatpush.bf16.msrb.mxu2 %v4977_v37  ;;  %6081 = vst [vmem:[#allocation52_spill] sm:$0xff] %v5051_v10 }
  0xac   : > { %1911 = vmatpush.bf16.msrb.mxu3 %v4980_v52  ;;  %6082 = vst [vmem:[#allocation53_spill] sm:$0xff] %v5053_v15 }
  0xad   : > { %1189 = vmatmul.bf16.gmra.mxu0 %v4918_v42  ;;  %6083 = vst [vmem:[#allocation54_spill] sm:$0xff] %v5056_v22 }
  0xae   : > { %1873 = vmatpush.bf16.msrb.mxu0 %v4983_v47  ;;  %1208 = vmatmul.bf16.gmra.mxu1 %v4920_v46  ;;  %6084 = vst [vmem:[#allocation55_spill] sm:$0xff] %v5058_v33  ;;  %v3905_v33 = vld [vmem:[#allocation9 + $0x1e8] sm:$0xf] }
  0xaf   : > { %1886 = vmatpush.bf16.msrb.mxu1 %v4987_v48  ;;  %1899 = vmatpush.bf16.msrb.mxu2 %v4989_v49  ;;  %6085 = vst [vmem:[#allocation56_spill] sm:$0xff] %v5061_v34 }
  0xb0   : > { %1912 = vmatpush.bf16.msrb.mxu3 %v4992_v54  ;;  %1227 = vmatmul.bf16.gmra.mxu2 %v4918_v42  ;;  %v4318_v42 = vld [vmem:[#allocation9 + $0x2dc] sm:$0xf]  ;;  %6086 = vst [vmem:[#allocation57_spill] sm:$0xff] %v5065_v40 }
  0xb1   : > { %1246 = vmatmul.bf16.gmra.mxu3 %v4920_v46  ;;  %v5032_v46 = vor.u32 %v4275_v31, %v3851_v32  ;;  %v5041_v59 = vor.u32 %v4318_v42, %v4027_v45  ;;  %v4306_v31 = vld [vmem:[#allocation9 + $0x27c] sm:$0xf]  ;;  %v3979_v32 = vld [vmem:[#allocation9 + $0x290] sm:$0xf0]  ;;  %6087 = vst [vmem:[#allocation58_spill] sm:$0xff] %v5067_v56 }
  0xb2   : > { %1874 = vmatpush.bf16.msrb.mxu0 %v4995_v61  ;;  %v4255_v42 = vld [vmem:[#allocation9 + $0xdc] sm:$0xf0]  ;;  %v3953_v45 = vld [vmem:[#allocation9 + $0x248] sm:$0xf]  ;;  %v5070_v55 = vor.u32 %v4306_v31, %v3979_v32  ;;  %6091 = vst [vmem:[#allocation62_spill] sm:$0xff] %v5085_v19  ;;  %v5089_v31 = vor.u32 %v4300_v6, %v3955_v8 }
  0xb3   : > { %1887 = vmatpush.bf16.msrb.mxu1 %v4999_v62  ;;  %1900 = vmatpush.bf16.msrb.mxu2 %v5001_v2  ;;  %6075 = vst [vmem:[#allocation46_spill] sm:$0xff] %v5032_v46  ;;  %v5079_v16 = vor.u32 %v4255_v42, %v3761_v41  ;;  %v5083_v18 = vor.u32 %v4303_v58, %v3953_v45  ;;  %v4297_v32 = vld [vmem:[#allocation9 + $0x22c] sm:$0xf0]  ;;  %v3739_v41 = vld [vmem:[#allocation9 + $0xb0] sm:$0xf0] }
  0xb4   : > { %1913 = vmatpush.bf16.msrb.mxu3 %v5004_v7  ;;  %6079 = vst [vmem:[#allocation50_spill] sm:$0xff] %v5041_v59  ;;  %v4294_v42 = vld [vmem:[#allocation9 + $0x21c] sm:$0xf]  ;;  %v3931_v45 = vld [vmem:[#allocation9 + $0x230] sm:$0xf0]  ;;  %v5095_v58 = vor.u32 %v4249_v27, %v3737_v26  ;;  %v5099_v60 = vor.u32 %v4297_v32, %v3929_v30  ;;  %v5101_v3 = vor.u32 %v4246_v38, %v3739_v41 }
  0xb5   : > { %6088 = vst [vmem:[#allocation59_spill] sm:$0xff] %v5070_v55  ;;  %v3713_v6 = vld [vmem:[#allocation9 + $0x68] sm:$0xf]  ;;  %v4243_v8 = vld [vmem:[#allocation9 + $0x7c] sm:$0xf0] }
  0xb6   : > { %1875 = vmatpush.bf16.msrb.mxu0 %v5007_v17  ;;  %6089 = vst [vmem:[#allocation60_spill] sm:$0xff] %v5079_v16  ;;  %v4288_v26 = vld [vmem:[#allocation9 + $0x1ec] sm:$0xf]  ;;  %v3907_v27 = vld [vmem:[#allocation9 + $0x200] sm:$0xf0] }
  0xb7   : > { %1888 = vmatpush.bf16.msrb.mxu1 %v5011_v20  ;;  %1901 = vmatpush.bf16.msrb.mxu2 %v5013_v21  ;;  %6090 = vst [vmem:[#allocation61_spill] sm:$0xff] %v5083_v18  ;;  %v3689_v38 = vld [vmem:[#allocation9 + $0x38] sm:$0xf]  ;;  %v4237_v41 = vld [vmem:[#allocation9 + $0x4c] sm:$0xf0] }
  0xb8   : > { %1914 = vmatpush.bf16.msrb.mxu3 %v5017_v28  ;;  %6092 = vst [vmem:[#allocation63_spill] sm:$0xff] %v5089_v31 }
  0xb9   : > { %6093 = vst [vmem:[#allocation64_spill] sm:$0xff] %v5095_v58 }
  0xba   : > { %1876 = vmatpush.bf16.msrb.mxu0 %v5023_v39  ;;  %6094 = vst [vmem:[#allocation65_spill] sm:$0xff] %v5099_v60 }
  0xbb   : > { %1889 = vmatpush.bf16.msrb.mxu1 %v5027_v43  ;;  %1902 = vmatpush.bf16.msrb.mxu2 %v5029_v44  ;;  %6095 = vst [vmem:[#allocation66_spill] sm:$0xff] %v5101_v3 }
  0xbc   : > { %1915 = vmatpush.bf16.msrb.mxu3 %v5032_v46 }
  0xbd   : > { %1877 = vmatmul.bf16.vlgmr.msrb.gmra.mxu0 %v5074_v57 }
  0xbe   : > { %1921 = vmatpush.bf16.msra.mxu0 %v5034_v50  ;;  %1890 = vmatmul.bf16.vlgmr.msrb.gmra.mxu1 %v5076_v4 }
  0xbf   : > { %1934 = vmatpush.bf16.msra.mxu1 %v5036_v51  ;;  %1947 = vmatpush.bf16.msra.mxu2 %v5038_v53 }
  0xc0   : > { %1960 = vmatpush.bf16.msra.mxu3 %v5041_v59  ;;  %1903 = vmatmul.bf16.vlgmr.msrb.gmra.mxu2 %v5074_v57  ;;  %v4009_v59 = vld [vmem:[#allocation9 + $0x2b0] sm:$0xf] }
  0xc1   : > { %1916 = vmatmul.bf16.vlgmr.msrb.gmra.mxu3 %v5076_v4 }
  0xc2   : > { %1922 = vmatpush.bf16.msra.mxu0 %v5047_v9 }
  0xc3   : > { %1935 = vmatpush.bf16.msra.mxu1 %v5051_v10  ;;  %1948 = vmatpush.bf16.msra.mxu2 %v5053_v15  ;;  %v4033_v10 = vld [vmem:[#allocation9 + $0x2e0] sm:$0xf]  ;;  %v3817_v15 = vld [vmem:[#allocation9 + $0x130] sm:$0xf] }
  0xc4   : > { %1961 = vmatpush.bf16.msra.mxu3 %v5056_v22  ;;  %v3841_v22 = vld [vmem:[#allocation9 + $0x160] sm:$0xf] }
  0xc6   : > { %1923 = vmatpush.bf16.msra.mxu0 %v5061_v34  ;;  %v4274_v34 = vld [vmem:[#allocation9 + $0x174] sm:$0xf0] }
  0xc7   : > { %1936 = vmatpush.bf16.msra.mxu1 %v5065_v40  ;;  %1949 = vmatpush.bf16.msra.mxu2 %v5067_v56  ;;  %v4291_v40 = vld [vmem:[#allocation9 + $0x1fc] sm:$0xf0]  ;;  %v4240_v56 = vld [vmem:[#allocation9 + $0x6c] sm:$0xf] }
  0xc8   : > { %1962 = vmatpush.bf16.msra.mxu3 %v5070_v55  ;;  %v5104_v55 = vor.u32 %v4294_v42, %v3931_v45  ;;  %v5111_v30 = vor.u32 %v4291_v40, %v3905_v33  ;;  %v3881_v42 = vld [vmem:[#allocation9 + $0x1b8] sm:$0xf]  ;;  %v5116_v45 = vor.u32 %v4288_v26, %v3907_v27  ;;  %v3665_v33 = vld [vmem:[#allocation9 + $0x8] sm:$0xf]  ;;  %v4231_v40 = vld [vmem:[#allocation9 + $0x1c] sm:$0xf0] }
  0xc9   : > { %v3857_v26 = vld [vmem:[#allocation9 + $0x188] sm:$0xf]  ;;  %v4279_v27 = vld [vmem:[#allocation9 + $0x19c] sm:$0xf0] }
  0xca   : > { %1924 = vmatpush.bf16.msra.mxu0 %v5079_v16  ;;  %6096 = vst [vmem:[#allocation67_spill] sm:$0xff] %v5104_v55  ;;  %v3715_v16 = vld [vmem:[#allocation9 + $0x80] sm:$0xf0] }
  0xcb   : > { %1937 = vmatpush.bf16.msra.mxu1 %v5083_v18  ;;  %1950 = vmatpush.bf16.msra.mxu2 %v5085_v19  ;;  %v5107_v18 = vor.u32 %v4243_v8, %v3713_v6  ;;  %6098 = vst [vmem:[#allocation69_spill] sm:$0xff] %v5111_v30  ;;  %v5113_v32 = vor.u32 %v4240_v56, %v3715_v16  ;;  %v4234_v19 = vld [vmem:[#allocation9 + $0x3c] sm:$0xf]  ;;  %v3883_v8 = vld [vmem:[#allocation9 + $0x1d0] sm:$0xf0] }
  0xcc   : > { %1963 = vmatpush.bf16.msra.mxu3 %v5089_v31  ;;  %6100 = vst [vmem:[#allocation71_spill] sm:$0xff] %v5116_v45  ;;  %v4285_v31 = vld [vmem:[#allocation9 + $0x1cc] sm:$0xf0]  ;;  %v4282_v6 = vld [vmem:[#allocation9 + $0x1bc] sm:$0xf] }
  0xcd   : > { %6097 = vst [vmem:[#allocation68_spill] sm:$0xff] %v5107_v18  ;;  %v5123_v56 = vor.u32 %v4285_v31, %v3881_v42  ;;  %v4322_v31 = vld [vmem:[#allocation9 + $0x2f4] sm:$0xf0]  ;;  %v5135_v42 = vor.u32 %v4279_v27, %v3857_v26  ;;  %v3819_v27 = vld [vmem:[#allocation9 + $0x148] sm:$0xf0] }
  0xce   : > { %1925 = vmatpush.bf16.msra.mxu0 %v5095_v58  ;;  %6099 = vst [vmem:[#allocation70_spill] sm:$0xff] %v5113_v32  ;;  %v3691_v58 = vld [vmem:[#allocation9 + $0x50] sm:$0xf0] }
  0xcf   : > { %1938 = vmatpush.bf16.msra.mxu1 %v5099_v60  ;;  %1951 = vmatpush.bf16.msra.mxu2 %v5101_v3  ;;  %v5119_v60 = vor.u32 %v4237_v41, %v3689_v38  ;;  %6102 = vst [vmem:[#allocation73_spill] sm:$0xff] %v5123_v56  ;;  %v5125_v16 = vor.u32 %v4234_v19, %v3691_v58  ;;  %v4276_v38 = vld [vmem:[#allocation9 + $0x18c] sm:$0xf]  ;;  %v3859_v41 = vld [vmem:[#allocation9 + $0x1a0] sm:$0xf0] }
  0xd0   : > { %1964 = vmatpush.bf16.msra.mxu3 %v5104_v55  ;;  %v4228_v55 = vld [vmem:[#allocation9 + $0xc] sm:$0xf]  ;;  %v5128_v3 = vor.u32 %v4282_v6, %v3883_v8  ;;  %v4271_v19 = vld [vmem:[#allocation9 + $0x164] sm:$0xf]  ;;  %v3843_v58 = vld [vmem:[#allocation9 + $0x178] sm:$0xf0] }
  0xd1   : > { %6101 = vst [vmem:[#allocation72_spill] sm:$0xff] %v5119_v60  ;;  %v4319_v8 = vld [vmem:[#allocation9 + $0x2e4] sm:$0xf] }
  0xd2   : > { %1926 = vmatpush.bf16.msra.mxu0 %v5107_v18  ;;  %6103 = vst [vmem:[#allocation74_spill] sm:$0xff] %v5125_v16  ;;  %v3667_v18 = vld [vmem:[#allocation9 + $0x20] sm:$0xf0] }
  0xd3   : > { %1939 = vmatpush.bf16.msra.mxu1 %v5111_v30  ;;  %1952 = vmatpush.bf16.msra.mxu2 %v5113_v32  ;;  %6104 = vst [vmem:[#allocation75_spill] sm:$0xff] %v5128_v3  ;;  %v5131_v30 = vor.u32 %v4231_v40, %v3665_v33  ;;  %v5137_v6 = vor.u32 %v4228_v55, %v3667_v18  ;;  %v4316_v55 = vld [vmem:[#allocation9 + $0x2c4] sm:$0xf0]  ;;  %v4265_v18 = vld [vmem:[#allocation9 + $0x134] sm:$0xf] }
  0xd4   : > { %1965 = vmatpush.bf16.msra.mxu3 %v5116_v45  ;;  %6106 = vst [vmem:[#allocation77_spill] sm:$0xff] %v5135_v42  ;;  %v4035_v45 = vld [vmem:[#allocation9 + $0x2f8] sm:$0xf0]  ;;  %v5140_v32 = vor.u32 %v4276_v38, %v3859_v41  ;;  %v5144_v33 = vor.u32 %v4322_v31, %v4033_v10  ;;  %v5146_v40 = vor.u32 %v4271_v19, %v3843_v58  ;;  %v5156_v10 = vld [vmem:[%s5867_s4] sm:$0x3f] }
  0xd5   : > { %6105 = vst [vmem:[#allocation76_spill] sm:$0xff] %v5131_v30  ;;  %v5149_v26 = vor.u32 %v4319_v8, %v4035_v45  ;;  %v3793_v38 = vld [vmem:[#allocation9 + $0x100] sm:$0xf]  ;;  %v5164_v41 = vor.u32 %v4316_v55, %v4009_v59  ;;  %v5166_v31 = vor.u32 %v4265_v18, %v3819_v27  ;;  %v4262_v19 = vld [vmem:[#allocation9 + $0x114] sm:$0xf0] }
  0xd6   : > { %1927 = vmatpush.bf16.msra.mxu0 %v5119_v60  ;;  %6107 = vst [vmem:[#allocation78_spill] sm:$0xff] %v5137_v6  ;;  %v5142_v60 = vor.u32 %v4274_v34, %v3841_v22  ;;  %v4313_v22 = vld [vmem:[#allocation9 + $0x2b4] sm:$0xf]  ;;  %v4011_v34 = vld [vmem:[#allocation9 + $0x2c8] sm:$0xf0]  ;;  %v5179_v18 = vor.u32 %v4262_v19, %v3793_v38 }
  0xd7   : > { %1940 = vmatpush.bf16.msra.mxu1 %v5123_v56  ;;  %1953 = vmatpush.bf16.msra.mxu2 %v5125_v16  ;;  %6108 = vst [vmem:[#allocation79_spill] sm:$0xff] %v5140_v32  ;;  %v4268_v56 = vld [vmem:[#allocation9 + $0x144] sm:$0xf0]  ;;  %v3985_v58 = vld [vmem:[#allocation9 + $0x280] sm:$0xf] }
  0xd8   : > { %1966 = vmatpush.bf16.msra.mxu3 %v5128_v3  ;;  %6109 = vst [vmem:[#allocation80_spill] sm:$0xff] %v5142_v60  ;;  %v5160_v45 = vor.u32 %v4268_v56, %v3817_v15  ;;  %v4310_v8 = vld [vmem:[#allocation9 + $0x294] sm:$0xf0]  ;;  %v4259_v15 = vld [vmem:[#allocation9 + $0x104] sm:$0xf] }
  0xd9   : > { %6110 = vst [vmem:[#allocation81_spill] sm:$0xff] %v5144_v33  ;;  %v3795_v56 = vld [vmem:[#allocation9 + $0x118] sm:$0xf0]  ;;  %v4307_v59 = vld [vmem:[#allocation9 + $0x284] sm:$0xf]  ;;  %v5183_v27 = vor.u32 %v4310_v8, %v3985_v58 }
  0xda   : > { %6111 = vst [vmem:[#allocation82_spill] sm:$0xff] %v5146_v40  ;;  %1928 = vmatpush.bf16.msra.mxu0 %v5131_v30  ;;  %v3987_v55 = vld [vmem:[#allocation9 + $0x298] sm:$0xf0]  ;;  %v4304_v19 = vld [vmem:[#allocation9 + $0x264] sm:$0xf0] }
  0xdb   : > { %6112 = vst [vmem:[#allocation83_spill] sm:$0xff] %v5149_v26  ;;  %1941 = vmatpush.bf16.msra.mxu1 %v5135_v42  ;;  %1954 = vmatpush.bf16.msra.mxu2 %v5137_v6  ;;  %v5188_v42 = vor.u32 %v4307_v59, %v3987_v55  ;;  %v1052_v38 = vpop.f32.mrf.mxu1  ;;  %v4253_v6 = vld [vmem:[#allocation9 + $0xd4] sm:$0xf]  ;;  %v4250_v55 = vld [vmem:[#allocation9 + $0xb4] sm:$0xf0] }
  0xdc   : > { %1967 = vmatpush.bf16.msra.mxu3 %v5140_v32  ;;  %6113 = vst [vmem:[#allocation84_spill] sm:$0xff] %v5160_v45  ;;  %v5170_v32 = vor.u32 %v4313_v22, %v4011_v34  ;;  %v5185_v22 = vor.u32 %v4259_v15, %v3795_v56  ;;  %v1033_v34 = vpop.f32.mrf.mxu0  ;;  %v4301_v3 = vld [vmem:[#allocation9 + $0x254] sm:$0xf]  ;;  %v3745_v15 = vld [vmem:[#allocation9 + $0xa0] sm:$0xf] }
  0xdd   : > { %6114 = vst [vmem:[#allocation85_spill] sm:$0xff] %v5164_v41  ;;  %1929 = vmatmul.bf16.vlgmr.msra.gmra.mxu0 %v5074_v57  ;;  %v3913_v30 = vld [vmem:[#allocation9 + $0x1f0] sm:$0xf] }
  0xde   : > { %1973 = vmatpush.bf16.msrb.mxu0 %v5142_v60  ;;  %6115 = vst [vmem:[#allocation86_spill] sm:$0xff] %v5166_v31  ;;  %v5173_v60 = vperm.slane %v5156_v10, 0  ;;  %1942 = vmatmul.bf16.vlgmr.msra.gmra.mxu1 %v5076_v4 }
  0xdf   : > { %1986 = vmatpush.bf16.msrb.mxu1 %v5144_v33  ;;  %1999 = vmatpush.bf16.msrb.mxu2 %v5146_v40  ;;  %6116 = vst [vmem:[#allocation87_spill] sm:$0xff] %v5170_v32  ;;  %v4256_v33 = vld [vmem:[#allocation9 + $0xe4] sm:$0xf0]  ;;  %v3961_v40 = vld [vmem:[#allocation9 + $0x250] sm:$0xf] }
  0xe0   : > { %2012 = vmatpush.bf16.msrb.mxu3 %v5149_v26  ;;  %6117 = vst [vmem:[#allocation88_spill] sm:$0xff] %v5173_v60  ;;  %1955 = vmatmul.bf16.vlgmr.msra.gmra.mxu2 %v5074_v57  ;;  %v3769_v26 = vld [vmem:[#allocation9 + $0xd0] sm:$0xf]  ;;  %v5198_v56 = vor.u32 %v4304_v19, %v3961_v40  ;;  %v5209_v40 = vor.u32 %v4250_v55, %v3745_v15 }
  0xe1   : > { %1968 = vmatmul.bf16.vlgmr.msra.gmra.mxu3 %v5076_v4  ;;  %6118 = vst [vmem:[#allocation89_spill] sm:$0xff] %v5179_v18  ;;  %v5194_v8 = vor.u32 %v4256_v33, %v3769_v26  ;;  %v4298_v33 = vld [vmem:[#allocation9 + $0x234] sm:$0xf0]  ;;  %v4247_v26 = vld [vmem:[#allocation9 + $0xa4] sm:$0xf] }
  0xe2   : > { %1974 = vmatpush.bf16.msrb.mxu0 %v5160_v45  ;;  %6119 = vst [vmem:[#allocation90_spill] sm:$0xff] %v5183_v27  ;;  %v1034_v45 = vadd.f32 %v1033_v34, %v5173_v60  ;;  %v3937_v34 = vld [vmem:[#allocation9 + $0x220] sm:$0xf] }
  0xe3   : > { %1987 = vmatpush.bf16.msrb.mxu1 %v5164_v41  ;;  %2000 = vmatpush.bf16.msrb.mxu2 %v5166_v31  ;;  %6120 = vst [vmem:[#allocation91_spill] sm:$0xff] %v5185_v22  ;;  %v3771_v41 = vld [vmem:[#allocation9 + $0xe8] sm:$0xf0]  ;;  %v5223_v55 = vpop.f32.mrf.mxu1 }
  0xe4   : > { %2013 = vmatpush.bf16.msrb.mxu3 %v5170_v32  ;;  %6121 = vst [vmem:[#allocation92_spill] sm:$0xff] %v5188_v42  ;;  %v3963_v31 = vld [vmem:[#allocation9 + $0x268] sm:$0xf0]  ;;  %v5192_v58 = vadd.f32 %v1052_v38, %v1034_v45  ;;  %v5200_v59 = vor.u32 %v4253_v6, %v3771_v41  ;;  %v5203_v32 = vperm.slane %v5156_v10, 1  ;;  %v3747_v38 = vld [vmem:[#allocation9 + $0xb8] sm:$0xf0]  ;;  %v1071_v6 = vpop.f32.mrf.mxu2  ;;  %v5213_v41 = vor.u32 %v4298_v33, %v3937_v34 }
  0xe5   : > { %6123 = vst [vmem:[#allocation94_spill] sm:$0xff] %v5194_v8  ;;  %v5206_v45 = vor.u32 %v4301_v3, %v3963_v31  ;;  %v5215_v19 = vor.u32 %v4247_v26, %v3747_v38  ;;  %v1090_v31 = vpop.f32.mrf.mxu3  ;;  %v3723_v34 = vld [vmem:[#allocation9 + $0x88] sm:$0xf0]  ;;  %v4289_v26 = vld [vmem:[#allocation9 + $0x1f4] sm:$0xf] }
  0xe6   : > { %1975 = vmatpush.bf16.msrb.mxu0 %v5179_v18  ;;  %6122 = vst [vmem:[#allocation93_spill] sm:$0xff] %v5192_v58  ;;  %v4295_v18 = vld [vmem:[#allocation9 + $0x224] sm:$0xf]  ;;  %v1072_v3 = vadd.f32 %v1071_v6, %v5203_v32  ;;  %v4244_v58 = vld [vmem:[#allocation9 + $0x84] sm:$0xf0] }
  0xe7   : > { %1988 = vmatpush.bf16.msrb.mxu1 %v5183_v27  ;;  %2001 = vmatpush.bf16.msrb.mxu2 %v5185_v22  ;;  %6124 = vst [vmem:[#allocation95_spill] sm:$0xff] %v5198_v56  ;;  %v3939_v27 = vld [vmem:[#allocation9 + $0x238] sm:$0xf0]  ;;  %v3721_v22 = vld [vmem:[#allocation9 + $0x70] sm:$0xf] }
  0xe8   : > { %6125 = vst [vmem:[#allocation96_spill] sm:$0xff] %v5200_v59  ;;  %2014 = vmatpush.bf16.msrb.mxu3 %v5188_v42  ;;  %v5218_v42 = vpop.f32.mrf.mxu0  ;;  %v5221_v15 = vor.u32 %v4295_v18, %v3939_v27  ;;  %v5225_v33 = vadd.f32 %v1090_v31, %v1072_v3  ;;  %v3915_v38 = vld [vmem:[#allocation9 + $0x208] sm:$0xf0]  ;;  %v5228_v6 = vor.u32 %v4244_v58, %v3721_v22  ;;  %v3697_v27 = vld [vmem:[#allocation9 + $0x40] sm:$0xf] }
  0xe9   : > { %6126 = vst [vmem:[#allocation97_spill] sm:$0xff] %v5203_v32  ;;  %v5237_v3 = vor.u32 %v4289_v26, %v3915_v38  ;;  %v4286_v31 = vld [vmem:[#allocation9 + $0x1d4] sm:$0xf0]  ;;  %v4283_v22 = vld [vmem:[#allocation9 + $0x1c4] sm:$0xf] }
  0xea   : > { %6127 = vst [vmem:[#allocation98_spill] sm:$0xff] %v5206_v45  ;;  %1976 = vmatpush.bf16.msrb.mxu0 %v5194_v8  ;;  %v4235_v8 = vld [vmem:[#allocation9 + $0x44] sm:$0xf]  ;;  %v3891_v58 = vld [vmem:[#allocation9 + $0x1d8] sm:$0xf0] }
  0xeb   : > { %6128 = vst [vmem:[#allocation99_spill] sm:$0xff] %v5209_v40  ;;  %1989 = vmatpush.bf16.msrb.mxu1 %v5198_v56  ;;  %2002 = vmatpush.bf16.msrb.mxu2 %v5200_v59  ;;  %v4292_v56 = vld [vmem:[#allocation9 + $0x204] sm:$0xf0]  ;;  %v4241_v59 = vld [vmem:[#allocation9 + $0x74] sm:$0xf] }
  0xec   : > { %6129 = vst [vmem:[#allocation100_spill] sm:$0xff] %v5213_v41  ;;  %2015 = vmatpush.bf16.msrb.mxu3 %v5206_v45  ;;  %v5234_v18 = vor.u32 %v4241_v59, %v3723_v34  ;;  %v3889_v45 = vld [vmem:[#allocation9 + $0x1c0] sm:$0xf]  ;;  %v3673_v38 = vld [vmem:[#allocation9 + $0x10] sm:$0xf] }
  0xed   : > { %6130 = vst [vmem:[#allocation101_spill] sm:$0xff] %v5215_v19  ;;  %v5250_v34 = vpop.f32.mrf.mxu3 }
  0xee   : > { %6131 = vst [vmem:[#allocation102_spill] sm:$0xff] %v5218_v42  ;;  %1977 = vmatpush.bf16.msrb.mxu0 %v5209_v40  ;;  %v5232_v42 = vor.u32 %v4292_v56, %v3913_v30  ;;  %v3699_v40 = vld [vmem:[#allocation9 + $0x58] sm:$0xf0]  ;;  %v5242_v30 = vpop.f32.mrf.mxu2  ;;  %v5246_v56 = vor.u32 %v4286_v31, %v3889_v45  ;;  %v4277_v45 = vld [vmem:[#allocation9 + $0x194] sm:$0xf] }
  0xef   : > { %6132 = vst [vmem:[#allocation103_spill] sm:$0xff] %v5221_v15  ;;  %1990 = vmatpush.bf16.msrb.mxu1 %v5213_v41  ;;  %2003 = vmatpush.bf16.msrb.mxu2 %v5215_v19  ;;  %v5248_v59 = vor.u32 %v4235_v8, %v3699_v40  ;;  %v3865_v19 = vld [vmem:[#allocation9 + $0x190] sm:$0xf]  ;;  %v3867_v31 = vld [vmem:[#allocation9 + $0x1a8] sm:$0xf0] }
  0xf0   : > { %6133 = vst [vmem:[#allocation104_spill] sm:$0xff] %v5223_v55  ;;  %v4238_v55 = vld [vmem:[#allocation9 + $0x54] sm:$0xf0]  ;;  %2016 = vmatpush.bf16.msrb.mxu3 %v5221_v15  ;;  %v1038_v26 = vpop.f32.mrf.mxu0  ;;  %v4232_v15 = vld [vmem:[#allocation9 + $0x24] sm:$0xf0] }
  0xf1   : > { %6134 = vst [vmem:[#allocation105_spill] sm:$0xff] %v5228_v6  ;;  %v5240_v41 = vor.u32 %v4238_v55, %v3697_v27  ;;  %v5253_v55 = vor.u32 %v4283_v22, %v3891_v58  ;;  %v1039_v27 = vadd.f32 %v1038_v26, %v5173_v60  ;;  %v5259_v40 = vor.u32 %v4232_v15, %v3673_v38 }
  0xf2   : > { %6135 = vst [vmem:[#allocation106_spill] sm:$0xff] %v5232_v42  ;;  %1978 = vmatpush.bf16.msrb.mxu0 %v5228_v6  ;;  %v4229_v6 = vld [vmem:[#allocation9 + $0x14] sm:$0xf]  ;;  %v5268_v26 = vor.u32 %v4277_v45, %v3867_v31 }
  0xf3   : > { %6136 = vst [vmem:[#allocation107_spill] sm:$0xff] %v5234_v18  ;;  %1991 = vmatpush.bf16.msrb.mxu1 %v5232_v42  ;;  %2004 = vmatpush.bf16.msrb.mxu2 %v5234_v18  ;;  %v4280_v42 = vld [vmem:[#allocation9 + $0x1a4] sm:$0xf0]  ;;  %v3675_v18 = vld [vmem:[#allocation9 + $0x28] sm:$0xf0] }
  0xf4   : > { %6137 = vst [vmem:[#allocation108_spill] sm:$0xff] %v5242_v30  ;;  %2017 = vmatpush.bf16.msrb.mxu3 %v5237_v3  ;;  %v1057_v30 = vpop.f32.mrf.mxu1  ;;  %v5263_v22 = vor.u32 %v4280_v42, %v3865_v19  ;;  %v5265_v58 = vor.u32 %v4229_v6, %v3675_v18 }
  0xf5   : > { %6138 = vst [vmem:[#allocation109_spill] sm:$0xff] %v5250_v34  ;;  %v5257_v8 = vadd.f32 %v1057_v30, %v1039_v27  ;;  %v4746_v34 = vmov 0   ;;  %v1373_v30 = vld [vmem:[%s5864_s1] sm:$0xff]  ;;  %v1095_v19 = vpop.f32.mrf.mxu3  ;;  %v5297_v27 = vperm.slane %v5156_v10, 2 }
  0xf6   : > { %1979 = vmatpush.bf16.msrb.mxu0 %v5240_v41  ;;  %6140 = vst [vmem:[#allocation111_spill] sm:$0xff] %v5263_v22  ;;  %4440 = vset.pattern.permute.xlu0 %v4746_v34  ;;  %v1076_v15 = vpop.f32.mrf.mxu2 }
  0xf7   : > { %6139 = vst [vmem:[#allocation110_spill] sm:$0xff] %v5257_v8  ;;  %1992 = vmatpush.bf16.msrb.mxu1 %v5246_v56  ;;  %2005 = vmatpush.bf16.msrb.mxu2 %v5248_v59  ;;  %v1077_v42 = vadd.f32 %v1076_v15, %v5203_v32  ;;  %v5312_v15 = vperm.slane %v5156_v10, 3  ;;  %v6165_v32 = vld [vmem:[#allocation57_spill] sm:$0xff] }
  0xf8   : > { %2018 = vmatpush.bf16.msrb.mxu3 %v5253_v55  ;;  %6141 = vst [vmem:[#allocation112_spill] sm:$0xff] %v5268_v26  ;;  %2133 = vperm.xlu0 %4440, %v1373_v30   ;;  %v5277_v6 = vpop.f32.mrf.mxu0 }
  0xf9   : > { %6142 = vst [vmem:[#allocation113_spill] sm:$0xff] %v5277_v6  ;;  %v5284_v34 = vadd.f32 %v1095_v19, %v1077_v42 }
  0xfa   : > { %1980 = vmatpush.bf16.msrb.mxu0 %v5259_v40  ;;  %6146 = vst [vmem:[#allocation117_spill] sm:$0xff] %v5297_v27 }
  0xfb   : > { %1993 = vmatpush.bf16.msrb.mxu1 %v5263_v22  ;;  %2006 = vmatpush.bf16.msrb.mxu2 %v5265_v58  ;;  %6144 = vst [vmem:[#allocation115_spill] sm:$0xff] %v5284_v34 }
  0xfc   : > { %2019 = vmatpush.bf16.msrb.mxu3 %v5268_v26  ;;  %v5280_v18 = vpop.f32.mrf.mxu1  ;;  %6148 = vst [vmem:[#allocation119_spill] sm:$0xff] %v5312_v15 }
  0xfd   : > { %6143 = vst [vmem:[#allocation114_spill] sm:$0xff] %v5280_v18  ;;  %1981 = vmatmul.bf16.vlgmr.msrb.gmra.mxu0 %v5074_v57  ;;  %v5299_v45 = vpop.f32.mrf.mxu3 }
  0xfe   : > { %2148 = vmatpush.bf16.msra.mxu0 %v4934_v63  ;;  %1994 = vmatmul.bf16.vlgmr.msrb.gmra.mxu1 %v5076_v4  ;;  %v5294_v38 = vpop.f32.mrf.mxu2  ;;  %6147 = vst [vmem:[#allocation118_spill] sm:$0xff] %v5299_v45 }
  0xff   : > { %2174 = vmatpush.bf16.msra.mxu2 %v4938_v1  ;;  %2020 = vmatmul.bf16.vlgmr.msrb.gmra.mxu3 %v5076_v4  ;;  %6145 = vst [vmem:[#allocation116_spill] sm:$0xff] %v5294_v38 }
 0x100   : > { %2007 = vmatmul.bf16.vlgmr.msrb.gmra.mxu2 %v5074_v57  ;;  %2161 = vmatpush.bf16.msra.mxu1 %v4936_v0  ;;  %v1109_v57 = vpop.f32.mrf.mxu0 }
 0x101   : > { %2187 = vmatpush.bf16.msra.mxu3 %v4940_v5  ;;  %v1110_v4 = vadd.f32 %v1109_v57, %v5297_v27 }
 0x102   : > { %2149 = vmatpush.bf16.msra.mxu0 %v4943_v11 }
 0x103   : > { %2175 = vmatpush.bf16.msra.mxu2 %v4949_v13 }
 0x104   : > { %2162 = vmatpush.bf16.msra.mxu1 %v4947_v12  ;;  %v1128_v31 = vpop.f32.mrf.mxu1 }
 0x105   : > { %2188 = vmatpush.bf16.msra.mxu3 %v4952_v14  ;;  %v5307_v30 = vadd.f32 %v1128_v31, %v1110_v4  ;;  %v1166_v57 = vpop.f32.mrf.mxu3 }
 0x106   : > { %2150 = vmatpush.bf16.msra.mxu0 %v4958_v23  ;;  %v1147_v42 = vpop.f32.mrf.mxu2 }
 0x107   : > { %2176 = vmatpush.bf16.msra.mxu2 %v4962_v25  ;;  %v1148_v19 = vadd.f32 %v1147_v42, %v5312_v15 }
 0x108   : > { %2163 = vmatpush.bf16.msra.mxu1 %v4960_v24  ;;  %v5319_v4 = vpop.f32.mrf.mxu0 }
 0x109   : > { %2189 = vmatpush.bf16.msra.mxu3 %v4965_v29  ;;  %6149 = vst [vmem:[#allocation120_spill] sm:$0xff] %v5319_v4  ;;  %v5324_v45 = vadd.f32 %v1166_v57, %v1148_v19  ;;  %v6160_v4 = vld [vmem:[#allocation56_spill] sm:$0xff] }
 0x10a   : > { %2151 = vmatpush.bf16.msra.mxu0 %v4971_v35 }
 0x10b   : > { %2177 = vmatpush.bf16.msra.mxu2 %v4977_v37 }
 0x10c   : > { %2164 = vmatpush.bf16.msra.mxu1 %v4975_v36  ;;  %v5322_v31 = vpop.f32.mrf.mxu1 }
 0x10d   : > { %2190 = vmatpush.bf16.msra.mxu3 %v4980_v52  ;;  %6150 = vst [vmem:[#allocation121_spill] sm:$0xff] %v5322_v31  ;;  %v5335_v38 = vpop.f32.mrf.mxu3  ;;  %v6159_v31 = vld [vmem:[#allocation52_spill] sm:$0xff] }
 0x10e   : > { %2152 = vmatpush.bf16.msra.mxu0 %v4983_v47  ;;  %v5331_v42 = vpop.f32.mrf.mxu2  ;;  %6152 = vst [vmem:[#allocation123_spill] sm:$0xff] %v5335_v38  ;;  %v6157_v38 = vld [vmem:[#allocation53_spill] sm:$0xff] }
 0x10f   : > { %2178 = vmatpush.bf16.msra.mxu2 %v4989_v49  ;;  %6151 = vst [vmem:[#allocation122_spill] sm:$0xff] %v5331_v42 }
 0x110   : > { %2165 = vmatpush.bf16.msra.mxu1 %v4987_v48  ;;  %v1114_v19 = vpop.f32.mrf.mxu0 }
 0x111   : > { %2191 = vmatpush.bf16.msra.mxu3 %v4992_v54  ;;  %v1115_v57 = vadd.f32 %v1114_v19, %v5297_v27  ;;  %v6161_v27 = vld [vmem:[#allocation54_spill] sm:$0xff] }
 0x112   : > { %2153 = vmatpush.bf16.msra.mxu0 %v4995_v61 }
 0x113   : > { %2179 = vmatpush.bf16.msra.mxu2 %v5001_v2 }
 0x114   : > { %2166 = vmatpush.bf16.msra.mxu1 %v4999_v62  ;;  %v1133_v18 = vpop.f32.mrf.mxu1 }
 0x115   : > { %2192 = vmatpush.bf16.msra.mxu3 %v5004_v7  ;;  %v5340_v6 = vadd.f32 %v1133_v18, %v1115_v57  ;;  %v1171_v19 = vpop.f32.mrf.mxu3 }
 0x116   : > { %2154 = vmatpush.bf16.msra.mxu0 %v5007_v17  ;;  %v1152_v34 = vpop.f32.mrf.mxu2 }
 0x117   : > { %2180 = vmatpush.bf16.msra.mxu2 %v5013_v21  ;;  %6153 = vst [vmem:[#allocation124_spill] sm:$0xff] %v5340_v6  ;;  %v1153_v18 = vadd.f32 %v1152_v34, %v5312_v15  ;;  %v6155_v6 = vld [vmem:[#allocation50_spill] sm:$0xff]  ;;  %v5364_v34 = vperm.slane %v5156_v10, 4 }
 0x118   : > { %2167 = vmatpush.bf16.msra.mxu1 %v5011_v20  ;;  %v5351_v57 = vpop.f32.mrf.mxu0 }
 0x119   : > { %2193 = vmatpush.bf16.msra.mxu3 %v5017_v28  ;;  %6154 = vst [vmem:[#allocation125_spill] sm:$0xff] %v5351_v57  ;;  %v5358_v42 = vadd.f32 %v1171_v19, %v1153_v18  ;;  %v6163_v57 = vld [vmem:[#allocation58_spill] sm:$0xff]  ;;  %v6167_v18 = vld [vmem:[#allocation60_spill] sm:$0xff]  ;;  %v6168_v19 = vld [vmem:[#allocation59_spill] sm:$0xff] }
 0x11a   : > { %2155 = vmatpush.bf16.msra.mxu0 %v5023_v39  ;;  %6162 = vst [vmem:[#allocation128_spill] sm:$0xff] %v5364_v34 }
 0x11b   : > { %2181 = vmatpush.bf16.msra.mxu2 %v5029_v44  ;;  %6158 = vst [vmem:[#allocation127_spill] sm:$0xff] %v5358_v42 }
 0x11c   : > { %2168 = vmatpush.bf16.msra.mxu1 %v5027_v43  ;;  %v5355_v8 = vpop.f32.mrf.mxu1 }
 0x11d   : > { %2194 = vmatpush.bf16.msra.mxu3 %v5032_v46  ;;  %6156 = vst [vmem:[#allocation126_spill] sm:$0xff] %v5355_v8  ;;  %v5370_v8 = vpop.f32.mrf.mxu3 }
 0x11e   : > { %2200 = vmatpush.bf16.msrb.mxu0 %v5034_v50  ;;  %v5367_v15 = vpop.f32.mrf.mxu2  ;;  %6166 = vst [vmem:[#allocation130_spill] sm:$0xff] %v5370_v8  ;;  %v6173_v8 = vld [vmem:[#allocation63_spill] sm:$0xff] }
 0x11f   : > { %2226 = vmatpush.bf16.msrb.mxu2 %v5038_v53  ;;  %6164 = vst [vmem:[#allocation129_spill] sm:$0xff] %v5367_v15  ;;  %v5380_v15 = vperm.slane %v5156_v10, 5 }
 0x120   : > { %2213 = vmatpush.bf16.msrb.mxu1 %v5036_v51  ;;  %v1185_v60 = vpop.f32.mrf.mxu0 }
 0x121   : > { %2239 = vmatpush.bf16.msrb.mxu3 %v6155_v6  ;;  %v1186_v42 = vadd.f32 %v1185_v60, %v5364_v34  ;;  %v6170_v6 = vld [vmem:[#allocation61_spill] sm:$0xff]  ;;  %6171 = vst [vmem:[#allocation131_spill] sm:$0xff] %v5380_v15 }
 0x122   : > { %2201 = vmatpush.bf16.msrb.mxu0 %v5047_v9 }
 0x123   : > { %2227 = vmatpush.bf16.msrb.mxu2 %v6157_v38 }
 0x124   : > { %2214 = vmatpush.bf16.msrb.mxu1 %v6159_v31  ;;  %v1204_v31 = vpop.f32.mrf.mxu1 }
 0x125   : > { %2240 = vmatpush.bf16.msrb.mxu3 %v6161_v27  ;;  %v6169_v27 = vld [vmem:[#allocation62_spill] sm:$0xff]  ;;  %v1242_v51 = vpop.f32.mrf.mxu3 }
 0x126   : > { %2202 = vmatpush.bf16.msrb.mxu0 %v6160_v4  ;;  %v5376_v4 = vadd.f32 %v1204_v31, %v1186_v42  ;;  %v6177_v31 = vld [vmem:[#allocation68_spill] sm:$0xff]  ;;  %v6178_v42 = vld [vmem:[#allocation67_spill] sm:$0xff] }
 0x127   : > { %2228 = vmatpush.bf16.msrb.mxu2 %v6163_v57  ;;  %v6174_v57 = vld [vmem:[#allocation66_spill] sm:$0xff] }
 0x128   : > { %2215 = vmatpush.bf16.msrb.mxu1 %v6165_v32  ;;  %v6172_v32 = vld [vmem:[#allocation64_spill] sm:$0xff] }
 0x129   : > { %2241 = vmatpush.bf16.msrb.mxu3 %v6168_v19  ;;  %v6175_v19 = vld [vmem:[#allocation65_spill] sm:$0xff] }
 0x12a   : > { %2203 = vmatpush.bf16.msrb.mxu0 %v6167_v18  ;;  %v1223_v18 = vpop.f32.mrf.mxu2 }
 0x12b   : > { %2229 = vmatpush.bf16.msrb.mxu2 %v6169_v27  ;;  %v1224_v60 = vadd.f32 %v1223_v18, %v5380_v15  ;;  %v5387_v27 = vpop.f32.mrf.mxu0 }
 0x12c   : > { %2216 = vmatpush.bf16.msrb.mxu1 %v6170_v6  ;;  %6176 = vst [vmem:[#allocation132_spill] sm:$0xff] %v5387_v27  ;;  %v5391_v10 = vpop.f32.mrf.mxu1  ;;  %v6180_v6 = vld [vmem:[#allocation70_spill] sm:$0xff]  ;;  %v6185_v27 = vld [vmem:[#allocation73_spill] sm:$0xff] }
 0x12d   : > { %2242 = vmatpush.bf16.msrb.mxu3 %v6173_v8  ;;  %6179 = vst [vmem:[#allocation133_spill] sm:$0xff] %v5391_v10  ;;  %v6181_v8 = vld [vmem:[#allocation69_spill] sm:$0xff]  ;;  %v6187_v10 = vld [vmem:[#allocation76_spill] sm:$0xff] }
 0x12e   : > { %2204 = vmatpush.bf16.msrb.mxu0 %v6172_v32  ;;  %v5394_v32 = vadd.f32 %v1242_v51, %v1224_v60 }
 0x12f   : > { %2230 = vmatpush.bf16.msrb.mxu2 %v6174_v57  ;;  %v6182_v57 = vld [vmem:[#allocation72_spill] sm:$0xff] }
 0x130   : > { %2217 = vmatpush.bf16.msrb.mxu1 %v6175_v19  ;;  %v6183_v19 = vld [vmem:[#allocation71_spill] sm:$0xff] }
 0x131   : > { %2243 = vmatpush.bf16.msrb.mxu3 %v6178_v42 }
 0x132   : > { %2205 = vmatpush.bf16.msrb.mxu0 %v6177_v31  ;;  %v5400_v18 = vpop.f32.mrf.mxu2  ;;  %v5403_v31 = vpop.f32.mrf.mxu3 }
 0x133   : > { %2231 = vmatpush.bf16.msrb.mxu2 %v6180_v6  ;;  %6184 = vst [vmem:[#allocation134_spill] sm:$0xff] %v5400_v18  ;;  %v1190_v42 = vpop.f32.mrf.mxu0  ;;  %v6188_v6 = vld [vmem:[#allocation75_spill] sm:$0xff] }
 0x134   : > { %2218 = vmatpush.bf16.msrb.mxu1 %v6181_v8  ;;  %6186 = vst [vmem:[#allocation135_spill] sm:$0xff] %v5403_v31  ;;  %v1191_v51 = vadd.f32 %v1190_v42, %v5364_v34  ;;  %v1209_v60 = vpop.f32.mrf.mxu1  ;;  %v6189_v8 = vld [vmem:[#allocation78_spill] sm:$0xff] }
 0x135   : > { %2244 = vmatpush.bf16.msrb.mxu3 %v6183_v19  ;;  %v6191_v19 = vld [vmem:[#allocation77_spill] sm:$0xff] }
 0x136   : > { %2206 = vmatpush.bf16.msrb.mxu0 %v6182_v57  ;;  %v5409_v57 = vadd.f32 %v1209_v60, %v1191_v51 }
 0x137   : > { %2232 = vmatpush.bf16.msrb.mxu2 %v5125_v16  ;;  %v6192_v16 = vld [vmem:[#allocation79_spill] sm:$0xff] }
 0x138   : > { %2219 = vmatpush.bf16.msrb.mxu1 %v6185_v27  ;;  %6190 = vst [vmem:[#allocation136_spill] sm:$0xff] %v5409_v57 }
 0x139   : > { %2245 = vmatpush.bf16.msrb.mxu3 %v6188_v6 }
 0x13a   : > { %2207 = vmatpush.bf16.msrb.mxu0 %v6187_v10  ;;  %v1228_v18 = vpop.f32.mrf.mxu2  ;;  %v1247_v31 = vpop.f32.mrf.mxu3 }
 0x13b   : > { %2233 = vmatpush.bf16.msrb.mxu2 %v6189_v8  ;;  %v1229_v27 = vadd.f32 %v1228_v18, %v5380_v15  ;;  %v5414_v46 = vpop.f32.mrf.mxu0 }
 0x13c   : > { %2220 = vmatpush.bf16.msrb.mxu1 %v6191_v19  ;;  %6193 = vst [vmem:[#allocation137_spill] sm:$0xff] %v5414_v46  ;;  %v5416_v10 = vpop.f32.mrf.mxu1  ;;  %v6198_v19 = vld [vmem:[#allocation93_spill] sm:$0xff] }
 0x13d   : > { %2246 = vmatpush.bf16.msrb.mxu3 %v6192_v16  ;;  %6194 = vst [vmem:[#allocation138_spill] sm:$0xff] %v5416_v10  ;;  %v5418_v6 = vadd.f32 %v1247_v31, %v1229_v27 }
 0x13f   : > { %6195 = vst [vmem:[#allocation139_spill] sm:$0xff] %v5418_v6 }
 0x142   : > { %v5420_v42 = vpop.f32.mrf.mxu2  ;;  %v5422_v34 = vpop.f32.mrf.mxu3 }
 0x143   : > { %6196 = vst [vmem:[#allocation140_spill] sm:$0xff] %v5420_v42  ;;  %v1878_v51 = vpop.f32.mrf.mxu0 }
 0x144   : > { %6197 = vst [vmem:[#allocation141_spill] sm:$0xff] %v5422_v34  ;;  %v1891_v60 = vpop.f32.mrf.mxu1 }
 0x145   : > { %v1892_v57 = vadd.f32 %v1891_v60, %v1878_v51 }
 0x147   : > { %v2025_v8 = vadd.f32 %v1892_v57, %v6198_v19 }
 0x149   : > { %v4039_v9 = vmul.f32 -1.442695, %v2025_v8 }
 0x14a   : > { %v1904_v16 = vpop.f32.mrf.mxu2  ;;  %v1917_v43 = vpop.f32.mrf.mxu3 }
 0x14b   : > { %v1880_v38 = vpop.f32.mrf.mxu0  ;;  %v1918_v15 = vadd.f32 %v1917_v43, %v1904_v16  ;;  %4441 = vpow2.f32 %v4039_v9 }
 0x14c   : > { %v1893_v18 = vpop.f32.mrf.mxu1 }
 0x14d   : > { %v2026_v46 = vadd.f32 %v1918_v15, %v5225_v33 }
 0x14f   : > { %v4040_v10 = vmul.f32 -1.442695, %v2026_v46 }
 0x151   : > { %v4442_v42 = vpop.eup %4441  ;;  %4443 = vpow2.f32 %v4040_v10 }
 0x152   : > { %v1906_v27 = vpop.f32.mrf.mxu2  ;;  %v1919_v31 = vpop.f32.mrf.mxu3  ;;  %v2033_v28 = vadd.f32 1.0, %v4442_v42 }
 0x154   : > { %4445 = vrcp.f32 %v2033_v28  ;;  %vm2040_vm1 = vweird.f32 %v2033_v28 }
 0x157   : > { %v4444_v19 = vpop.eup %4443 }
 0x158   : > { %v5427_v33 = vadd.f32 1.0, %v4444_v19 }
 0x15a   : > { %v1930_v34 = vpop.f32.mrf.mxu0  ;;  %v4446_v15 = vpop.eup %4445  ;;  %vm2055_vm6 = vweird.f32 %v5427_v33 }
 0x15b   : > { %v1943_v6 = vpop.f32.mrf.mxu1  ;;  %v2036_v42 = vmul.f32 %v4446_v15, %v2033_v28  ;;  %vm2041_vm0 = vweird.f32 %v4446_v15 }
 0x15c   : > { %v1944_v51 = vadd.f32 %v1943_v6, %v1930_v34  ;;  %vm2042_vm2 = vmor %vm2040_vm1, %vm2041_vm0 }
 0x15d   : > { %v2037_v31 = vsub.f32 1.0, %v2036_v42 }
 0x15e   : > { %v2065_v57 = vadd.f32 %v1944_v51, %v5307_v30 }
 0x160   : > { %v4041_v38 = vmul.f32 -1.442695, %v2065_v57 }
 0x162   : > { %4447 = vpow2.f32 %v4041_v38  ;;  %v1932_v16 = vpop.f32.mrf.mxu0  ;;  %v2038_v38 = vmul.f32 %v4446_v15, %v2037_v31 }
 0x163   : > { %v1956_v60 = vpop.f32.mrf.mxu2  ;;  %v1945_v8 = vpop.f32.mrf.mxu1  ;;  %4449 = vrcp.f32 %v5427_v33  ;;  %v1372_v16 = vld [vmem:[%s5868_s5] sm:$0x3] }
 0x164   : > { %v1969_v43 = vpop.f32.mrf.mxu3  ;;  %v2039_v8 = vadd.f32 %v4446_v15, %v2038_v38 }
 0x165   : > { %v1970_v9 = vadd.f32 %v1969_v43, %v1956_v60 }
 0x167   : > { %v2066_v46 = vadd.f32 %v1970_v9, %v5324_v45 }
 0x168   : > { %v4448_v6 = vpop.eup %4447 }
 0x169   : > { %v4042_v10 = vmul.f32 -1.442695, %v2066_v46  ;;  %v5431_v34 = vadd.f32 1.0, %v4448_v6  ;;  %v5434_v27 = vpop.eup %4449  ;;  %v2046_v46 = vand.u32 2147483648, %v2033_v28  ;;  %v2044_v6 = vand.u32 2147483647, %v2033_v28 }
 0x16a   : > { %v2051_v45 = vmul.f32 %v5434_v27, %v5427_v33  ;;  %vm2056_vm4 = vweird.f32 %v5434_v27 }
 0x16b   : > { %4451 = vpow2.f32 %v4042_v10  ;;  %v1958_v30 = vpop.f32.mrf.mxu2  ;;  %v2047_v38 = vor.u32 1.1754944e-38, %v2046_v46  ;;  %vm2045_vm3 = vcmp.eq.f32.partialorder %v2044_v6, 8.507059e+37  ;;  %v2086_v39 = vand.u32 2147483648, %v5431_v34  ;;  %vm5460_vm8 = vmor %vm2055_vm6, %vm2056_vm4 }
 0x16c   : > { %v1971_v18 = vpop.f32.mrf.mxu3  ;;  %4453 = vrcp.f32 %v5431_v34  ;;  %v2052_v9 = vsub.f32 1.0, %v2051_v45  ;;  %v5445_v30 = vperm.slane %v1372_v16, 0  ;;  %v2043_v45 = vsel %vm2042_vm2, %v4446_v15, %v2039_v8 }
 0x16d   : > { %v2048_v44 = vsel %vm2045_vm3, %v2047_v38, %v2043_v45  ;;  %vm2080_vm7 = vweird.f32 %v5431_v34  ;;  %v2084_v15 = vand.u32 2147483647, %v5431_v34  ;;  %v2059_v46 = vand.u32 2147483647, %v5427_v33 }
 0x16e   : > { %6199 = vst [vmem:[#allocation93_spill] sm:$0xff] %v5445_v30  ;;  %v5465_v6 = vperm.slane %v1372_v16, 1  ;;  %v2087_v45 = vor.u32 1.1754944e-38, %v2086_v39 }
 0x16f   : > { %vm2085_vm10 = vcmp.eq.f32.partialorder %v2084_v15, 8.507059e+37  ;;  %vm2060_vm11 = vcmp.eq.f32.partialorder %v2059_v46, 8.507059e+37 }
 0x171   : > { %v4452_v51 = vpop.eup %4451 }
 0x172   : > { %v5436_v57 = vadd.f32 1.0, %v4452_v51  ;;  %v4454_v19 = vpop.eup %4453  ;;  %v2053_v51 = vmul.f32 %v5434_v27, %v2052_v9 }
 0x173   : > { %v2076_v60 = vmul.f32 %v4454_v19, %v5431_v34  ;;  %vm2081_vm5 = vweird.f32 %v4454_v19 }
 0x174   : > { %4455 = vrcp.f32 %v5436_v57  ;;  %vm5467_vm9 = vmor %vm2080_vm7, %vm2081_vm5  ;;  %vm2095_vm13 = vweird.f32 %v5436_v57  ;;  %v2099_v39 = vand.u32 2147483647, %v5436_v57 }
 0x175   : > { %v2077_v43 = vsub.f32 1.0, %v2076_v60 }
 0x176   : > { %vm2100_vm15 = vcmp.eq.f32.partialorder %v2099_v39, 8.507059e+37 }
 0x177   : > { %v2078_v18 = vmul.f32 %v4454_v19, %v2077_v43  ;;  %v2054_v43 = vadd.f32 %v5434_v27, %v2053_v51 }
 0x179   : > { %v2079_v28 = vadd.f32 %v4454_v19, %v2078_v18 }
 0x17a   : > { %v1982_v10 = vpop.f32.mrf.mxu0  ;;  %v5447_v42 = vpop.eup %4455 }
 0x17b   : > { %v1995_v31 = vpop.f32.mrf.mxu1  ;;  %v2091_v60 = vmul.f32 %v5447_v42, %v5436_v57  ;;  %v2083_v51 = vsel %vm5467_vm9, %v4454_v19, %v2079_v28  ;;  %vm2096_vm12 = vweird.f32 %v5447_v42  ;;  %v2101_v19 = vand.u32 2147483648, %v5436_v57 }
 0x17c   : > { %v1996_v20 = vadd.f32 %v1995_v31, %v1982_v10  ;;  %v2061_v10 = vand.u32 2147483648, %v5427_v33  ;;  %v2058_v33 = vsel %vm5460_vm8, %v5434_v27, %v2054_v43  ;;  %vm5487_vm14 = vmor %vm2095_vm13, %vm2096_vm12 }
 0x17d   : > { %v2092_v53 = vsub.f32 1.0, %v2091_v60 }
 0x17e   : > { %v2110_v50 = vadd.f32 %v5445_v30, %v1996_v20  ;;  %v2062_v38 = vor.u32 1.1754944e-38, %v2061_v10  ;;  %v5493_v20 = vpop.permute.xlu0 %2133 }
 0x180   : > { %v2112_v9 = vmul.f32 %v2110_v50, %v2048_v44  ;;  %v2093_v44 = vmul.f32 %v5447_v42, %v2092_v53  ;;  %v2063_v18 = vsel %vm2060_vm11, %v2062_v38, %v2058_v33  ;;  %v4521_v33 = vld [vmem:[#allocation2] sm:$0xff]  ;;  %v2129_v38 = vstv %s2127_s20 }
 0x181   : > { %vm2136_vm1 = vcmp.lt.s32.totalorder %v2129_v38, %v5493_v20  ;;  %v6223_v38 = vld [vmem:[#allocation95_spill] sm:$0xff] }
 0x182   : > { %v2114_v50 = vadd.f32 %v2112_v9, %v5376_v4  ;;  %v2021_v31 = vpop.f32.mrf.mxu3  ;;  %v1984_v34 = vpop.f32.mrf.mxu0  ;;  %v2094_v4 = vadd.f32 %v5447_v42, %v2093_v44  ;;  %v2088_v9 = vsel %vm2085_vm10, %v2087_v45, %v2083_v51 }
 0x183   : > { %v2008_v8 = vpop.f32.mrf.mxu2  ;;  %v1997_v16 = vpop.f32.mrf.mxu1  ;;  %v2118_v43 = vsub.f32 1.0, %v2088_v9  ;;  %v6206_v34 = vld [vmem:[#allocation55_spill] sm:$0xff] }
 0x184   : > { %v2022_v60 = vadd.f32 %v2021_v31, %v2008_v8  ;;  %4457 = vtanh.f32 %v2114_v50  ;;  %v2128_v8 = vstv %s5482_s25  ;;  %v2098_v44 = vsel %vm5487_vm14, %v5447_v42, %v2094_v4 }
 0x185   : > { %v2102_v31 = vor.u32 1.1754944e-38, %v2101_v19  ;;  %v2122_v51 = vmul.f32 %v2088_v9, %v6206_v34  ;;  %vm2135_vm0 = vcmp.lt.s32.totalorder %v2128_v8, %v5493_v20  ;;  %v6207_v9 = vld [vmem:[#allocation80_spill] sm:$0xff]  ;;  %v6211_v8 = vld [vmem:[#allocation81_spill] sm:$0xff]  ;;  %v6217_v34 = vld [vmem:[#allocation94_spill] sm:$0xff] }
 0x186   : > { %v2111_v53 = vadd.f32 %v5465_v6, %v2022_v60 }
 0x188   : > { %v2113_v27 = vmul.f32 %v2111_v53, %v2063_v18  ;;  %v4522_v18 = vld [vmem:[#allocation2 + $0x8] sm:$0xff] }
 0x18a   : > { %v2115_v10 = vadd.f32 %v2113_v27, %v5394_v32  ;;  %v4458_v46 = vpop.eup %4457  ;;  %v2023_v50 = vpop.f32.mrf.mxu3  ;;  %v2103_v32 = vsel %vm2100_vm15, %v2102_v31, %v2098_v44  ;;  %v6208_v27 = vld [vmem:[#allocation82_spill] sm:$0xff]  ;;  %v6213_v44 = vld [vmem:[#allocation89_spill] sm:$0xff] }
 0x18b   : > { %v2010_v15 = vpop.f32.mrf.mxu2  ;;  %v2120_v57 = vmul.f32 %v4458_v46, %v2118_v43  ;;  %v2119_v45 = vsub.f32 1.0, %v2103_v32  ;;  %v2123_v19 = vmul.f32 %v4522_v18, %v2103_v32  ;;  %v6209_v43 = vld [vmem:[#allocation84_spill] sm:$0xff]  ;;  %v6212_v46 = vld [vmem:[#allocation83_spill] sm:$0xff]  ;;  %v6215_v31 = vld [vmem:[#allocation85_spill] sm:$0xff] }
 0x18c   : > { %4459 = vtanh.f32 %v2115_v10  ;;  %v6210_v10 = vld [vmem:[#allocation86_spill] sm:$0xff]  ;;  %v6214_v50 = vld [vmem:[#allocation91_spill] sm:$0xff]  ;;  %v6220_v32 = vld [vmem:[#allocation92_spill] sm:$0xff] }
 0x18d   : > { %v2124_v60 = vadd.f32 %v2122_v51, %v2120_v57  ;;  %v6216_v57 = vld [vmem:[#allocation87_spill] sm:$0xff]  ;;  %v6218_v51 = vld [vmem:[#allocation96_spill] sm:$0xff] }
 0x18f   : > { %v5501_v16 = vsel %vm2135_vm0, %v2124_v60, %v4521_v33  ;;  %v6219_v60 = vld [vmem:[#allocation90_spill] sm:$0xff]  ;;  %v6221_v33 = vld [vmem:[#allocation99_spill] sm:$0xff] }
 0x190   : > { %v2146_v42 = vpack.c.bf16 %v5501_v16, %v5501_v16 }
 0x192   : > { %v4460_v53 = vpop.eup %4459  ;;  %2156 = vmatmul.bf16.vlgmr.msra.gmra.mxu0 %v2146_v42  ;;  %2182 = vmatmul.bf16.vlgmr.msra.gmra.mxu2 %v2146_v42 }
 0x193   : > { %v2121_v4 = vmul.f32 %v4460_v53, %v2119_v45  ;;  %2252 = vmatpush.bf16.msra.mxu0 %v6207_v9  ;;  %2278 = vmatpush.bf16.msra.mxu2 %v6208_v27  ;;  %v6222_v45 = vld [vmem:[#allocation101_spill] sm:$0xff]  ;;  %v6224_v53 = vld [vmem:[#allocation98_spill] sm:$0xff] }
 0x195   : > { %v2125_v39 = vadd.f32 %v2123_v19, %v2121_v4  ;;  %v6225_v4 = vld [vmem:[#allocation105_spill] sm:$0xff]  ;;  %v6227_v19 = vld [vmem:[#allocation100_spill] sm:$0xff] }
 0x197   : > { %v5508_v28 = vsel %vm2136_vm1, %v2125_v39, %v4522_v18  ;;  %2253 = vmatpush.bf16.msra.mxu0 %v6209_v43  ;;  %2279 = vmatpush.bf16.msra.mxu2 %v6210_v10  ;;  %v6226_v18 = vld [vmem:[#allocation107_spill] sm:$0xff] }
 0x198   : > { %v2147_v15 = vpack.c.bf16 %v5508_v28, %v5508_v28  ;;  %v6228_v39 = vld [vmem:[#allocation103_spill] sm:$0xff] }
 0x19a   : > { %2169 = vmatmul.bf16.vlgmr.msra.gmra.mxu1 %v2147_v15  ;;  %2195 = vmatmul.bf16.vlgmr.msra.gmra.mxu3 %v2147_v15 }
 0x19b   : > { %2265 = vmatpush.bf16.msra.mxu1 %v6211_v8  ;;  %2291 = vmatpush.bf16.msra.mxu3 %v6212_v46 }
 0x19c   : > { %2254 = vmatpush.bf16.msra.mxu0 %v6213_v44  ;;  %2280 = vmatpush.bf16.msra.mxu2 %v6214_v50 }
 0x19f   : > { %2266 = vmatpush.bf16.msra.mxu1 %v6215_v31  ;;  %2292 = vmatpush.bf16.msra.mxu3 %v6216_v57 }
 0x1a0   : > { %2255 = vmatpush.bf16.msra.mxu0 %v6217_v34  ;;  %2281 = vmatpush.bf16.msra.mxu2 %v6218_v51 }
 0x1a2   : > { %2208 = vmatmul.bf16.vlgmr.msrb.gmra.mxu0 %v2146_v42  ;;  %2234 = vmatmul.bf16.vlgmr.msrb.gmra.mxu2 %v2146_v42 }
 0x1a3   : > { %2267 = vmatpush.bf16.msra.mxu1 %v6219_v60  ;;  %2293 = vmatpush.bf16.msra.mxu3 %v6220_v32 }
 0x1a4   : > { %2256 = vmatpush.bf16.msra.mxu0 %v6221_v33  ;;  %2282 = vmatpush.bf16.msra.mxu2 %v6222_v45  ;;  %v6229_v33 = vld [vmem:[#allocation106_spill] sm:$0xff] }
 0x1a7   : > { %2268 = vmatpush.bf16.msra.mxu1 %v6223_v38  ;;  %2294 = vmatpush.bf16.msra.mxu3 %v6224_v53 }
 0x1a8   : > { %2257 = vmatpush.bf16.msra.mxu0 %v6225_v4  ;;  %2283 = vmatpush.bf16.msra.mxu2 %v6226_v18 }
 0x1aa   : > { %2221 = vmatmul.bf16.vlgmr.msrb.gmra.mxu1 %v2147_v15  ;;  %2247 = vmatmul.bf16.vlgmr.msrb.gmra.mxu3 %v2147_v15 }
 0x1ab   : > { %2269 = vmatpush.bf16.msra.mxu1 %v6227_v19  ;;  %2295 = vmatpush.bf16.msra.mxu3 %v6228_v39 }
 0x1ac   : > { %2258 = vmatpush.bf16.msra.mxu0 %v5240_v41  ;;  %2284 = vmatpush.bf16.msra.mxu2 %v5248_v59 }
 0x1af   : > { %2270 = vmatpush.bf16.msra.mxu1 %v6229_v33  ;;  %2296 = vmatpush.bf16.msra.mxu3 %v5237_v3 }
 0x1b0   : > { %2259 = vmatpush.bf16.msra.mxu0 %v5259_v40  ;;  %2285 = vmatpush.bf16.msra.mxu2 %v5265_v58 }
 0x1b3   : > { %2271 = vmatpush.bf16.msra.mxu1 %v5246_v56  ;;  %2297 = vmatpush.bf16.msra.mxu3 %v5253_v55 }
 0x1b4   : > { %2419 = vmatpush.bf16.msrb.mxu0 %v4934_v63  ;;  %2445 = vmatpush.bf16.msrb.mxu2 %v4938_v1 }
 0x1b5   : > { %2260 = vmatmul.bf16.vlgmr.msra.gmra.mxu0 %v2146_v42  ;;  %2286 = vmatmul.bf16.vlgmr.msra.gmra.mxu2 %v2146_v42  ;;  %v6230_v42 = vld [vmem:[#allocation43_spill] sm:$0xff] }
 0x1b7   : > { %2272 = vmatpush.bf16.msra.mxu1 %v5263_v22  ;;  %2298 = vmatpush.bf16.msra.mxu3 %v5268_v26  ;;  %v6282_v22 = vld [vmem:[#allocation133_spill] sm:$0xff] }
 0x1b8   : > { %2420 = vmatpush.bf16.msrb.mxu0 %v4943_v11  ;;  %2446 = vmatpush.bf16.msrb.mxu2 %v4949_v13 }
 0x1ba   : > { %2273 = vmatmul.bf16.vlgmr.msra.gmra.mxu1 %v2147_v15  ;;  %2299 = vmatmul.bf16.vlgmr.msra.gmra.mxu3 %v2147_v15  ;;  %v6231_v15 = vld [vmem:[#allocation45_spill] sm:$0xff] }
 0x1bb   : > { %2432 = vmatpush.bf16.msrb.mxu1 %v4936_v0  ;;  %2458 = vmatpush.bf16.msrb.mxu3 %v4940_v5  ;;  %v6274_v0 = vld [vmem:[#allocation117_spill] sm:$0xff] }
 0x1bc   : > { %2421 = vmatpush.bf16.msrb.mxu0 %v4958_v23  ;;  %2447 = vmatpush.bf16.msrb.mxu2 %v4962_v25 }
 0x1bf   : > { %2433 = vmatpush.bf16.msrb.mxu1 %v4947_v12  ;;  %2459 = vmatpush.bf16.msrb.mxu3 %v4952_v14  ;;  %v6273_v14 = vld [vmem:[#allocation109_spill] sm:$0xff] }
 0x1c0   : > { %2422 = vmatpush.bf16.msrb.mxu0 %v4971_v35  ;;  %2448 = vmatpush.bf16.msrb.mxu2 %v4977_v37 }
 0x1c3   : > { %2434 = vmatpush.bf16.msrb.mxu1 %v4960_v24  ;;  %2460 = vmatpush.bf16.msrb.mxu3 %v4965_v29  ;;  %v6271_v24 = vld [vmem:[#allocation97_spill] sm:$0xff] }
 0x1c4   : > { %2423 = vmatpush.bf16.msrb.mxu0 %v4983_v47  ;;  %2449 = vmatpush.bf16.msrb.mxu2 %v4989_v49  ;;  %v6270_v47 = vld [vmem:[#allocation104_spill] sm:$0xff] }
 0x1c7   : > { %2435 = vmatpush.bf16.msrb.mxu1 %v4975_v36  ;;  %2461 = vmatpush.bf16.msrb.mxu3 %v4980_v52  ;;  %v6232_v52 = vld [vmem:[#allocation47_spill] sm:$0xff]  ;;  %v6269_v36 = vld [vmem:[#allocation102_spill] sm:$0xff] }
 0x1c8   : > { %2424 = vmatpush.bf16.msrb.mxu0 %v4995_v61  ;;  %2450 = vmatpush.bf16.msrb.mxu2 %v5001_v2  ;;  %v6233_v61 = vld [vmem:[#allocation49_spill] sm:$0xff]  ;;  %v6234_v2 = vld [vmem:[#allocation40_spill] sm:$0xff] }
 0x1cb   : > { %2436 = vmatpush.bf16.msrb.mxu1 %v4987_v48  ;;  %2462 = vmatpush.bf16.msrb.mxu3 %v4992_v54  ;;  %v6235_v48 = vld [vmem:[#allocation42_spill] sm:$0xff]  ;;  %v6236_v54 = vld [vmem:[#allocation51_spill] sm:$0xff] }
 0x1cc   : > { %2425 = vmatpush.bf16.msrb.mxu0 %v5007_v17  ;;  %2451 = vmatpush.bf16.msrb.mxu2 %v5013_v21  ;;  %v6237_v17 = vld [vmem:[#allocation53_spill] sm:$0xff]  ;;  %v6238_v21 = vld [vmem:[#allocation44_spill] sm:$0xff] }
 0x1cf   : > { %2437 = vmatpush.bf16.msrb.mxu1 %v4999_v62  ;;  %2463 = vmatpush.bf16.msrb.mxu3 %v5004_v7  ;;  %v6239_v62 = vld [vmem:[#allocation46_spill] sm:$0xff]  ;;  %v6240_v7 = vld [vmem:[#allocation48_spill] sm:$0xff] }
 0x1d0   : > { %2426 = vmatpush.bf16.msrb.mxu0 %v6230_v42  ;;  %2452 = vmatpush.bf16.msrb.mxu2 %v6231_v15  ;;  %v6241_v42 = vld [vmem:[#allocation50_spill] sm:$0xff]  ;;  %v6242_v15 = vld [vmem:[#allocation56_spill] sm:$0xff] }
 0x1d3   : > { %2438 = vmatpush.bf16.msrb.mxu1 %v6234_v2  ;;  %2464 = vmatpush.bf16.msrb.mxu3 %v6235_v48  ;;  %v6245_v2 = vld [vmem:[#allocation54_spill] sm:$0xff]  ;;  %v6246_v48 = vld [vmem:[#allocation60_spill] sm:$0xff] }
 0x1d4   : > { %2471 = vmatpush.bf16.msra.mxu0 %v6232_v52  ;;  %2497 = vmatpush.bf16.msra.mxu2 %v6233_v61  ;;  %v6243_v52 = vld [vmem:[#allocation58_spill] sm:$0xff]  ;;  %v6244_v61 = vld [vmem:[#allocation52_spill] sm:$0xff] }
 0x1d7   : > { %2439 = vmatpush.bf16.msrb.mxu1 %v6238_v21  ;;  %2465 = vmatpush.bf16.msrb.mxu3 %v6239_v62  ;;  %v6249_v21 = vld [vmem:[#allocation59_spill] sm:$0xff]  ;;  %v6250_v62 = vld [vmem:[#allocation64_spill] sm:$0xff] }
 0x1d8   : > { %2472 = vmatpush.bf16.msra.mxu0 %v6236_v54  ;;  %2498 = vmatpush.bf16.msra.mxu2 %v6237_v17  ;;  %v6247_v54 = vld [vmem:[#allocation62_spill] sm:$0xff]  ;;  %v6248_v17 = vld [vmem:[#allocation57_spill] sm:$0xff] }
 0x1db   : > { %2484 = vmatpush.bf16.msra.mxu1 %v6240_v7  ;;  %2510 = vmatpush.bf16.msra.mxu3 %v6241_v42  ;;  %v6251_v7 = vld [vmem:[#allocation66_spill] sm:$0xff]  ;;  %v6252_v42 = vld [vmem:[#allocation61_spill] sm:$0xff] }
 0x1dc   : > { %2473 = vmatpush.bf16.msra.mxu0 %v6242_v15  ;;  %2499 = vmatpush.bf16.msra.mxu2 %v6243_v52  ;;  %v6253_v15 = vld [vmem:[#allocation63_spill] sm:$0xff]  ;;  %v6254_v52 = vld [vmem:[#allocation68_spill] sm:$0xff] }
 0x1df   : > { %2485 = vmatpush.bf16.msra.mxu1 %v6244_v61  ;;  %2511 = vmatpush.bf16.msra.mxu3 %v6245_v2  ;;  %v6255_v61 = vld [vmem:[#allocation70_spill] sm:$0xff]  ;;  %v6256_v2 = vld [vmem:[#allocation65_spill] sm:$0xff] }
 0x1e0   : > { %2474 = vmatpush.bf16.msra.mxu0 %v6246_v48  ;;  %2500 = vmatpush.bf16.msra.mxu2 %v6247_v54  ;;  %v6257_v48 = vld [vmem:[#allocation67_spill] sm:$0xff]  ;;  %v6258_v54 = vld [vmem:[#allocation72_spill] sm:$0xff] }
 0x1e3   : > { %2486 = vmatpush.bf16.msra.mxu1 %v6248_v17  ;;  %2512 = vmatpush.bf16.msra.mxu3 %v6249_v21  ;;  %v6259_v17 = vld [vmem:[#allocation74_spill] sm:$0xff]  ;;  %v6260_v21 = vld [vmem:[#allocation69_spill] sm:$0xff] }
 0x1e4   : > { %2475 = vmatpush.bf16.msra.mxu0 %v6250_v62  ;;  %2501 = vmatpush.bf16.msra.mxu2 %v6251_v7  ;;  %v6261_v62 = vld [vmem:[#allocation71_spill] sm:$0xff]  ;;  %v6262_v7 = vld [vmem:[#allocation76_spill] sm:$0xff] }
 0x1e7   : > { %2487 = vmatpush.bf16.msra.mxu1 %v6252_v42  ;;  %2513 = vmatpush.bf16.msra.mxu3 %v6253_v15  ;;  %v6263_v42 = vld [vmem:[#allocation78_spill] sm:$0xff]  ;;  %v6264_v15 = vld [vmem:[#allocation73_spill] sm:$0xff] }
 0x1e8   : > { %2476 = vmatpush.bf16.msra.mxu0 %v6254_v52  ;;  %2502 = vmatpush.bf16.msra.mxu2 %v6255_v61  ;;  %v6265_v52 = vld [vmem:[#allocation75_spill] sm:$0xff]  ;;  %v6266_v61 = vld [vmem:[#allocation77_spill] sm:$0xff] }
 0x1eb   : > { %2488 = vmatpush.bf16.msra.mxu1 %v6256_v2  ;;  %2514 = vmatpush.bf16.msra.mxu3 %v6257_v48  ;;  %v6267_v2 = vld [vmem:[#allocation79_spill] sm:$0xff] }
 0x1ec   : > { %2477 = vmatpush.bf16.msra.mxu0 %v6258_v54  ;;  %2503 = vmatpush.bf16.msra.mxu2 %v6259_v17  ;;  %v6268_v54 = vld [vmem:[#allocation88_spill] sm:$0xff] }
 0x1ed   : > { %v1036_v17 = vadd.f32 %v6269_v36, %v6268_v54 }
 0x1ef   : > { %2489 = vmatpush.bf16.msra.mxu1 %v6260_v21  ;;  %2515 = vmatpush.bf16.msra.mxu3 %v6261_v62  ;;  %v1055_v62 = vadd.f32 %v6270_v47, %v1036_v17  ;;  %v6275_v47 = vld [vmem:[#allocation120_spill] sm:$0xff] }
 0x1f0   : > { %2478 = vmatpush.bf16.msra.mxu0 %v6262_v7  ;;  %2504 = vmatpush.bf16.msra.mxu2 %v6263_v42  ;;  %v6272_v42 = vld [vmem:[#allocation108_spill] sm:$0xff] }
 0x1f1   : > { %v1074_v37 = vadd.f32 %v6272_v42, %v6271_v24 }
 0x1f3   : > { %2490 = vmatpush.bf16.msra.mxu1 %v6264_v15  ;;  %2516 = vmatpush.bf16.msra.mxu3 %v6265_v52 }
 0x1f7   : > { %2491 = vmatpush.bf16.msra.mxu1 %v6266_v61  ;;  %2517 = vmatpush.bf16.msra.mxu3 %v6267_v2  ;;  %v1093_v61 = vadd.f32 %v6273_v14, %v1074_v37 }
 0x20f   : > { %v2157_v48 = vpop.f32.mrf.mxu0 }
 0x215   : > { %v2183_v49 = vpop.f32.mrf.mxu2 }
 0x217   : > { %v2170_v21 = vpop.f32.mrf.mxu1  ;;  %v2159_v7 = vpop.f32.mrf.mxu0 }
 0x218   : > { %v2171_v29 = vadd.f32 %v2170_v21, %v2157_v48  ;;  %v1112_v48 = vadd.f32 %v6275_v47, %v6274_v0  ;;  %v6276_v21 = vld [vmem:[#allocation121_spill] sm:$0xff] }
 0x21a   : > { %v2304_v15 = vadd.f32 %v2171_v29, %v1055_v62  ;;  %v1131_v42 = vadd.f32 %v6276_v21, %v1112_v48 }
 0x21c   : > { %v4044_v35 = vmul.f32 -1.442695, %v2304_v15 }
 0x21d   : > { %v2196_v52 = vpop.f32.mrf.mxu3  ;;  %v2185_v12 = vpop.f32.mrf.mxu2 }
 0x21e   : > { %4461 = vpow2.f32 %v4044_v35  ;;  %v2197_v2 = vadd.f32 %v2196_v52, %v2183_v49  ;;  %v6277_v12 = vld [vmem:[#allocation119_spill] sm:$0xff] }
 0x21f   : > { %v2172_v25 = vpop.f32.mrf.mxu1  ;;  %v2209_v36 = vpop.f32.mrf.mxu0 }
 0x220   : > { %v2305_v23 = vadd.f32 %v2197_v2, %v1093_v61  ;;  %v6278_v25 = vld [vmem:[#allocation122_spill] sm:$0xff] }
 0x221   : > { %v1150_v52 = vadd.f32 %v6278_v25, %v6277_v12 }
 0x222   : > { %v4045_v54 = vmul.f32 -1.442695, %v2305_v23 }
 0x224   : > { %v4462_v5 = vpop.eup %4461  ;;  %4463 = vpow2.f32 %v4045_v54  ;;  %v6279_v54 = vld [vmem:[#allocation123_spill] sm:$0xff] }
 0x225   : > { %v2312_v7 = vadd.f32 1.0, %v4462_v5  ;;  %v2198_v17 = vpop.f32.mrf.mxu3  ;;  %v2235_v62 = vpop.f32.mrf.mxu2  ;;  %v1169_v15 = vadd.f32 %v6279_v54, %v1150_v52 }
 0x227   : > { %4465 = vrcp.f32 %v2312_v7  ;;  %v2222_v29 = vpop.f32.mrf.mxu1  ;;  %v2211_v35 = vpop.f32.mrf.mxu0  ;;  %v2325_v52 = vand.u32 2147483648, %v2312_v7  ;;  %vm2319_vm3 = vweird.f32 %v2312_v7 }
 0x228   : > { %v2223_v14 = vadd.f32 %v2222_v29, %v2209_v36 }
 0x22a   : > { %v4464_v37 = vpop.eup %4463  ;;  %v2344_v49 = vadd.f32 %v2223_v14, %v1131_v42 }
 0x22b   : > { %v5617_v23 = vadd.f32 1.0, %v4464_v37 }
 0x22c   : > { %v4046_v61 = vmul.f32 -1.442695, %v2344_v49 }
 0x22d   : > { %v4466_v2 = vpop.eup %4465  ;;  %4467 = vrcp.f32 %v5617_v23  ;;  %v2248_v5 = vpop.f32.mrf.mxu3  ;;  %v2340_v26 = vand.u32 2147483648, %v5617_v23  ;;  %vm2334_vm7 = vweird.f32 %v5617_v23 }
 0x22e   : > { %4469 = vpow2.f32 %v4046_v61  ;;  %v2249_v47 = vadd.f32 %v2248_v5, %v2235_v62  ;;  %v2315_v17 = vmul.f32 %v4466_v2, %v2312_v7  ;;  %v2237_v36 = vpop.f32.mrf.mxu2  ;;  %vm2320_vm2 = vweird.f32 %v4466_v2 }
 0x22f   : > { %v2224_v48 = vpop.f32.mrf.mxu1  ;;  %v2323_v62 = vand.u32 2147483647, %v2312_v7  ;;  %vm2321_vm4 = vmor %vm2319_vm3, %vm2320_vm2 }
 0x230   : > { %v2345_v29 = vadd.f32 %v2249_v47, %v1169_v15  ;;  %v2316_v21 = vsub.f32 1.0, %v2315_v17  ;;  %v6280_v15 = vld [vmem:[#allocation128_spill] sm:$0xff] }
 0x231   : > { %v6281_v47 = vld [vmem:[#allocation132_spill] sm:$0xff]  ;;  %vm2324_vm5 = vcmp.eq.f32.partialorder %v2323_v62, 8.507059e+37 }
 0x232   : > { %v2261_v35 = vpop.f32.mrf.mxu0  ;;  %v4047_v0 = vmul.f32 -1.442695, %v2345_v29  ;;  %v2317_v25 = vmul.f32 %v4466_v2, %v2316_v21  ;;  %v1188_v17 = vadd.f32 %v6281_v47, %v6280_v15  ;;  %v2326_v29 = vor.u32 1.1754944e-38, %v2325_v52  ;;  %v6284_v52 = vld [vmem:[#allocation134_spill] sm:$0xff] }
 0x233   : > { %v4468_v42 = vpop.eup %4467 }
 0x234   : > { %v4470_v14 = vpop.eup %4469  ;;  %4471 = vpow2.f32 %v4047_v0  ;;  %v2318_v37 = vadd.f32 %v4466_v2, %v2317_v25  ;;  %v2330_v49 = vmul.f32 %v4468_v42, %v5617_v23  ;;  %vm2335_vm6 = vweird.f32 %v4468_v42 }
 0x235   : > { %v2352_v12 = vadd.f32 1.0, %v4470_v14  ;;  %v2250_v24 = vpop.f32.mrf.mxu3  ;;  %v1207_v13 = vadd.f32 %v6282_v22, %v1188_v17  ;;  %vm2336_vm8 = vmor %vm2334_vm7, %vm2335_vm6 }
 0x236   : > { %v2331_v61 = vsub.f32 1.0, %v2330_v49  ;;  %v2322_v36 = vsel %vm2321_vm4, %v4466_v2, %v2318_v37  ;;  %v2338_v2 = vand.u32 2147483647, %v5617_v23  ;;  %v6283_v37 = vld [vmem:[#allocation131_spill] sm:$0xff] }
 0x237   : > { %4473 = vrcp.f32 %v2352_v12  ;;  %v2274_v5 = vpop.f32.mrf.mxu1  ;;  %v2327_v49 = vsel %vm2324_vm5, %v2326_v29, %v2322_v36  ;;  %vm2359_vm11 = vweird.f32 %v2352_v12 }
 0x238   : > { %v2287_v54 = vpop.f32.mrf.mxu2  ;;  %v2275_v48 = vadd.f32 %v2274_v5, %v2261_v35  ;;  %v2332_v0 = vmul.f32 %v4468_v42, %v2331_v61  ;;  %v1226_v61 = vadd.f32 %v6284_v52, %v6283_v37  ;;  %vm2339_vm9 = vcmp.eq.f32.partialorder %v2338_v2, 8.507059e+37 }
 0x239   : > { %v2363_v37 = vand.u32 2147483647, %v2352_v12 }
 0x23a   : > { %v2263_v21 = vpop.f32.mrf.mxu0  ;;  %v4472_v25 = vpop.eup %4471  ;;  %v2384_v24 = vadd.f32 %v2275_v48, %v5445_v30  ;;  %v2333_v14 = vadd.f32 %v4468_v42, %v2332_v0  ;;  %v2341_v0 = vor.u32 1.1754944e-38, %v2340_v26 }
 0x23b   : > { %v2353_v7 = vadd.f32 1.0, %v4472_v25  ;;  %v6285_v25 = vld [vmem:[#allocation135_spill] sm:$0xff]  ;;  %vm2364_vm13 = vcmp.eq.f32.partialorder %v2363_v37, 8.507059e+37 }
 0x23c   : > { %v2386_v11 = vmul.f32 %v2384_v24, %v2327_v49  ;;  %v2337_v36 = vsel %vm2336_vm8, %v4468_v42, %v2333_v14  ;;  %v1245_v23 = vadd.f32 %v6285_v25, %v1226_v61  ;;  %v2365_v24 = vand.u32 2147483648, %v2352_v12 }
 0x23d   : > { %v4474_v35 = vpop.eup %4473  ;;  %4475 = vrcp.f32 %v2353_v7  ;;  %v2300_v62 = vpop.f32.mrf.mxu3  ;;  %v2342_v49 = vsel %vm2339_vm9, %v2341_v0, %v2337_v36  ;;  %v2380_v61 = vand.u32 2147483648, %v2353_v7  ;;  %vm2374_vm15 = vweird.f32 %v2353_v7 }
 0x23e   : > { %v2355_v5 = vmul.f32 %v4474_v35, %v2352_v12  ;;  %v2388_v47 = vadd.f32 %v2386_v11, %v1207_v13  ;;  %v2301_v48 = vadd.f32 %v2300_v62, %v2287_v54  ;;  %vm2360_vm10 = vweird.f32 %v4474_v35 }
 0x23f   : > { %v2276_v29 = vpop.f32.mrf.mxu1  ;;  %vm2361_vm12 = vmor %vm2359_vm11, %vm2360_vm10  ;;  %v2366_v42 = vor.u32 1.1754944e-38, %v2365_v24  ;;  %v2403_v24 = vstv %s2401_s18 }
 0x240   : > { %v2289_v21 = vpop.f32.mrf.mxu2  ;;  %v2356_v22 = vsub.f32 1.0, %v2355_v5  ;;  %v2385_v17 = vadd.f32 %v2301_v48, %v5465_v6  ;;  %4477 = vtanh.f32 %v2388_v47  ;;  %v2378_v48 = vand.u32 2147483647, %v2353_v7 }
 0x241   : > { %v2402_v47 = vstv %s2400_s15  ;;  %v2381_v21 = vor.u32 1.1754944e-38, %v2380_v61  ;;  %vm2407_vm3 = vcmp.lt.s32.totalorder %v2403_v24, %v5493_v20  ;;  %v6295_v61 = vld [vmem:[#allocation20_spill] sm:$0xff]  ;;  %v6312_v24 = vld [vmem:[#allocation38_spill] sm:$0xff] }
 0x242   : > { %v2357_v52 = vmul.f32 %v4474_v35, %v2356_v22  ;;  %v2387_v15 = vmul.f32 %v2385_v17, %v2342_v49  ;;  %vm2379_vm1 = vcmp.eq.f32.partialorder %v2378_v48, 8.507059e+37  ;;  %vm2406_vm2 = vcmp.lt.s32.totalorder %v2402_v47, %v5493_v20  ;;  %v6298_v48 = vld [vmem:[#allocation29_spill] sm:$0xff]  ;;  %v6301_v47 = vld [vmem:[#allocation31_spill] sm:$0xff] }
 0x243   : > { %v4476_v30 = vpop.eup %4475 }
 0x244   : > { %v2358_v11 = vadd.f32 %v4474_v35, %v2357_v52  ;;  %v2370_v13 = vmul.f32 %v4476_v30, %v2353_v7  ;;  %v2389_v26 = vadd.f32 %v2387_v15, %v1245_v23  ;;  %vm2375_vm14 = vweird.f32 %v4476_v30 }
 0x245   : > { %v2302_v54 = vpop.f32.mrf.mxu3  ;;  %vm2376_vm0 = vmor %vm2374_vm15, %vm2375_vm14 }
 0x246   : > { %v2371_v14 = vsub.f32 1.0, %v2370_v13  ;;  %v2362_v2 = vsel %vm2361_vm12, %v4474_v35, %v2358_v11  ;;  %v4478_v0 = vpop.eup %4477  ;;  %4479 = vtanh.f32 %v2389_v26  ;;  %v6287_v13 = vld [vmem:[#allocation19_spill] sm:$0xff]  ;;  %v6288_v26 = vld [vmem:[#allocation21_spill] sm:$0xff]  ;;  %v6290_v54 = vld [vmem:[#allocation112_spill] sm:$0xff] }
 0x247   : > { %v2367_v62 = vsel %vm2364_vm13, %v2366_v42, %v2362_v2  ;;  %v6289_v42 = vld [vmem:[#allocation111_spill] sm:$0xff]  ;;  %v6292_v2 = vld [vmem:[#allocation18_spill] sm:$0xff] }
 0x248   : > { %v2372_v5 = vmul.f32 %v4476_v30, %v2371_v14  ;;  %v2392_v36 = vsub.f32 1.0, %v2367_v62  ;;  %v2396_v29 = vmul.f32 %v2367_v62, %v5501_v16  ;;  %v6291_v14 = vld [vmem:[#allocation17_spill] sm:$0xff]  ;;  %v6296_v62 = vld [vmem:[#allocation22_spill] sm:$0xff] }
 0x24a   : > { %v2373_v12 = vadd.f32 %v4476_v30, %v2372_v5  ;;  %v2394_v15 = vmul.f32 %v4478_v0, %v2392_v36  ;;  %v6297_v5 = vld [vmem:[#allocation27_spill] sm:$0xff]  ;;  %v6299_v36 = vld [vmem:[#allocation24_spill] sm:$0xff]  ;;  %v6300_v0 = vld [vmem:[#allocation26_spill] sm:$0xff] }
 0x24c   : > { %v2398_v37 = vadd.f32 %v2396_v29, %v2394_v15  ;;  %v2377_v35 = vsel %vm2376_vm0, %v4476_v30, %v2373_v12  ;;  %v4480_v23 = vpop.eup %4479  ;;  %v6302_v12 = vld [vmem:[#allocation33_spill] sm:$0xff]  ;;  %v6303_v15 = vld [vmem:[#allocation28_spill] sm:$0xff]  ;;  %v6304_v29 = vld [vmem:[#allocation30_spill] sm:$0xff] }
 0x24d   : > { %v2382_v22 = vsel %vm2379_vm1, %v2381_v21, %v2377_v35  ;;  %v6305_v21 = vld [vmem:[#allocation35_spill] sm:$0xff]  ;;  %v6307_v35 = vld [vmem:[#allocation32_spill] sm:$0xff] }
 0x24e   : > { %v2393_v17 = vsub.f32 1.0, %v2382_v22  ;;  %v5638_v25 = vsel %vm2406_vm2, %v2398_v37, %v5501_v16  ;;  %v2397_v52 = vmul.f32 %v2382_v22, %v5508_v28  ;;  %v6306_v37 = vld [vmem:[#allocation37_spill] sm:$0xff]  ;;  %v6308_v22 = vld [vmem:[#allocation34_spill] sm:$0xff] }
 0x24f   : > { %v2417_v7 = vpack.c.bf16 %v5638_v25, %v5638_v25 }
 0x250   : > { %v2395_v49 = vmul.f32 %v4480_v23, %v2393_v17  ;;  %v6309_v17 = vld [vmem:[#allocation39_spill] sm:$0xff]  ;;  %v6310_v23 = vld [vmem:[#allocation41_spill] sm:$0xff] }
 0x251   : > { %2427 = vmatmul.bf16.vlgmr.msrb.gmra.mxu0 %v2417_v7  ;;  %2453 = vmatmul.bf16.vlgmr.msrb.gmra.mxu2 %v2417_v7 }
 0x252   : > { %v2399_v11 = vadd.f32 %v2397_v52, %v2395_v49  ;;  %2523 = vmatpush.bf16.msrb.mxu0 %v6207_v9  ;;  %2549 = vmatpush.bf16.msrb.mxu2 %v6208_v27  ;;  %v6313_v49 = vld [vmem:[#allocation43_spill] sm:$0xff]  ;;  %v6314_v52 = vld [vmem:[#allocation45_spill] sm:$0xff] }
 0x254   : > { %v5647_v30 = vsel %vm2407_vm3, %v2399_v11, %v5508_v28  ;;  %v6286_v28 = vld [vmem:[#allocation99_spill] sm:$0xff] }
 0x255   : > { %v2418_v16 = vpack.c.bf16 %v5647_v30, %v5647_v30  ;;  %v6315_v11 = vld [vmem:[#allocation47_spill] sm:$0xff] }
 0x256   : > { %2524 = vmatpush.bf16.msrb.mxu0 %v6209_v43  ;;  %2550 = vmatpush.bf16.msrb.mxu2 %v6210_v10 }
 0x257   : > { %2440 = vmatmul.bf16.vlgmr.msrb.gmra.mxu1 %v2418_v16  ;;  %2466 = vmatmul.bf16.vlgmr.msrb.gmra.mxu3 %v2418_v16 }
 0x258   : > { %2536 = vmatpush.bf16.msrb.mxu1 %v6211_v8  ;;  %2562 = vmatpush.bf16.msrb.mxu3 %v6212_v46 }
 0x25a   : > { %2525 = vmatpush.bf16.msrb.mxu0 %v6213_v44  ;;  %2551 = vmatpush.bf16.msrb.mxu2 %v6214_v50 }
 0x25c   : > { %2537 = vmatpush.bf16.msrb.mxu1 %v6215_v31  ;;  %2563 = vmatpush.bf16.msrb.mxu3 %v6216_v57 }
 0x25e   : > { %2526 = vmatpush.bf16.msrb.mxu0 %v6217_v34  ;;  %2552 = vmatpush.bf16.msrb.mxu2 %v6218_v51 }
 0x260   : > { %2538 = vmatpush.bf16.msrb.mxu1 %v6219_v60  ;;  %2564 = vmatpush.bf16.msrb.mxu3 %v6220_v32 }
 0x261   : > { %2479 = vmatmul.bf16.vlgmr.msra.gmra.mxu0 %v2417_v7  ;;  %2505 = vmatmul.bf16.vlgmr.msra.gmra.mxu2 %v2417_v7 }
 0x262   : > { %2527 = vmatpush.bf16.msrb.mxu0 %v6286_v28  ;;  %2553 = vmatpush.bf16.msrb.mxu2 %v6222_v45 }
 0x264   : > { %2539 = vmatpush.bf16.msrb.mxu1 %v6223_v38  ;;  %2565 = vmatpush.bf16.msrb.mxu3 %v6224_v53 }
 0x266   : > { %2528 = vmatpush.bf16.msrb.mxu0 %v6225_v4  ;;  %2554 = vmatpush.bf16.msrb.mxu2 %v6226_v18 }
 0x267   : > { %2492 = vmatmul.bf16.vlgmr.msra.gmra.mxu1 %v2418_v16  ;;  %2518 = vmatmul.bf16.vlgmr.msra.gmra.mxu3 %v2418_v16 }
 0x268   : > { %2540 = vmatpush.bf16.msrb.mxu1 %v6227_v19  ;;  %2566 = vmatpush.bf16.msrb.mxu3 %v6228_v39 }
 0x26a   : > { %2529 = vmatpush.bf16.msrb.mxu0 %v5240_v41  ;;  %2555 = vmatpush.bf16.msrb.mxu2 %v5248_v59 }
 0x26c   : > { %2541 = vmatpush.bf16.msrb.mxu1 %v6229_v33  ;;  %2567 = vmatpush.bf16.msrb.mxu3 %v5237_v3 }
 0x26e   : > { %2530 = vmatpush.bf16.msrb.mxu0 %v5259_v40  ;;  %2556 = vmatpush.bf16.msrb.mxu2 %v5265_v58 }
 0x270   : > { %2542 = vmatpush.bf16.msrb.mxu1 %v5246_v56  ;;  %2568 = vmatpush.bf16.msrb.mxu3 %v5253_v55 }
 0x271   : > { %2531 = vmatmul.bf16.vlgmr.msrb.gmra.mxu0 %v2417_v7  ;;  %2557 = vmatmul.bf16.vlgmr.msrb.gmra.mxu2 %v2417_v7  ;;  %v6311_v7 = vld [vmem:[#allocation36_spill] sm:$0xff] }
 0x272   : > { %2690 = vmatpush.bf16.msra.mxu0 %v4934_v63  ;;  %2716 = vmatpush.bf16.msra.mxu2 %v4938_v1  ;;  %v6293_v63 = vld [vmem:[#allocation23_spill] sm:$0xff]  ;;  %v6294_v1 = vld [vmem:[#allocation25_spill] sm:$0xff] }
 0x274   : > { %2543 = vmatpush.bf16.msrb.mxu1 %v6289_v42  ;;  %2569 = vmatpush.bf16.msrb.mxu3 %v6290_v54 }
 0x276   : > { %2691 = vmatpush.bf16.msra.mxu0 %v6287_v13  ;;  %2717 = vmatpush.bf16.msra.mxu2 %v6288_v26  ;;  %v6317_v13 = vld [vmem:[#allocation40_spill] sm:$0xff]  ;;  %v6318_v26 = vld [vmem:[#allocation42_spill] sm:$0xff] }
 0x277   : > { %2544 = vmatmul.bf16.vlgmr.msrb.gmra.mxu1 %v2418_v16  ;;  %2570 = vmatmul.bf16.vlgmr.msrb.gmra.mxu3 %v2418_v16  ;;  %v6316_v16 = vld [vmem:[#allocation49_spill] sm:$0xff] }
 0x278   : > { %2703 = vmatpush.bf16.msra.mxu1 %v6291_v14  ;;  %2729 = vmatpush.bf16.msra.mxu3 %v6292_v2  ;;  %v6319_v14 = vld [vmem:[#allocation51_spill] sm:$0xff]  ;;  %v6320_v2 = vld [vmem:[#allocation53_spill] sm:$0xff] }
 0x27a   : > { %2692 = vmatpush.bf16.msra.mxu0 %v6293_v63  ;;  %2718 = vmatpush.bf16.msra.mxu2 %v6294_v1  ;;  %v6321_v63 = vld [vmem:[#allocation44_spill] sm:$0xff]  ;;  %v6322_v1 = vld [vmem:[#allocation46_spill] sm:$0xff] }
 0x27c   : > { %2704 = vmatpush.bf16.msra.mxu1 %v6295_v61  ;;  %2730 = vmatpush.bf16.msra.mxu3 %v6296_v62  ;;  %v6323_v61 = vld [vmem:[#allocation48_spill] sm:$0xff]  ;;  %v6324_v62 = vld [vmem:[#allocation50_spill] sm:$0xff] }
 0x27e   : > { %2693 = vmatpush.bf16.msra.mxu0 %v6297_v5  ;;  %2719 = vmatpush.bf16.msra.mxu2 %v6298_v48  ;;  %v6325_v5 = vld [vmem:[#allocation56_spill] sm:$0xff]  ;;  %v6326_v48 = vld [vmem:[#allocation58_spill] sm:$0xff] }
 0x280   : > { %2705 = vmatpush.bf16.msra.mxu1 %v6299_v36  ;;  %2731 = vmatpush.bf16.msra.mxu3 %v6300_v0  ;;  %v6327_v36 = vld [vmem:[#allocation52_spill] sm:$0xff]  ;;  %v6328_v0 = vld [vmem:[#allocation54_spill] sm:$0xff] }
 0x282   : > { %2694 = vmatpush.bf16.msra.mxu0 %v6301_v47  ;;  %2720 = vmatpush.bf16.msra.mxu2 %v6302_v12  ;;  %v6329_v47 = vld [vmem:[#allocation60_spill] sm:$0xff]  ;;  %v6330_v12 = vld [vmem:[#allocation62_spill] sm:$0xff] }
 0x284   : > { %2706 = vmatpush.bf16.msra.mxu1 %v6303_v15  ;;  %2732 = vmatpush.bf16.msra.mxu3 %v6304_v29  ;;  %v6331_v15 = vld [vmem:[#allocation57_spill] sm:$0xff]  ;;  %v6332_v29 = vld [vmem:[#allocation59_spill] sm:$0xff] }
 0x286   : > { %2695 = vmatpush.bf16.msra.mxu0 %v6305_v21  ;;  %2721 = vmatpush.bf16.msra.mxu2 %v6306_v37  ;;  %v6333_v21 = vld [vmem:[#allocation64_spill] sm:$0xff]  ;;  %v6334_v37 = vld [vmem:[#allocation66_spill] sm:$0xff] }
 0x288   : > { %2707 = vmatpush.bf16.msra.mxu1 %v6307_v35  ;;  %2733 = vmatpush.bf16.msra.mxu3 %v6308_v22  ;;  %v6335_v35 = vld [vmem:[#allocation61_spill] sm:$0xff]  ;;  %v6336_v22 = vld [vmem:[#allocation63_spill] sm:$0xff] }
 0x28a   : > { %2696 = vmatpush.bf16.msra.mxu0 %v6309_v17  ;;  %2722 = vmatpush.bf16.msra.mxu2 %v6310_v23  ;;  %v6337_v17 = vld [vmem:[#allocation68_spill] sm:$0xff]  ;;  %v6338_v23 = vld [vmem:[#allocation70_spill] sm:$0xff] }
 0x28c   : > { %2708 = vmatpush.bf16.msra.mxu1 %v6311_v7  ;;  %2734 = vmatpush.bf16.msra.mxu3 %v6312_v24  ;;  %v6339_v7 = vld [vmem:[#allocation65_spill] sm:$0xff]  ;;  %v6340_v24 = vld [vmem:[#allocation67_spill] sm:$0xff] }
 0x28e   : > { %2697 = vmatpush.bf16.msra.mxu0 %v6313_v49  ;;  %2723 = vmatpush.bf16.msra.mxu2 %v6314_v52  ;;  %v6341_v49 = vld [vmem:[#allocation72_spill] sm:$0xff]  ;;  %v6342_v52 = vld [vmem:[#allocation74_spill] sm:$0xff] }
 0x290   : > { %2709 = vmatpush.bf16.msra.mxu1 %v6317_v13  ;;  %2735 = vmatpush.bf16.msra.mxu3 %v6318_v26  ;;  %v6345_v13 = vld [vmem:[#allocation76_spill] sm:$0xff]  ;;  %v6346_v26 = vld [vmem:[#allocation78_spill] sm:$0xff] }
 0x292   : > { %2742 = vmatpush.bf16.msrb.mxu0 %v6315_v11  ;;  %2768 = vmatpush.bf16.msrb.mxu2 %v6316_v16  ;;  %v6343_v11 = vld [vmem:[#allocation69_spill] sm:$0xff]  ;;  %v6344_v16 = vld [vmem:[#allocation71_spill] sm:$0xff] }
 0x294   : > { %2710 = vmatpush.bf16.msra.mxu1 %v6321_v63  ;;  %2736 = vmatpush.bf16.msra.mxu3 %v6322_v1  ;;  %v6349_v63 = vld [vmem:[#allocation77_spill] sm:$0xff]  ;;  %v6350_v1 = vld [vmem:[#allocation79_spill] sm:$0xff] }
 0x296   : > { %2743 = vmatpush.bf16.msrb.mxu0 %v6319_v14  ;;  %2769 = vmatpush.bf16.msrb.mxu2 %v6320_v2  ;;  %v6347_v14 = vld [vmem:[#allocation73_spill] sm:$0xff]  ;;  %v6348_v2 = vld [vmem:[#allocation75_spill] sm:$0xff] }
 0x298   : > { %2755 = vmatpush.bf16.msrb.mxu1 %v6323_v61  ;;  %2781 = vmatpush.bf16.msrb.mxu3 %v6324_v62 }
 0x29a   : > { %2744 = vmatpush.bf16.msrb.mxu0 %v6325_v5  ;;  %2770 = vmatpush.bf16.msrb.mxu2 %v6326_v48 }
 0x29c   : > { %2756 = vmatpush.bf16.msrb.mxu1 %v6327_v36  ;;  %2782 = vmatpush.bf16.msrb.mxu3 %v6328_v0  ;;  %v6351_v0 = vld [vmem:[#allocation110_spill] sm:$0xff] }
 0x29e   : > { %2745 = vmatpush.bf16.msrb.mxu0 %v6329_v47  ;;  %2771 = vmatpush.bf16.msrb.mxu2 %v6330_v12 }
 0x2a0   : > { %2757 = vmatpush.bf16.msrb.mxu1 %v6331_v15  ;;  %2783 = vmatpush.bf16.msrb.mxu3 %v6332_v29 }
 0x2a2   : > { %2746 = vmatpush.bf16.msrb.mxu0 %v6333_v21  ;;  %2772 = vmatpush.bf16.msrb.mxu2 %v6334_v37 }
 0x2a4   : > { %2758 = vmatpush.bf16.msrb.mxu1 %v6335_v35  ;;  %2784 = vmatpush.bf16.msrb.mxu3 %v6336_v22  ;;  %v6352_v35 = vld [vmem:[#allocation115_spill] sm:$0xff] }
 0x2a6   : > { %2747 = vmatpush.bf16.msrb.mxu0 %v6337_v17  ;;  %2773 = vmatpush.bf16.msrb.mxu2 %v6338_v23 }
 0x2a8   : > { %2759 = vmatpush.bf16.msrb.mxu1 %v6339_v7  ;;  %2785 = vmatpush.bf16.msrb.mxu3 %v6340_v24 }
 0x2aa   : > { %2748 = vmatpush.bf16.msrb.mxu0 %v6341_v49  ;;  %2774 = vmatpush.bf16.msrb.mxu2 %v6342_v52 }
 0x2ac   : > { %2760 = vmatpush.bf16.msrb.mxu1 %v6343_v11  ;;  %2786 = vmatpush.bf16.msrb.mxu3 %v6344_v16 }
 0x2ae   : > { %2749 = vmatpush.bf16.msrb.mxu0 %v6345_v13  ;;  %2775 = vmatpush.bf16.msrb.mxu2 %v6346_v26 }
 0x2b0   : > { %2761 = vmatpush.bf16.msrb.mxu1 %v6347_v14  ;;  %2787 = vmatpush.bf16.msrb.mxu3 %v6348_v2  ;;  %v6353_v14 = vld [vmem:[#allocation124_spill] sm:$0xff] }
 0x2b4   : > { %2762 = vmatpush.bf16.msrb.mxu1 %v6349_v63  ;;  %2788 = vmatpush.bf16.msrb.mxu3 %v6350_v1 }
 0x2ce   : > { %v2428_v61 = vpop.f32.mrf.mxu0 }
 0x2d4   : > { %v2441_v62 = vpop.f32.mrf.mxu1  ;;  %v2454_v5 = vpop.f32.mrf.mxu2 }
 0x2d5   : > { %v2442_v48 = vadd.f32 %v2441_v62, %v2428_v61 }
 0x2d6   : > { %v2430_v36 = vpop.f32.mrf.mxu0 }
 0x2d7   : > { %v2575_v47 = vadd.f32 %v2442_v48, %v6351_v0 }
 0x2d9   : > { %v4048_v12 = vmul.f32 -1.442695, %v2575_v47  ;;  %v6354_v47 = vld [vmem:[#allocation127_spill] sm:$0xff] }
 0x2da   : > { %v2467_v15 = vpop.f32.mrf.mxu3 }
 0x2db   : > { %4481 = vpow2.f32 %v4048_v12  ;;  %v2468_v29 = vadd.f32 %v2467_v15, %v2454_v5 }
 0x2dc   : > { %v2443_v21 = vpop.f32.mrf.mxu1  ;;  %v2456_v37 = vpop.f32.mrf.mxu2 }
 0x2dd   : > { %v2576_v22 = vadd.f32 %v2468_v29, %v6352_v35 }
 0x2de   : > { %v2480_v17 = vpop.f32.mrf.mxu0 }
 0x2df   : > { %v4049_v23 = vmul.f32 -1.442695, %v2576_v22 }
 0x2e1   : > { %v4482_v7 = vpop.eup %4481  ;;  %4483 = vpow2.f32 %v4049_v23 }
 0x2e2   : > { %v2583_v24 = vadd.f32 1.0, %v4482_v7  ;;  %v2469_v49 = vpop.f32.mrf.mxu3 }
 0x2e4   : > { %4485 = vrcp.f32 %v2583_v24  ;;  %v2493_v52 = vpop.f32.mrf.mxu1  ;;  %v2506_v11 = vpop.f32.mrf.mxu2  ;;  %vm2590_vm5 = vweird.f32 %v2583_v24 }
 0x2e5   : > { %v2494_v16 = vadd.f32 %v2493_v52, %v2480_v17  ;;  %v2596_v52 = vand.u32 2147483648, %v2583_v24 }
 0x2e6   : > { %v2482_v13 = vpop.f32.mrf.mxu0 }
 0x2e7   : > { %v4484_v26 = vpop.eup %4483  ;;  %v2615_v2 = vadd.f32 %v2494_v16, %v6353_v14 }
 0x2e8   : > { %v2584_v63 = vadd.f32 1.0, %v4484_v26 }
 0x2e9   : > { %v4050_v1 = vmul.f32 -1.442695, %v2615_v2 }
 0x2ea   : > { %v4486_v61 = vpop.eup %4485  ;;  %4487 = vrcp.f32 %v2584_v63  ;;  %v2519_v62 = vpop.f32.mrf.mxu3  ;;  %vm2605_vm9 = vweird.f32 %v2584_v63 }
 0x2eb   : > { %4489 = vpow2.f32 %v4050_v1  ;;  %v2520_v5 = vadd.f32 %v2519_v62, %v2506_v11  ;;  %v2586_v48 = vmul.f32 %v4486_v61, %v2583_v24  ;;  %vm2591_vm4 = vweird.f32 %v4486_v61 }
 0x2ec   : > { %v2495_v36 = vpop.f32.mrf.mxu1  ;;  %v2508_v0 = vpop.f32.mrf.mxu2  ;;  %v2594_v11 = vand.u32 2147483647, %v2583_v24  ;;  %vm2592_vm6 = vmor %vm2590_vm5, %vm2591_vm4  ;;  %v2597_v62 = vor.u32 1.1754944e-38, %v2596_v52 }
 0x2ed   : > { %v2616_v12 = vadd.f32 %v2520_v5, %v6354_v47  ;;  %v2587_v15 = vsub.f32 1.0, %v2586_v48  ;;  %v6355_v36 = vld [vmem:[#allocation93_spill] sm:$0xff] }
 0x2ee   : > { %v2532_v29 = vpop.f32.mrf.mxu0  ;;  %vm2595_vm7 = vcmp.eq.f32.partialorder %v2594_v11, 8.507059e+37 }
 0x2ef   : > { %v4051_v21 = vmul.f32 -1.442695, %v2616_v12  ;;  %v2588_v37 = vmul.f32 %v4486_v61, %v2587_v15 }
 0x2f0   : > { %v4488_v35 = vpop.eup %4487 }
 0x2f1   : > { %v4490_v22 = vpop.eup %4489  ;;  %4491 = vpow2.f32 %v4051_v21  ;;  %v2589_v17 = vadd.f32 %v4486_v61, %v2588_v37  ;;  %v2601_v23 = vmul.f32 %v4488_v35, %v2584_v63  ;;  %vm2606_vm8 = vweird.f32 %v4488_v35 }
 0x2f2   : > { %v2623_v7 = vadd.f32 1.0, %v4490_v22  ;;  %v2521_v49 = vpop.f32.mrf.mxu3  ;;  %v2611_v21 = vand.u32 2147483648, %v2584_v63  ;;  %v2609_v37 = vand.u32 2147483647, %v2584_v63  ;;  %vm2607_vm10 = vmor %vm2605_vm9, %vm2606_vm8 }
 0x2f3   : > { %v2602_v16 = vsub.f32 1.0, %v2601_v23  ;;  %v2593_v2 = vsel %vm2592_vm6, %v4486_v61, %v2589_v17 }
 0x2f4   : > { %4493 = vrcp.f32 %v2623_v7  ;;  %v2545_v13 = vpop.f32.mrf.mxu1  ;;  %v2558_v26 = vpop.f32.mrf.mxu2  ;;  %v2598_v15 = vsel %vm2595_vm7, %v2597_v62, %v2593_v2  ;;  %v2612_v11 = vor.u32 1.1754944e-38, %v2611_v21  ;;  %vm2610_vm11 = vcmp.eq.f32.partialorder %v2609_v37, 8.507059e+37 }
 0x2f5   : > { %v2546_v14 = vadd.f32 %v2545_v13, %v2532_v29  ;;  %v2603_v1 = vmul.f32 %v4488_v35, %v2602_v16  ;;  %v6356_v29 = vld [vmem:[#allocation136_spill] sm:$0xff]  ;;  %vm2630_vm13 = vweird.f32 %v2623_v7 }
 0x2f6   : > { %v2534_v5 = vpop.f32.mrf.mxu0 }
 0x2f7   : > { %v4492_v48 = vpop.eup %4491  ;;  %v2655_v0 = vadd.f32 %v2546_v14, %v6355_v36  ;;  %v2604_v47 = vadd.f32 %v4488_v35, %v2603_v1  ;;  %v2636_v1 = vand.u32 2147483648, %v2623_v7  ;;  %v2634_v5 = vand.u32 2147483647, %v2623_v7 }
 0x2f8   : > { %v2624_v12 = vadd.f32 1.0, %v4492_v48 }
 0x2f9   : > { %v2657_v24 = vmul.f32 %v2655_v0, %v2598_v15  ;;  %v2608_v52 = vsel %vm2607_vm10, %v4488_v35, %v2604_v47  ;;  %v6357_v35 = vld [vmem:[#allocation139_spill] sm:$0xff]  ;;  %v2637_v21 = vor.u32 1.1754944e-38, %v2636_v1  ;;  %vm2635_vm15 = vcmp.eq.f32.partialorder %v2634_v5, 8.507059e+37 }
 0x2fa   : > { %v4494_v22 = vpop.eup %4493  ;;  %4495 = vrcp.f32 %v2624_v12  ;;  %v2571_v23 = vpop.f32.mrf.mxu3  ;;  %v2613_v62 = vsel %vm2610_vm11, %v2612_v11, %v2608_v52  ;;  %v2649_v52 = vand.u32 2147483647, %v2624_v12  ;;  %vm2645_vm1 = vweird.f32 %v2624_v12 }
 0x2fb   : > { %v2626_v61 = vmul.f32 %v4494_v22, %v2623_v7  ;;  %v2659_v17 = vadd.f32 %v2657_v24, %v6356_v29  ;;  %v2572_v49 = vadd.f32 %v2571_v23, %v2558_v26  ;;  %vm2631_vm12 = vweird.f32 %v4494_v22 }
 0x2fc   : > { %v2547_v16 = vpop.f32.mrf.mxu1  ;;  %v2560_v13 = vpop.f32.mrf.mxu2  ;;  %vm2632_vm14 = vmor %vm2630_vm13, %vm2631_vm12  ;;  %vm2650_vm3 = vcmp.eq.f32.partialorder %v2649_v52, 8.507059e+37 }
 0x2fd   : > { %v2627_v14 = vsub.f32 1.0, %v2626_v61  ;;  %v2656_v2 = vadd.f32 %v2572_v49, %v5465_v6  ;;  %4497 = vtanh.f32 %v2659_v17  ;;  %v2651_v61 = vand.u32 2147483648, %v2624_v12 }
 0x2fe   : > { %v2673_v16 = vstv %s2671_s21 }
 0x2ff   : > { %v2628_v63 = vmul.f32 %v4494_v22, %v2627_v14  ;;  %v2658_v48 = vmul.f32 %v2656_v2, %v2613_v62  ;;  %v2652_v2 = vor.u32 1.1754944e-38, %v2651_v61  ;;  %vm2677_vm4 = vcmp.lt.s32.totalorder %v2673_v16, %v5493_v20  ;;  %v6367_v61 = vld [vmem:[#allocation119_spill] sm:$0xff] }
 0x300   : > { %v4496_v0 = vpop.eup %4495 }
 0x301   : > { %v2629_v15 = vadd.f32 %v4494_v22, %v2628_v63  ;;  %v2641_v26 = vmul.f32 %v4496_v0, %v2624_v12  ;;  %v2660_v47 = vadd.f32 %v2658_v48, %v6357_v35  ;;  %vm2646_vm0 = vweird.f32 %v4496_v0 }
 0x302   : > { %v2573_v24 = vpop.f32.mrf.mxu3  ;;  %vm2647_vm2 = vmor %vm2645_vm1, %vm2646_vm0 }
 0x303   : > { %v2642_v37 = vsub.f32 1.0, %v2641_v26  ;;  %v2633_v23 = vsel %vm2632_vm14, %v4494_v22, %v2629_v15  ;;  %v4498_v17 = vpop.eup %4497  ;;  %4499 = vtanh.f32 %v2660_v47  ;;  %v2674_v15 = vstv %s2672_s22 }
 0x304   : > { %v2638_v29 = vsel %vm2635_vm15, %v2637_v21, %v2633_v23  ;;  %vm2678_vm5 = vcmp.lt.s32.totalorder %v2674_v15, %v5493_v20 }
 0x305   : > { %v2643_v49 = vmul.f32 %v4496_v0, %v2642_v37  ;;  %v2663_v11 = vsub.f32 1.0, %v2638_v29  ;;  %v2667_v14 = vmul.f32 %v2638_v29, %v5638_v25  ;;  %v6368_v29 = vld [vmem:[#allocation129_spill] sm:$0xff] }
 0x307   : > { %v2644_v7 = vadd.f32 %v4496_v0, %v2643_v49  ;;  %v2665_v13 = vmul.f32 %v4498_v17, %v2663_v11  ;;  %v1155_v49 = vadd.f32 %v6368_v29, %v6367_v61 }
 0x309   : > { %v2669_v1 = vadd.f32 %v2667_v14, %v2665_v13  ;;  %v2648_v22 = vsel %vm2647_vm2, %v4496_v0, %v2644_v7  ;;  %v4500_v48 = vpop.eup %4499  ;;  %v6369_v13 = vld [vmem:[#allocation130_spill] sm:$0xff] }
 0x30a   : > { %v2653_v62 = vsel %vm2650_vm3, %v2652_v2, %v2648_v22  ;;  %v1174_v14 = vadd.f32 %v6369_v13, %v1155_v49  ;;  %v6375_v49 = vld [vmem:[#allocation141_spill] sm:$0xff] }
 0x30b   : > { %v2664_v63 = vsub.f32 1.0, %v2653_v62  ;;  %v5758_v5 = vsel %vm2677_vm4, %v2669_v1, %v5638_v25  ;;  %v2668_v35 = vmul.f32 %v2653_v62, %v5647_v30 }
 0x30c   : > { %v2688_v12 = vpack.c.bf16 %v5758_v5, %v5758_v5 }
 0x30d   : > { %v2666_v26 = vmul.f32 %v4500_v48, %v2664_v63 }
 0x30e   : > { %2698 = vmatmul.bf16.vlgmr.msra.gmra.mxu0 %v2688_v12  ;;  %2724 = vmatmul.bf16.vlgmr.msra.gmra.mxu2 %v2688_v12 }
 0x30f   : > { %v2670_v47 = vadd.f32 %v2668_v35, %v2666_v26  ;;  %2794 = vmatpush.bf16.msra.mxu0 %v6207_v9  ;;  %2820 = vmatpush.bf16.msra.mxu2 %v6208_v27  ;;  %v6359_v9 = vld [vmem:[#allocation113_spill] sm:$0xff] }
 0x311   : > { %v5767_v25 = vsel %vm2678_vm5, %v2670_v47, %v5647_v30 }
 0x312   : > { %v2689_v0 = vpack.c.bf16 %v5767_v25, %v5767_v25 }
 0x313   : > { %2795 = vmatpush.bf16.msra.mxu0 %v6209_v43  ;;  %2821 = vmatpush.bf16.msra.mxu2 %v6210_v10  ;;  %v6360_v43 = vld [vmem:[#allocation114_spill] sm:$0xff] }
 0x314   : > { %2711 = vmatmul.bf16.vlgmr.msra.gmra.mxu1 %v2689_v0  ;;  %2737 = vmatmul.bf16.vlgmr.msra.gmra.mxu3 %v2689_v0 }
 0x315   : > { %2807 = vmatpush.bf16.msra.mxu1 %v6211_v8  ;;  %2833 = vmatpush.bf16.msra.mxu3 %v6212_v46  ;;  %v6361_v8 = vld [vmem:[#allocation97_spill] sm:$0xff] }
 0x317   : > { %2796 = vmatpush.bf16.msra.mxu0 %v6213_v44  ;;  %2822 = vmatpush.bf16.msra.mxu2 %v6214_v50 }
 0x319   : > { %2808 = vmatpush.bf16.msra.mxu1 %v6215_v31  ;;  %2834 = vmatpush.bf16.msra.mxu3 %v6216_v57  ;;  %v6363_v57 = vld [vmem:[#allocation118_spill] sm:$0xff] }
 0x31b   : > { %2797 = vmatpush.bf16.msra.mxu0 %v6217_v34  ;;  %2823 = vmatpush.bf16.msra.mxu2 %v6218_v51 }
 0x31d   : > { %2809 = vmatpush.bf16.msra.mxu1 %v6219_v60  ;;  %2835 = vmatpush.bf16.msra.mxu3 %v6220_v32 }
 0x31e   : > { %2750 = vmatmul.bf16.vlgmr.msrb.gmra.mxu0 %v2688_v12  ;;  %2776 = vmatmul.bf16.vlgmr.msrb.gmra.mxu2 %v2688_v12 }
 0x31f   : > { %2798 = vmatpush.bf16.msra.mxu0 %v6286_v28  ;;  %2824 = vmatpush.bf16.msra.mxu2 %v6222_v45 }
 0x321   : > { %2810 = vmatpush.bf16.msra.mxu1 %v6223_v38  ;;  %2836 = vmatpush.bf16.msra.mxu3 %v6224_v53 }
 0x323   : > { %2799 = vmatpush.bf16.msra.mxu0 %v6225_v4  ;;  %2825 = vmatpush.bf16.msra.mxu2 %v6226_v18  ;;  %v6364_v4 = vld [vmem:[#allocation117_spill] sm:$0xff] }
 0x324   : > { %2763 = vmatmul.bf16.vlgmr.msrb.gmra.mxu1 %v2689_v0  ;;  %2789 = vmatmul.bf16.vlgmr.msrb.gmra.mxu3 %v2689_v0  ;;  %v6365_v18 = vld [vmem:[#allocation125_spill] sm:$0xff] }
 0x325   : > { %2811 = vmatpush.bf16.msra.mxu1 %v6227_v19  ;;  %2837 = vmatpush.bf16.msra.mxu3 %v6228_v39  ;;  %v1117_v19 = vadd.f32 %v6365_v18, %v6364_v4 }
 0x327   : > { %2800 = vmatpush.bf16.msra.mxu0 %v5240_v41  ;;  %2826 = vmatpush.bf16.msra.mxu2 %v5248_v59  ;;  %v6358_v59 = vld [vmem:[#allocation88_spill] sm:$0xff] }
 0x329   : > { %2812 = vmatpush.bf16.msra.mxu1 %v6229_v33  ;;  %2838 = vmatpush.bf16.msra.mxu3 %v5237_v3  ;;  %v1041_v3 = vadd.f32 %v6359_v9, %v6358_v59 }
 0x32b   : > { %2801 = vmatpush.bf16.msra.mxu0 %v5259_v40  ;;  %2827 = vmatpush.bf16.msra.mxu2 %v5265_v58  ;;  %v1060_v58 = vadd.f32 %v6360_v43, %v1041_v3 }
 0x32d   : > { %2813 = vmatpush.bf16.msra.mxu1 %v5246_v56  ;;  %2839 = vmatpush.bf16.msra.mxu3 %v5253_v55  ;;  %v6362_v55 = vld [vmem:[#allocation116_spill] sm:$0xff] }
 0x32e   : > { %2802 = vmatmul.bf16.vlgmr.msra.gmra.mxu0 %v2688_v12  ;;  %2828 = vmatmul.bf16.vlgmr.msra.gmra.mxu2 %v2688_v12  ;;  %v1079_v46 = vadd.f32 %v6362_v55, %v6361_v8 }
 0x330   : > { %v1098_v34 = vadd.f32 %v6363_v57, %v1079_v46 }
 0x331   : > { %2814 = vmatpush.bf16.msra.mxu1 %v6289_v42  ;;  %2840 = vmatpush.bf16.msra.mxu3 %v6290_v54  ;;  %v6366_v54 = vld [vmem:[#allocation126_spill] sm:$0xff] }
 0x332   : > { %v1136_v21 = vadd.f32 %v6366_v54, %v1117_v19  ;;  %v6373_v19 = vld [vmem:[#allocation131_spill] sm:$0xff] }
 0x334   : > { %2815 = vmatmul.bf16.vlgmr.msra.gmra.mxu1 %v2689_v0  ;;  %2841 = vmatmul.bf16.vlgmr.msra.gmra.mxu3 %v2689_v0 }
 0x38b   : > { %v2699_v41 = vpop.f32.mrf.mxu0 }
 0x391   : > { %v2712_v27 = vpop.f32.mrf.mxu1  ;;  %v2725_v40 = vpop.f32.mrf.mxu2 }
 0x392   : > { %v2713_v10 = vadd.f32 %v2712_v27, %v2699_v41 }
 0x393   : > { %v2701_v56 = vpop.f32.mrf.mxu0 }
 0x394   : > { %v2846_v44 = vadd.f32 %v2713_v10, %v1060_v58  ;;  %v6370_v10 = vld [vmem:[#allocation128_spill] sm:$0xff]  ;;  %v6371_v56 = vld [vmem:[#allocation137_spill] sm:$0xff] }
 0x395   : > { %v1193_v8 = vadd.f32 %v6371_v56, %v6370_v10 }
 0x396   : > { %v4052_v50 = vmul.f32 -1.442695, %v2846_v44 }
 0x397   : > { %v2738_v31 = vpop.f32.mrf.mxu3 }
 0x398   : > { %4501 = vpow2.f32 %v4052_v50  ;;  %v2739_v51 = vadd.f32 %v2738_v31, %v2725_v40 }
 0x399   : > { %v2714_v60 = vpop.f32.mrf.mxu1  ;;  %v2727_v32 = vpop.f32.mrf.mxu2 }
 0x39a   : > { %v2847_v33 = vadd.f32 %v2739_v51, %v1098_v34 }
 0x39b   : > { %v2751_v45 = vpop.f32.mrf.mxu0 }
 0x39c   : > { %v4053_v38 = vmul.f32 -1.442695, %v2847_v33 }
 0x39e   : > { %v4502_v53 = vpop.eup %4501  ;;  %4503 = vpow2.f32 %v4053_v38 }
 0x39f   : > { %v2854_v39 = vadd.f32 1.0, %v4502_v53  ;;  %v2740_v30 = vpop.f32.mrf.mxu3 }
 0x3a1   : > { %4505 = vrcp.f32 %v2854_v39  ;;  %v2764_v28 = vpop.f32.mrf.mxu1  ;;  %v2777_v42 = vpop.f32.mrf.mxu2  ;;  %v2867_v3 = vand.u32 2147483648, %v2854_v39  ;;  %vm2861_vm7 = vweird.f32 %v2854_v39  ;;  %v2865_v27 = vand.u32 2147483647, %v2854_v39 }
 0x3a2   : > { %v2765_v24 = vadd.f32 %v2764_v28, %v2751_v45  ;;  %v6372_v45 = vld [vmem:[#allocation138_spill] sm:$0xff] }
 0x3a3   : > { %v2753_v37 = vpop.f32.mrf.mxu0  ;;  %v2868_v50 = vor.u32 1.1754944e-38, %v2867_v3  ;;  %vm2866_vm9 = vcmp.eq.f32.partialorder %v2865_v27, 8.507059e+37  ;;  %v1212_v38 = vadd.f32 %v6372_v45, %v1193_v8 }
 0x3a4   : > { %v4504_v23 = vpop.eup %4503  ;;  %v2886_v52 = vadd.f32 %v2765_v24, %v1136_v21 }
 0x3a5   : > { %v5812_v11 = vadd.f32 1.0, %v4504_v23 }
 0x3a6   : > { %v4054_v17 = vmul.f32 -1.442695, %v2886_v52 }
 0x3a7   : > { %v4506_v16 = vpop.eup %4505  ;;  %4507 = vrcp.f32 %v5812_v11  ;;  %v2790_v7 = vpop.f32.mrf.mxu3  ;;  %v2882_v33 = vand.u32 2147483648, %v5812_v11  ;;  %vm2876_vm11 = vweird.f32 %v5812_v11  ;;  %v2880_v4 = vand.u32 2147483647, %v5812_v11 }
 0x3a8   : > { %4509 = vpow2.f32 %v4054_v17  ;;  %v2791_v2 = vadd.f32 %v2790_v7, %v2777_v42  ;;  %v2857_v1 = vmul.f32 %v4506_v16, %v2854_v39  ;;  %vm2862_vm6 = vweird.f32 %v4506_v16  ;;  %v6374_v39 = vld [vmem:[#allocation140_spill] sm:$0xff] }
 0x3a9   : > { %v2766_v22 = vpop.f32.mrf.mxu1  ;;  %v2779_v62 = vpop.f32.mrf.mxu2  ;;  %vm2863_vm8 = vmor %vm2861_vm7, %vm2862_vm6  ;;  %v1231_v30 = vadd.f32 %v6374_v39, %v6373_v19  ;;  %v2883_v24 = vor.u32 1.1754944e-38, %v2882_v33  ;;  %vm2881_vm13 = vcmp.eq.f32.partialorder %v2880_v4, 8.507059e+37 }
 0x3aa   : > { %v2887_v63 = vadd.f32 %v2791_v2, %v1174_v14  ;;  %v2858_v48 = vsub.f32 1.0, %v2857_v1 }
 0x3ab   : > { %v2803_v12 = vpop.f32.mrf.mxu0  ;;  %v1250_v52 = vadd.f32 %v6375_v49, %v1231_v30 }
 0x3ac   : > { %v4055_v15 = vmul.f32 -1.442695, %v2887_v63  ;;  %v2859_v26 = vmul.f32 %v4506_v16, %v2858_v48 }
 0x3ad   : > { %v4508_v35 = vpop.eup %4507 }
 0x3ae   : > { %v4510_v47 = vpop.eup %4509  ;;  %4511 = vpow2.f32 %v4055_v15  ;;  %v2860_v0 = vadd.f32 %v4506_v16, %v2859_v26  ;;  %v2872_v41 = vmul.f32 %v4508_v35, %v5812_v11  ;;  %vm2877_vm10 = vweird.f32 %v4508_v35 }
 0x3af   : > { %v2894_v59 = vadd.f32 1.0, %v4510_v47  ;;  %v2792_v9 = vpop.f32.mrf.mxu3  ;;  %vm2878_vm12 = vmor %vm2876_vm11, %vm2877_vm10 }
 0x3b0   : > { %v2873_v40 = vsub.f32 1.0, %v2872_v41  ;;  %v2864_v46 = vsel %vm2863_vm8, %v4506_v16, %v2860_v0  ;;  %v2944_v41 = vstv %s2942_s16 }
 0x3b1   : > { %4513 = vrcp.f32 %v2894_v59  ;;  %v2816_v43 = vpop.f32.mrf.mxu1  ;;  %v2829_v58 = vpop.f32.mrf.mxu2  ;;  %v2869_v32 = vsel %vm2866_vm9, %v2868_v50, %v2864_v46  ;;  %v2907_v11 = vand.u32 2147483648, %v2894_v59  ;;  %v2905_v7 = vand.u32 2147483647, %v2894_v59 }
 0x3b2   : > { %v2817_v55 = vadd.f32 %v2816_v43, %v2803_v12  ;;  %v2874_v44 = vmul.f32 %v4508_v35, %v2873_v40  ;;  %vm2901_vm15 = vweird.f32 %v2894_v59  ;;  %vm2948_vm6 = vcmp.lt.s32.totalorder %v2944_v41, %v5493_v20 }
 0x3b3   : > { %v2805_v31 = vpop.f32.mrf.mxu0  ;;  %v2908_v62 = vor.u32 1.1754944e-38, %v2907_v11  ;;  %vm2906_vm1 = vcmp.eq.f32.partialorder %v2905_v7, 8.507059e+37 }
 0x3b4   : > { %v4512_v57 = vpop.eup %4511  ;;  %v2926_v34 = vadd.f32 %v2817_v55, %v6355_v36  ;;  %v2875_v51 = vadd.f32 %v4508_v35, %v2874_v44  ;;  %v2945_v55 = vstv %s2943_s19 }
 0x3b5   : > { %v2895_v60 = vadd.f32 1.0, %v4512_v57  ;;  %vm2949_vm7 = vcmp.lt.s32.totalorder %v2945_v55, %v5493_v20 }
 0x3b6   : > { %v2928_v53 = vmul.f32 %v2926_v34, %v2869_v32  ;;  %v2879_v21 = vsel %vm2878_vm12, %v4508_v35, %v2875_v51 }
 0x3b7   : > { %v4514_v18 = vpop.eup %4513  ;;  %4515 = vrcp.f32 %v2895_v60  ;;  %v2842_v28 = vpop.f32.mrf.mxu3  ;;  %v2884_v17 = vsel %vm2881_vm13, %v2883_v24, %v2879_v21  ;;  %v2922_v12 = vand.u32 2147483648, %v2895_v60  ;;  %v2920_v35 = vand.u32 2147483647, %v2895_v60 }
 0x3b8   : > { %v2897_v36 = vmul.f32 %v4514_v18, %v2894_v59  ;;  %v2930_v42 = vadd.f32 %v2928_v53, %v1212_v38  ;;  %v2843_v54 = vadd.f32 %v2842_v28, %v2829_v58  ;;  %vm2902_vm14 = vweird.f32 %v4514_v18 }
 0x3b9   : > { %v2818_v37 = vpop.f32.mrf.mxu1  ;;  %v2831_v23 = vpop.f32.mrf.mxu2  ;;  %vm2903_vm0 = vmor %vm2901_vm15, %vm2902_vm14  ;;  %vm2916_vm3 = vweird.f32 %v2895_v60  ;;  %v2923_v27 = vor.u32 1.1754944e-38, %v2922_v12  ;;  %vm2921_vm5 = vcmp.eq.f32.partialorder %v2920_v35, 8.507059e+37 }
 0x3ba   : > { %v2898_v61 = vsub.f32 1.0, %v2897_v36  ;;  %v2927_v29 = vadd.f32 %v2843_v54, %v5465_v6  ;;  %4517 = vtanh.f32 %v2930_v42 }
 0x3bc   : > { %v2899_v16 = vmul.f32 %v4514_v18, %v2898_v61  ;;  %v2929_v13 = vmul.f32 %v2927_v29, %v2884_v17 }
 0x3bd   : > { %v4516_v14 = vpop.eup %4515 }
 0x3be   : > { %v2900_v2 = vadd.f32 %v4514_v18, %v2899_v16  ;;  %v2912_v1 = vmul.f32 %v4516_v14, %v2895_v60  ;;  %v2931_v22 = vadd.f32 %v2929_v13, %v1250_v52  ;;  %vm2917_vm2 = vweird.f32 %v4516_v14 }
 0x3bf   : > { %v2844_v63 = vpop.f32.mrf.mxu3  ;;  %vm2918_vm4 = vmor %vm2916_vm3, %vm2917_vm2 }
 0x3c0   : > { %v2913_v6 = vsub.f32 1.0, %v2912_v1  ;;  %v2904_v48 = vsel %vm2903_vm0, %v4514_v18, %v2900_v2  ;;  %v4518_v0 = vpop.eup %4517  ;;  %4519 = vtanh.f32 %v2931_v22 }
 0x3c1   : > { %v2909_v15 = vsel %vm2906_vm1, %v2908_v62, %v2904_v48 }
 0x3c2   : > { %v2914_v26 = vmul.f32 %v4516_v14, %v2913_v6  ;;  %v2934_v47 = vsub.f32 1.0, %v2909_v15  ;;  %v2938_v3 = vmul.f32 %v2909_v15, %v5758_v5 }
 0x3c4   : > { %v2915_v59 = vadd.f32 %v4516_v14, %v2914_v26  ;;  %v2936_v9 = vmul.f32 %v4518_v0, %v2934_v47 }
 0x3c6   : > { %v2940_v40 = vadd.f32 %v2938_v3, %v2936_v9  ;;  %v2919_v43 = vsel %vm2918_vm4, %v4516_v14, %v2915_v59  ;;  %v4520_v8 = vpop.eup %4519 }
 0x3c7   : > { %v2924_v58 = vsel %vm2921_vm5, %v2923_v27, %v2919_v43 }
 0x3c8   : > { %v2950_v10 = vsel %vm2948_vm6, %v2940_v40, %v5758_v5  ;;  %v2935_v56 = vsub.f32 1.0, %v2924_v58  ;;  %v2939_v44 = vmul.f32 %v2924_v58, %v5767_v25 }
 0x3c9   : > { %2952 = vst [vmem:[#allocation2] sm:$0xff] %v2950_v10 }
 0x3ca   : > { %v2937_v46 = vmul.f32 %v4520_v8, %v2935_v56 }
 0x3cb   : > { %2957 = sbr.rel (%p4056_p1) target bundleno = 1143 (0x477), region = 76 }
 0x3cc   : > { %v2941_v50 = vadd.f32 %v2939_v44, %v2937_v46 }
 0x3ce   : > { %v2951_v31 = vsel %vm2949_vm7, %v2941_v50, %v5767_v25 }
 0x3cf   : > { %2953 = vst [vmem:[#allocation2 + $0x8] sm:$0xff] %v2951_v31 }
 0x3d0   : > { %v4330_v57 = vld [vmem:[#allocation10 + $0x38] sm:$0xff]  ;;  %v4329_v5 = vld [vmem:[#allocation10 + $0x30] sm:$0xff]  ;;  %v4328_v60 = vld [vmem:[#allocation10 + $0x28] sm:$0xff]  ;;  %v2958_v30 = vpack.c.bf16 %v2950_v10, %v2950_v10  ;;  %v2959_v28 = vpack.c.bf16 %v2951_v31, %v2951_v31 }
 0x3d1   : > { %v4338_v34 = vld [vmem:[#allocation10 + $0x78] sm:$0xff]  ;;  %3092 = vmatpush.bf16.msra.mxu0 %v4330_v57  ;;  %v4337_v51 = vld [vmem:[#allocation10 + $0x70] sm:$0xff]  ;;  %v4336_v32 = vld [vmem:[#allocation10 + $0x68] sm:$0xff] }
 0x3d2   : > { %3105 = vmatpush.bf16.msra.mxu1 %v4338_v34  ;;  %v4327_v33 = vld [vmem:[#allocation10 + $0x20] sm:$0xff]  ;;  %v4326_v25 = vld [vmem:[#allocation10 + $0x18] sm:$0xff]  ;;  %v4325_v38 = vld [vmem:[#allocation10 + $0x10] sm:$0xff] }
 0x3d3   : > { %v4335_v20 = vld [vmem:[#allocation10 + $0x60] sm:$0xff]  ;;  %v4334_v45 = vld [vmem:[#allocation10 + $0x58] sm:$0xff]  ;;  %v4333_v53 = vld [vmem:[#allocation10 + $0x50] sm:$0xff] }
 0x3d4   : > { %v4324_v4 = vld [vmem:[#allocation10 + $0x8] sm:$0xff]  ;;  %v4323_v19 = vld [vmem:[#allocation10] sm:$0xff]  ;;  %v4523_v36 = vld [vmem:[%s5870_s7] ss:$0 sm:$0xff] }
 0x3d5   : > { %3093 = vmatpush.bf16.msra.mxu0 %v4329_v5  ;;  %v4332_v18 = vld [vmem:[#allocation10 + $0x48] sm:$0xff]  ;;  %v4331_v39 = vld [vmem:[#allocation10 + $0x40] sm:$0xff] }
 0x3d6   : > { %3106 = vmatpush.bf16.msra.mxu1 %v4337_v51 }
 0x3d9   : > { %3094 = vmatpush.bf16.msra.mxu0 %v4328_v60 }
 0x3da   : > { %3107 = vmatpush.bf16.msra.mxu1 %v4336_v32 }
 0x3dd   : > { %3095 = vmatpush.bf16.msra.mxu0 %v4327_v33 }
 0x3de   : > { %3108 = vmatpush.bf16.msra.mxu1 %v4335_v20 }
 0x3e1   : > { %3096 = vmatpush.bf16.msra.mxu0 %v4326_v25 }
 0x3e2   : > { %3109 = vmatpush.bf16.msra.mxu1 %v4334_v45 }
 0x3e5   : > { %3097 = vmatpush.bf16.msra.mxu0 %v4325_v38 }
 0x3e6   : > { %3110 = vmatpush.bf16.msra.mxu1 %v4333_v53 }
 0x3e9   : > { %3098 = vmatpush.bf16.msra.mxu0 %v4324_v4 }
 0x3ea   : > { %3111 = vmatpush.bf16.msra.mxu1 %v4332_v18 }
 0x3ed   : > { %3099 = vmatpush.bf16.msra.mxu0 %v4323_v19 }
 0x3ee   : > { %3112 = vmatpush.bf16.msra.mxu1 %v4331_v39 }
 0x3f0   : > { %3100 = vmatmul.bf16.vlgmr.msra.gmra.mxu0 %v2958_v30 }
 0x3f1   : > { %3113 = vmatmul.bf16.vlgmr.msra.gmra.mxu1 %v2959_v28 }
 0x46d   : > { %v3101_v42 = vpop.f32.mrf.mxu0 }
 0x46e   : > { %v3114_v54 = vpop.f32.mrf.mxu1  ;;  %v3102_v21 = vadd.f32 %v4523_v36, %v3101_v42 }
 0x470   : > { %v3115_v24 = vadd.f32 %v3114_v54, %v3102_v21 }
 0x472   : > { %3118 = vst [vmem:[#allocation12] sm:$0xff] %v3115_v24 }
 0x475   : > { %v3103_v37 = vpop.f32.mrf.mxu0 }
 0x476   : > { %v3116_v23 = vpop.f32.mrf.mxu1 }
 0x477 PF: > { %s6376_s24 = sadd.s32 4294967295, %s4734_s10   ;;  %s3129_s3 = sshll.u32 %s5871_s8, 4  ;;  %s3130_s3 = int_to_ptr.hbm [resolvable:$true] %s3129_s3 }
 0x478   : > { %p4378_p3 = scmp.eq.s32.totalorder %s6376_s24, 1  ;;  %s4747_s12 = smov [#allocation12]  }
 0x479   : > { %s3127_s13 = sshll.u32 %s4747_s12, 4  ;;  %s3128_s13 = int_to_ptr.vmem [resolvable:$true] %s3127_s13 }
 0x47a   : > { %4354 = dma.vmem_to_hbm [thread:$0]  (%p4378_p3), %s3128_s13, 128, %s3130_s3, [#allocation6]  }
 0x47b   : > { %4709 = dma.done.wait (%p4378_p3), [#allocation6], 128  }
 0x47c   : > { %4711 = vsyncadd (%p4378_p3), [#allocation6], 4294967168 }
 0x47d PF: > { %s24_s10 = sadd.s32 1, %s4734_s10   ;;  %s6377_s27 = smov %s4718_s28 }
 0x47e   : > { %p21_p4 = scmp.ge.s32.totalorder %s24_s10, 4   ;;  %s6378_s28 = smov %s4722_s29 }
 0x47f   : > { %s6379_s29 = smov %s4877_s11  ;;  %s6380_s30 = smov %s4730_s9 }
 0x480   : > { %s6381_s9 = smov %s6383_s26  ;;  %23 = sbr.rel (!%p21_p4) target bundleno = 10 (0xa), region = 116 }
 0x485   :  { %3143 = vsyncpa [#allocation5], 1 }
 0x486   :  { %3145 = vsyncpa [#allocation5 + $0x1], 1 }
 0x487   :  { %3146 = vsyncpa [#allocation8], 1 }
 0x488   :  { %3147 = vsyncpa [#allocation11], 1 }
 0x489   :  { %3148 = vsyncpa [#allocation6], 1 }
 0x48a   :  { %3150 = vsyncpa [#allocation6 + $0x1], 1 }

</bundles_post_ra>
